<compile_context>
chip_gen: v6e
topology: v6e:2x2x1
jax: 0.10.0
libtpu: 0.0.40
codegen_flags: <defaults>
</compile_context>

<pallas_src>
import functools

import jax
import jax.numpy as jnp
from jax.experimental import pallas as pl
from jax.experimental.pallas import tpu as pltpu


# --------------------------------- kernel ------------------------------------

def net_fused_kernel(x_ref, m1_ref, b1_ref, s1e_ref, s1o_ref,
                     m2_ref, b2_ref, s2e_ref, s2o_ref,
                     f1_ref, fc1b_ref, fc2w_ref, fc2b_ref, o_ref):
    tb = x_ref.shape[0]
    cdt = m1_ref.dtype          # compute dtype for MXU matmuls (bf16)
    f32 = jnp.float32

    # ---- conv1 (1->10, k=5): 5 row-tap MXU matmuls over the W axis ----------
    # rows = (b, input row h), lanes of the result = j*10 + c  (j = out col)
    xr = x_ref[...].reshape(tb * 28, 28).astype(cdt)
    a1 = None
    for ki in range(5):
        y = jnp.dot(xr, m1_ref[ki], preferred_element_type=f32)      # [tb*28, 240]
        y = y.reshape(tb, 28, 240)[:, ki:ki + 24, :].reshape(tb * 24, 240)
        a1 = y if a1 is None else a1 + y
    a1 = a1 + b1_ref[...]                                            # [(b,i), j*10+c]

    # ---- maxpool 2x2 + relu --------------------------------------------------
    # row pairs via reshape/max, column pairs via 0/1 lane-selection matmuls
    a1 = a1.reshape(tb, 12, 2, 240)
    yi = jnp.maximum(a1[:, :, 0, :], a1[:, :, 1, :]).reshape(tb * 12, 240)
    p1 = jnp.maximum(
        jnp.maximum(jnp.dot(yi, s1e_ref[...], preferred_element_type=f32),
                    jnp.dot(yi, s1o_ref[...], preferred_element_type=f32)),
        0.0)                                                         # [(b,r), s*10+c]

    # ---- conv2 (10->20, k=5): 5 row-tap matmuls, K=120 ----------------------
    # TODO(synk): training-mode Dropout2d / F.dropout (stateful RNG masks) are
    # not implemented; this is the eval-mode forward where both are identity.
    p1b = p1.astype(cdt).reshape(tb, 12, 120)
    a2 = None
    for ki in range(5):
        pk = p1b[:, ki:ki + 8, :].reshape(tb * 8, 120)
        y = jnp.dot(pk, m2_ref[ki], preferred_element_type=f32)      # [tb*8, 160]
        a2 = y if a2 is None else a2 + y
    a2 = a2 + b2_ref[...]                                            # [(b,i), j*20+co]

    # ---- maxpool 2x2 + relu --------------------------------------------------
    a2 = a2.reshape(tb, 4, 2, 160)
    zi = jnp.maximum(a2[:, :, 0, :], a2[:, :, 1, :]).reshape(tb * 4, 160)
    p2 = jnp.maximum(
        jnp.maximum(jnp.dot(zi, s2e_ref[...], preferred_element_type=f32),
                    jnp.dot(zi, s2o_ref[...], preferred_element_type=f32)),
        0.0)                                                         # [(b,hh), ww*20+co]

    # ---- fc1 (320->50): 4 per-row-position matmuls + relu -------------------
    p2f = p2.reshape(tb, 4, 80)
    h = None
    for hh in range(4):
        part = jnp.dot(p2f[:, hh, :].astype(cdt), f1_ref[hh],
                       preferred_element_type=f32)                   # [tb, 50]
        h = part if h is None else h + part
    h = jnp.maximum(h + fc1b_ref[...], 0.0)

    # ---- fc2 (50->10) + log_softmax(dim=1) -----------------------------------
    z = jnp.dot(h.astype(cdt), fc2w_ref[...],
                preferred_element_type=f32) + fc2b_ref[...]          # [tb, 10]
    zmax = jnp.max(z, axis=-1, keepdims=True)
    lse = jnp.log(jnp.sum(jnp.exp(z - zmax), axis=-1, keepdims=True)) + zmax
    o_ref[...] = z - lse


# ------------------------------ weight packing --------------------------------

def _pack_params(p, compute_dtype):
    """Repack PyTorch-layout params into the kernel's MXU-friendly layouts.

    Tiny (a few KB of weights); traced once inside the jitted wrapper.
    """
    f32 = jnp.float32
    w1 = p["conv1_w"].astype(f32)      # [10, 1, 5, 5]
    w2 = p["conv2_w"].astype(f32)      # [20, 10, 5, 5]

    # conv1 row-tap matrices M1[ki]: [28, 240], out lane = j*10 + c
    lane1 = jnp.arange(240)
    j1, c1 = lane1 // 10, lane1 % 10
    wpos = jnp.arange(28)
    kj1 = wpos[:, None] - j1[None, :]                    # [28, 240]
    ok1 = (kj1 >= 0) & (kj1 < 5)
    kj1c = jnp.clip(kj1, 0, 4)
    m1 = jnp.stack([jnp.where(ok1, w1[c1[None, :], 0, ki, kj1c], 0.0)
                    for ki in range(5)]).astype(compute_dtype)       # [5, 28, 240]
    b1c = jnp.tile(p["conv1_b"].astype(f32), 24)[None, :]            # [1, 240]

    # pool1 column-pair selection matrices: [240, 120]
    il = jnp.arange(240); ij, ic = il // 10, il % 10
    ol = jnp.arange(120); oj, oc = ol // 10, ol % 10
    eq_c = ic[:, None] == oc[None, :]
    s1e = ((ij[:, None] == 2 * oj[None, :]) & eq_c).astype(f32)
    s1o = ((ij[:, None] == 2 * oj[None, :] + 1) & eq_c).astype(f32)

    # conv2 row-tap matrices M2[ki]: [120, 160], in lane = w*10+c, out = j*20+co
    il2 = jnp.arange(120); w2p, c2 = il2 // 10, il2 % 10
    ol2 = jnp.arange(160); j2, co2 = ol2 // 20, ol2 % 20
    kj2 = w2p[:, None] - j2[None, :]                     # [120, 160]
    ok2 = (kj2 >= 0) & (kj2 < 5)
    kj2c = jnp.clip(kj2, 0, 4)
    m2 = jnp.stack([jnp.where(ok2, w2[co2[None, :], c2[:, None], ki, kj2c], 0.0)
                    for ki in range(5)]).astype(compute_dtype)       # [5, 120, 160]
    b2c = jnp.tile(p["conv2_b"].astype(f32), 8)[None, :]             # [1, 160]

    # pool2 column-pair selection matrices: [160, 80]
    il3 = jnp.arange(160); ij3, ic3 = il3 // 20, il3 % 20
    ol3 = jnp.arange(80);  oj3, oc3 = ol3 // 20, ol3 % 20
    eq_c3 = ic3[:, None] == oc3[None, :]
    s2e = ((ij3[:, None] == 2 * oj3[None, :]) & eq_c3).astype(f32)
    s2o = ((ij3[:, None] == 2 * oj3[None, :] + 1) & eq_c3).astype(f32)

    # fc1: PyTorch flattens NCHW as (c, h, w); kernel rows are (b, hh) and lanes
    # are ww*20 + co, so gather per-hh weight blocks F1[hh]: [80, 50].
    fc1_w = p["fc1_w"].astype(f32)                       # [50, 320]
    il4 = jnp.arange(80); ww, cc = il4 // 20, il4 % 20
    f1 = jnp.stack([fc1_w[:, cc * 16 + hh * 4 + ww].T
                    for hh in range(4)]).astype(compute_dtype)       # [4, 80, 50]
    fc1b = p["fc1_b"].astype(f32)[None, :]                           # [1, 50]

    fc2w = p["fc2_w"].astype(f32).T.astype(compute_dtype)            # [50, 10]
    fc2b = p["fc2_b"].astype(f32)[None, :]                           # [1, 10]

    return m1, b1c, s1e, s1o, m2, b2c, s2e, s2o, f1, fc1b, fc2w, fc2b


# ------------------------------ host-side wrapper -----------------------------

@functools.partial(jax.jit, static_argnames=("tile_b", "compute_dtype"))
def net_forward(x, params, *, tile_b=64, compute_dtype=jnp.bfloat16):
    """x: [B,1,28,28] float32 -> log-probabilities [B,10] float32 (eval mode)."""
    B = x.shape[0]
    assert x.shape[1:] == (1, 28, 28), "Net requires 1x28x28 inputs (fc1 is 320-wide)"

    tile_b = max(1, min(int(tile_b), B))
    packed = _pack_params(params, compute_dtype)

    xk = x.reshape(B, 28, 28).astype(jnp.float32)        # squeeze channel dim
    Bp = pl.cdiv(B, tile_b) * tile_b
    if Bp != B:
        xk = jnp.pad(xk, ((0, Bp - B), (0, 0), (0, 0)))

    def _full(shape):
        nd = len(shape)
        return pl.BlockSpec(shape, lambda i, _nd=nd: (0,) * _nd)

    out = pl.pallas_call(
        net_fused_kernel,
        out_shape=jax.ShapeDtypeStruct((Bp, 10), jnp.float32),
        grid=(Bp // tile_b,),
        in_specs=[
            pl.BlockSpec((tile_b, 28, 28), lambda i: (i, 0, 0)),  # input images
            _full((5, 28, 240)),   # conv1 row-tap weights (bf16)
            _full((1, 240)),       # conv1 bias (interleaved)
            _full((240, 120)),     # pool1 even-column selector
            _full((240, 120)),     # pool1 odd-column selector
            _full((5, 120, 160)),  # conv2 row-tap weights (bf16)
            _full((1, 160)),       # conv2 bias (interleaved)
            _full((160, 80)),      # pool2 even-column selector
            _full((160, 80)),      # pool2 odd-column selector
            _full((4, 80, 50)),    # fc1 per-row-position weights (bf16)
            _full((1, 50)),        # fc1 bias
            _full((50, 10)),       # fc2 weight (bf16)
            _full((1, 10)),        # fc2 bias
        ],
        out_specs=pl.BlockSpec((tile_b, 10), lambda i: (i, 0)),
        compiler_params=pltpu.CompilerParams(
            dimension_semantics=("parallel",),
            vmem_limit_bytes=64 * 1024 * 1024),
    )(xk, *packed)

    return out[:B] if Bp != B else out


# --------------------------- pure-JAX reference (f32) -------------------------

def ref_forward(x, p):
    """Direct translation of the PyTorch Net forward (eval mode), f32."""
    B = x.shape[0]
    xx = x[:, 0].astype(jnp.float32)                                  # [B,28,28]
    a1 = jnp.zeros((B, 10, 24, 24), jnp.float32)
    for ki in range(5):
        for kj in range(5):
            a1 = a1 + (p["conv1_w"][None, :, 0, ki, kj, None, None]
                       * xx[:, None, ki:ki + 24, kj:kj + 24])
    a1 = a1 + p["conv1_b"][None, :, None, None]
    p1 = jnp.maximum(a1.reshape(B, 10, 12, 2, 12, 2).max(axis=(3, 5)), 0.0)
    a2 = jnp.zeros((B, 20, 8, 8), jnp.float32)
    for ki in range(5):
        for kj in range(5):
            a2 = a2 + jnp.einsum("bcij,oc->boij",
                                 p1[:, :, ki:ki + 8, kj:kj + 8],
                                 p["conv2_w"][:, :, ki, kj])
    a2 = a2 + p["conv2_b"][None, :, None, None]
    p2 = jnp.maximum(a2.reshape(B, 20, 4, 2, 4, 2).max(axis=(3, 5)), 0.0)
    h = jnp.maximum(p2.reshape(B, 320) @ p["fc1_w"].T + p["fc1_b"], 0.0)
    z = h @ p["fc2_w"].T + p["fc2_b"]
    return jax.nn.log_softmax(z, axis=1)


# --------------------------------- params ------------------------------------

def init_params(key):
    """PyTorch-layout parameters with nn.init-style U(-1/sqrt(fan_in), +)."""
    ks = jax.random.split(key, 8)

    def u(k, shape, fan_in):
        bound = 1.0 / jnp.sqrt(jnp.float32(fan_in))
        return jax.random.uniform(k, shape, jnp.float32, -bound, bound)

    return {
        "conv1_w": u(ks[0], (10, 1, 5, 5), 1 * 5 * 5),
        "conv1_b": u(ks[1], (10,), 1 * 5 * 5),
        "conv2_w": u(ks[2], (20, 10, 5, 5), 10 * 5 * 5),
        "conv2_b": u(ks[3], (20,), 10 * 5 * 5),
        "fc1_w": u(ks[4], (50, 320), 320),      # PyTorch [out, in]
        "fc1_b": u(ks[5], (50,), 320),
        "fc2_w": u(ks[6], (10, 50), 50),        # PyTorch [out, in]
        "fc2_b": u(ks[7], (10,), 50),
    }


if __name__ == "__main__":
    x = jax.random.normal(jax.random.PRNGKey(0), (2, 1, 28, 28), dtype=jnp.float32)
    params = init_params(jax.random.PRNGKey(42))

    out = jax.block_until_ready(net_forward(x, params))

    assert out.shape == (2, 10)
    assert bool(jnp.all(jnp.isfinite(out)))
    # log_softmax sanity: rows of exp(out) sum to ~1
    row_sums = jnp.exp(out).sum(axis=1)
    assert bool(jnp.all(jnp.abs(row_sums - 1.0) < 1e-4))

    # numerical parity vs pure-JAX f32 reference (bf16 matmuls -> small error)
    ref = ref_forward(x, params)
    max_err = float(jnp.max(jnp.abs(out - ref)))
    assert max_err < 5e-2, f"mismatch vs f32 reference: {max_err}"

    print("KERNEL_OK")
</pallas_src>

<mosaic_0001>
module attributes {stable_mosaic.version = 11 : i64} {
  func.func @net_fused_kernel(%arg0: i32, %arg1: memref<2x28x28xf32, #tpu.memory_space<vmem>>, %arg2: memref<5x28x240xbf16, #tpu.memory_space<vmem>>, %arg3: memref<1x240xf32, #tpu.memory_space<vmem>>, %arg4: memref<240x120xf32, #tpu.memory_space<vmem>>, %arg5: memref<240x120xf32, #tpu.memory_space<vmem>>, %arg6: memref<5x120x160xbf16, #tpu.memory_space<vmem>>, %arg7: memref<1x160xf32, #tpu.memory_space<vmem>>, %arg8: memref<160x80xf32, #tpu.memory_space<vmem>>, %arg9: memref<160x80xf32, #tpu.memory_space<vmem>>, %arg10: memref<4x80x50xbf16, #tpu.memory_space<vmem>>, %arg11: memref<1x50xf32, #tpu.memory_space<vmem>>, %arg12: memref<50x10xbf16, #tpu.memory_space<vmem>>, %arg13: memref<1x10xf32, #tpu.memory_space<vmem>>, %arg14: memref<2x10xf32, #tpu.memory_space<vmem>>) attributes {dimension_semantics = [#tpu.dimension_semantics<parallel>], iteration_bounds = array<i64: 1>, scalar_prefetch = 0 : i64, scratch_operands = 0 : i64, tpu.core_type = #tpu.core_type<tc>, window_params = [{transform_indices = @transform_0, window_bounds = array<i64: 2, 28, 28>}, {pipeline_mode = #tpu.pipeline_mode<synchronous>, transform_indices = @transform_1, window_bounds = array<i64: 5, 28, 240>}, {pipeline_mode = #tpu.pipeline_mode<synchronous>, transform_indices = @transform_2, window_bounds = array<i64: 1, 240>}, {pipeline_mode = #tpu.pipeline_mode<synchronous>, transform_indices = @transform_3, window_bounds = array<i64: 240, 120>}, {pipeline_mode = #tpu.pipeline_mode<synchronous>, transform_indices = @transform_4, window_bounds = array<i64: 240, 120>}, {pipeline_mode = #tpu.pipeline_mode<synchronous>, transform_indices = @transform_5, window_bounds = array<i64: 5, 120, 160>}, {pipeline_mode = #tpu.pipeline_mode<synchronous>, transform_indices = @transform_6, window_bounds = array<i64: 1, 160>}, {pipeline_mode = #tpu.pipeline_mode<synchronous>, transform_indices = @transform_7, window_bounds = array<i64: 160, 80>}, {pipeline_mode = #tpu.pipeline_mode<synchronous>, transform_indices = @transform_8, window_bounds = array<i64: 160, 80>}, {pipeline_mode = #tpu.pipeline_mode<synchronous>, transform_indices = @transform_9, window_bounds = array<i64: 4, 80, 50>}, {pipeline_mode = #tpu.pipeline_mode<synchronous>, transform_indices = @transform_10, window_bounds = array<i64: 1, 50>}, {pipeline_mode = #tpu.pipeline_mode<synchronous>, transform_indices = @transform_11, window_bounds = array<i64: 50, 10>}, {pipeline_mode = #tpu.pipeline_mode<synchronous>, transform_indices = @transform_12, window_bounds = array<i64: 1, 10>}, {transform_indices = @transform_13, window_bounds = array<i64: 2, 10>}]} {
    %c0 = arith.constant 0 : index
    %c0_0 = arith.constant 0 : index
    %c0_1 = arith.constant 0 : index
    %0 = vector.load %arg1[%c0, %c0_0, %c0_1] : memref<2x28x28xf32, #tpu.memory_space<vmem>>, vector<2x28x28xf32>
    %1 = vector.shape_cast %0 : vector<2x28x28xf32> to vector<56x28xf32>
    %2 = arith.truncf %1 : vector<56x28xf32> to vector<56x28xbf16>
    %c0_2 = arith.constant 0 : index
    %c0_3 = arith.constant 0 : index
    %c0_4 = arith.constant 0 : index
    %3 = vector.load %arg2[%c0_2, %c0_3, %c0_4] : memref<5x28x240xbf16, #tpu.memory_space<vmem>>, vector<1x28x240xbf16>
    %4 = vector.shape_cast %3 : vector<1x28x240xbf16> to vector<28x240xbf16>
    %cst = arith.constant dense<0.000000e+00> : vector<56x240xf32>
    %5 = tpu.matmul %2, %4, %cst {dimension_numbers = #tpu.dot_dimension_numbers<[1], [0], [0], [1], [0, 0, 1, 1], [], []>} : vector<56x28xbf16>, vector<28x240xbf16>, vector<56x240xf32> -> vector<56x240xf32>
    %6 = vector.shape_cast %5 : vector<56x240xf32> to vector<2x28x240xf32>
    %7 = vector.extract_strided_slice %6 {offsets = [0, 0, 0], sizes = [2, 24, 240], strides = [1, 1, 1]} : vector<2x28x240xf32> to vector<2x24x240xf32>
    %8 = vector.shape_cast %7 : vector<2x24x240xf32> to vector<48x240xf32>
    %c1 = arith.constant 1 : index
    %c0_5 = arith.constant 0 : index
    %c0_6 = arith.constant 0 : index
    %9 = vector.load %arg2[%c1, %c0_5, %c0_6] : memref<5x28x240xbf16, #tpu.memory_space<vmem>>, vector<1x28x240xbf16>
    %10 = vector.shape_cast %9 : vector<1x28x240xbf16> to vector<28x240xbf16>
    %cst_7 = arith.constant dense<0.000000e+00> : vector<56x240xf32>
    %11 = tpu.matmul %2, %10, %cst_7 {dimension_numbers = #tpu.dot_dimension_numbers<[1], [0], [0], [1], [0, 0, 1, 1], [], []>} : vector<56x28xbf16>, vector<28x240xbf16>, vector<56x240xf32> -> vector<56x240xf32>
    %12 = vector.shape_cast %11 : vector<56x240xf32> to vector<2x28x240xf32>
    %13 = vector.extract_strided_slice %12 {offsets = [0, 1, 0], sizes = [2, 24, 240], strides = [1, 1, 1]} : vector<2x28x240xf32> to vector<2x24x240xf32>
    %14 = vector.shape_cast %13 : vector<2x24x240xf32> to vector<48x240xf32>
    %15 = arith.addf %8, %14 : vector<48x240xf32>
    %c2 = arith.constant 2 : index
    %c0_8 = arith.constant 0 : index
    %c0_9 = arith.constant 0 : index
    %16 = vector.load %arg2[%c2, %c0_8, %c0_9] : memref<5x28x240xbf16, #tpu.memory_space<vmem>>, vector<1x28x240xbf16>
    %17 = vector.shape_cast %16 : vector<1x28x240xbf16> to vector<28x240xbf16>
    %cst_10 = arith.constant dense<0.000000e+00> : vector<56x240xf32>
    %18 = tpu.matmul %2, %17, %cst_10 {dimension_numbers = #tpu.dot_dimension_numbers<[1], [0], [0], [1], [0, 0, 1, 1], [], []>} : vector<56x28xbf16>, vector<28x240xbf16>, vector<56x240xf32> -> vector<56x240xf32>
    %19 = vector.shape_cast %18 : vector<56x240xf32> to vector<2x28x240xf32>
    %20 = vector.extract_strided_slice %19 {offsets = [0, 2, 0], sizes = [2, 24, 240], strides = [1, 1, 1]} : vector<2x28x240xf32> to vector<2x24x240xf32>
    %21 = vector.shape_cast %20 : vector<2x24x240xf32> to vector<48x240xf32>
    %22 = arith.addf %15, %21 : vector<48x240xf32>
    %c3 = arith.constant 3 : index
    %c0_11 = arith.constant 0 : index
    %c0_12 = arith.constant 0 : index
    %23 = vector.load %arg2[%c3, %c0_11, %c0_12] : memref<5x28x240xbf16, #tpu.memory_space<vmem>>, vector<1x28x240xbf16>
    %24 = vector.shape_cast %23 : vector<1x28x240xbf16> to vector<28x240xbf16>
    %cst_13 = arith.constant dense<0.000000e+00> : vector<56x240xf32>
    %25 = tpu.matmul %2, %24, %cst_13 {dimension_numbers = #tpu.dot_dimension_numbers<[1], [0], [0], [1], [0, 0, 1, 1], [], []>} : vector<56x28xbf16>, vector<28x240xbf16>, vector<56x240xf32> -> vector<56x240xf32>
    %26 = vector.shape_cast %25 : vector<56x240xf32> to vector<2x28x240xf32>
    %27 = vector.extract_strided_slice %26 {offsets = [0, 3, 0], sizes = [2, 24, 240], strides = [1, 1, 1]} : vector<2x28x240xf32> to vector<2x24x240xf32>
    %28 = vector.shape_cast %27 : vector<2x24x240xf32> to vector<48x240xf32>
    %29 = arith.addf %22, %28 : vector<48x240xf32>
    %c4 = arith.constant 4 : index
    %c0_14 = arith.constant 0 : index
    %c0_15 = arith.constant 0 : index
    %30 = vector.load %arg2[%c4, %c0_14, %c0_15] : memref<5x28x240xbf16, #tpu.memory_space<vmem>>, vector<1x28x240xbf16>
    %31 = vector.shape_cast %30 : vector<1x28x240xbf16> to vector<28x240xbf16>
    %cst_16 = arith.constant dense<0.000000e+00> : vector<56x240xf32>
    %32 = tpu.matmul %2, %31, %cst_16 {dimension_numbers = #tpu.dot_dimension_numbers<[1], [0], [0], [1], [0, 0, 1, 1], [], []>} : vector<56x28xbf16>, vector<28x240xbf16>, vector<56x240xf32> -> vector<56x240xf32>
    %33 = vector.shape_cast %32 : vector<56x240xf32> to vector<2x28x240xf32>
    %34 = vector.extract_strided_slice %33 {offsets = [0, 4, 0], sizes = [2, 24, 240], strides = [1, 1, 1]} : vector<2x28x240xf32> to vector<2x24x240xf32>
    %35 = vector.shape_cast %34 : vector<2x24x240xf32> to vector<48x240xf32>
    %36 = arith.addf %29, %35 : vector<48x240xf32>
    %c0_17 = arith.constant 0 : index
    %c0_18 = arith.constant 0 : index
    %37 = vector.load %arg3[%c0_17, %c0_18] : memref<1x240xf32, #tpu.memory_space<vmem>>, vector<1x240xf32>
    %38 = vector.broadcast %37 : vector<1x240xf32> to vector<48x240xf32>
    %39 = arith.addf %36, %38 : vector<48x240xf32>
    %40 = vector.shape_cast %39 : vector<48x240xf32> to vector<2x12x2x240xf32>
    %41 = vector.extract_strided_slice %40 {offsets = [0, 0, 0, 0], sizes = [2, 12, 1, 240], strides = [1, 1, 1, 1]} : vector<2x12x2x240xf32> to vector<2x12x1x240xf32>
    %42 = vector.shape_cast %41 : vector<2x12x1x240xf32> to vector<2x12x240xf32>
    %43 = vector.extract_strided_slice %40 {offsets = [0, 0, 1, 0], sizes = [2, 12, 1, 240], strides = [1, 1, 1, 1]} : vector<2x12x2x240xf32> to vector<2x12x1x240xf32>
    %44 = vector.shape_cast %43 : vector<2x12x1x240xf32> to vector<2x12x240xf32>
    %45 = arith.maximumf %42, %44 : vector<2x12x240xf32>
    %46 = vector.shape_cast %45 : vector<2x12x240xf32> to vector<24x240xf32>
    %c0_19 = arith.constant 0 : index
    %c0_20 = arith.constant 0 : index
    %47 = vector.load %arg4[%c0_19, %c0_20] : memref<240x120xf32, #tpu.memory_space<vmem>>, vector<240x120xf32>
    %cst_21 = arith.constant dense<0.000000e+00> : vector<24x120xf32>
    %48 = tpu.matmul %46, %47, %cst_21 {dimension_numbers = #tpu.dot_dimension_numbers<[1], [0], [0], [1], [0, 0, 1, 1], [], []>} : vector<24x240xf32>, vector<240x120xf32>, vector<24x120xf32> -> vector<24x120xf32>
    %c0_22 = arith.constant 0 : index
    %c0_23 = arith.constant 0 : index
    %49 = vector.load %arg5[%c0_22, %c0_23] : memref<240x120xf32, #tpu.memory_space<vmem>>, vector<240x120xf32>
    %cst_24 = arith.constant dense<0.000000e+00> : vector<24x120xf32>
    %50 = tpu.matmul %46, %49, %cst_24 {dimension_numbers = #tpu.dot_dimension_numbers<[1], [0], [0], [1], [0, 0, 1, 1], [], []>} : vector<24x240xf32>, vector<240x120xf32>, vector<24x120xf32> -> vector<24x120xf32>
    %51 = arith.maximumf %48, %50 : vector<24x120xf32>
    %cst_25 = arith.constant 0.000000e+00 : f32
    %52 = vector.broadcast %cst_25 : f32 to vector<24x120xf32>
    %53 = arith.maximumf %51, %52 : vector<24x120xf32>
    %54 = arith.truncf %53 : vector<24x120xf32> to vector<24x120xbf16>
    %55 = vector.shape_cast %54 : vector<24x120xbf16> to vector<2x12x120xbf16>
    %56 = vector.extract_strided_slice %55 {offsets = [0, 0, 0], sizes = [2, 8, 120], strides = [1, 1, 1]} : vector<2x12x120xbf16> to vector<2x8x120xbf16>
    %57 = vector.shape_cast %56 : vector<2x8x120xbf16> to vector<16x120xbf16>
    %c0_26 = arith.constant 0 : index
    %c0_27 = arith.constant 0 : index
    %c0_28 = arith.constant 0 : index
    %58 = vector.load %arg6[%c0_26, %c0_27, %c0_28] : memref<5x120x160xbf16, #tpu.memory_space<vmem>>, vector<1x120x160xbf16>
    %59 = vector.shape_cast %58 : vector<1x120x160xbf16> to vector<120x160xbf16>
    %cst_29 = arith.constant dense<0.000000e+00> : vector<16x160xf32>
    %60 = tpu.matmul %57, %59, %cst_29 {dimension_numbers = #tpu.dot_dimension_numbers<[1], [0], [0], [1], [0, 0, 1, 1], [], []>} : vector<16x120xbf16>, vector<120x160xbf16>, vector<16x160xf32> -> vector<16x160xf32>
    %61 = vector.extract_strided_slice %55 {offsets = [0, 1, 0], sizes = [2, 8, 120], strides = [1, 1, 1]} : vector<2x12x120xbf16> to vector<2x8x120xbf16>
    %62 = vector.shape_cast %61 : vector<2x8x120xbf16> to vector<16x120xbf16>
    %c1_30 = arith.constant 1 : index
    %c0_31 = arith.constant 0 : index
    %c0_32 = arith.constant 0 : index
    %63 = vector.load %arg6[%c1_30, %c0_31, %c0_32] : memref<5x120x160xbf16, #tpu.memory_space<vmem>>, vector<1x120x160xbf16>
    %64 = vector.shape_cast %63 : vector<1x120x160xbf16> to vector<120x160xbf16>
    %cst_33 = arith.constant dense<0.000000e+00> : vector<16x160xf32>
    %65 = tpu.matmul %62, %64, %cst_33 {dimension_numbers = #tpu.dot_dimension_numbers<[1], [0], [0], [1], [0, 0, 1, 1], [], []>} : vector<16x120xbf16>, vector<120x160xbf16>, vector<16x160xf32> -> vector<16x160xf32>
    %66 = arith.addf %60, %65 : vector<16x160xf32>
    %67 = vector.extract_strided_slice %55 {offsets = [0, 2, 0], sizes = [2, 8, 120], strides = [1, 1, 1]} : vector<2x12x120xbf16> to vector<2x8x120xbf16>
    %68 = vector.shape_cast %67 : vector<2x8x120xbf16> to vector<16x120xbf16>
    %c2_34 = arith.constant 2 : index
    %c0_35 = arith.constant 0 : index
    %c0_36 = arith.constant 0 : index
    %69 = vector.load %arg6[%c2_34, %c0_35, %c0_36] : memref<5x120x160xbf16, #tpu.memory_space<vmem>>, vector<1x120x160xbf16>
    %70 = vector.shape_cast %69 : vector<1x120x160xbf16> to vector<120x160xbf16>
    %cst_37 = arith.constant dense<0.000000e+00> : vector<16x160xf32>
    %71 = tpu.matmul %68, %70, %cst_37 {dimension_numbers = #tpu.dot_dimension_numbers<[1], [0], [0], [1], [0, 0, 1, 1], [], []>} : vector<16x120xbf16>, vector<120x160xbf16>, vector<16x160xf32> -> vector<16x160xf32>
    %72 = arith.addf %66, %71 : vector<16x160xf32>
    %73 = vector.extract_strided_slice %55 {offsets = [0, 3, 0], sizes = [2, 8, 120], strides = [1, 1, 1]} : vector<2x12x120xbf16> to vector<2x8x120xbf16>
    %74 = vector.shape_cast %73 : vector<2x8x120xbf16> to vector<16x120xbf16>
    %c3_38 = arith.constant 3 : index
    %c0_39 = arith.constant 0 : index
    %c0_40 = arith.constant 0 : index
    %75 = vector.load %arg6[%c3_38, %c0_39, %c0_40] : memref<5x120x160xbf16, #tpu.memory_space<vmem>>, vector<1x120x160xbf16>
    %76 = vector.shape_cast %75 : vector<1x120x160xbf16> to vector<120x160xbf16>
    %cst_41 = arith.constant dense<0.000000e+00> : vector<16x160xf32>
    %77 = tpu.matmul %74, %76, %cst_41 {dimension_numbers = #tpu.dot_dimension_numbers<[1], [0], [0], [1], [0, 0, 1, 1], [], []>} : vector<16x120xbf16>, vector<120x160xbf16>, vector<16x160xf32> -> vector<16x160xf32>
    %78 = arith.addf %72, %77 : vector<16x160xf32>
    %79 = vector.extract_strided_slice %55 {offsets = [0, 4, 0], sizes = [2, 8, 120], strides = [1, 1, 1]} : vector<2x12x120xbf16> to vector<2x8x120xbf16>
    %80 = vector.shape_cast %79 : vector<2x8x120xbf16> to vector<16x120xbf16>
    %c4_42 = arith.constant 4 : index
    %c0_43 = arith.constant 0 : index
    %c0_44 = arith.constant 0 : index
    %81 = vector.load %arg6[%c4_42, %c0_43, %c0_44] : memref<5x120x160xbf16, #tpu.memory_space<vmem>>, vector<1x120x160xbf16>
    %82 = vector.shape_cast %81 : vector<1x120x160xbf16> to vector<120x160xbf16>
    %cst_45 = arith.constant dense<0.000000e+00> : vector<16x160xf32>
    %83 = tpu.matmul %80, %82, %cst_45 {dimension_numbers = #tpu.dot_dimension_numbers<[1], [0], [0], [1], [0, 0, 1, 1], [], []>} : vector<16x120xbf16>, vector<120x160xbf16>, vector<16x160xf32> -> vector<16x160xf32>
    %84 = arith.addf %78, %83 : vector<16x160xf32>
    %c0_46 = arith.constant 0 : index
    %c0_47 = arith.constant 0 : index
    %85 = vector.load %arg7[%c0_46, %c0_47] : memref<1x160xf32, #tpu.memory_space<vmem>>, vector<1x160xf32>
    %86 = vector.broadcast %85 : vector<1x160xf32> to vector<16x160xf32>
    %87 = arith.addf %84, %86 : vector<16x160xf32>
    %88 = vector.shape_cast %87 : vector<16x160xf32> to vector<2x4x2x160xf32>
    %89 = vector.extract_strided_slice %88 {offsets = [0, 0, 0, 0], sizes = [2, 4, 1, 160], strides = [1, 1, 1, 1]} : vector<2x4x2x160xf32> to vector<2x4x1x160xf32>
    %90 = vector.shape_cast %89 : vector<2x4x1x160xf32> to vector<2x4x160xf32>
    %91 = vector.extract_strided_slice %88 {offsets = [0, 0, 1, 0], sizes = [2, 4, 1, 160], strides = [1, 1, 1, 1]} : vector<2x4x2x160xf32> to vector<2x4x1x160xf32>
    %92 = vector.shape_cast %91 : vector<2x4x1x160xf32> to vector<2x4x160xf32>
    %93 = arith.maximumf %90, %92 : vector<2x4x160xf32>
    %94 = vector.shape_cast %93 : vector<2x4x160xf32> to vector<8x160xf32>
    %c0_48 = arith.constant 0 : index
    %c0_49 = arith.constant 0 : index
    %95 = vector.load %arg8[%c0_48, %c0_49] : memref<160x80xf32, #tpu.memory_space<vmem>>, vector<160x80xf32>
    %cst_50 = arith.constant dense<0.000000e+00> : vector<8x80xf32>
    %96 = tpu.matmul %94, %95, %cst_50 {dimension_numbers = #tpu.dot_dimension_numbers<[1], [0], [0], [1], [0, 0, 1, 1], [], []>} : vector<8x160xf32>, vector<160x80xf32>, vector<8x80xf32> -> vector<8x80xf32>
    %c0_51 = arith.constant 0 : index
    %c0_52 = arith.constant 0 : index
    %97 = vector.load %arg9[%c0_51, %c0_52] : memref<160x80xf32, #tpu.memory_space<vmem>>, vector<160x80xf32>
    %cst_53 = arith.constant dense<0.000000e+00> : vector<8x80xf32>
    %98 = tpu.matmul %94, %97, %cst_53 {dimension_numbers = #tpu.dot_dimension_numbers<[1], [0], [0], [1], [0, 0, 1, 1], [], []>} : vector<8x160xf32>, vector<160x80xf32>, vector<8x80xf32> -> vector<8x80xf32>
    %99 = arith.maximumf %96, %98 : vector<8x80xf32>
    %cst_54 = arith.constant 0.000000e+00 : f32
    %100 = vector.broadcast %cst_54 : f32 to vector<8x80xf32>
    %101 = arith.maximumf %99, %100 : vector<8x80xf32>
    %102 = vector.shape_cast %101 : vector<8x80xf32> to vector<2x4x80xf32>
    %103 = vector.extract_strided_slice %102 {offsets = [0, 0, 0], sizes = [2, 1, 80], strides = [1, 1, 1]} : vector<2x4x80xf32> to vector<2x1x80xf32>
    %104 = vector.shape_cast %103 : vector<2x1x80xf32> to vector<2x80xf32>
    %105 = arith.truncf %104 : vector<2x80xf32> to vector<2x80xbf16>
    %c0_55 = arith.constant 0 : index
    %c0_56 = arith.constant 0 : index
    %c0_57 = arith.constant 0 : index
    %106 = vector.load %arg10[%c0_55, %c0_56, %c0_57] : memref<4x80x50xbf16, #tpu.memory_space<vmem>>, vector<1x80x50xbf16>
    %107 = vector.shape_cast %106 : vector<1x80x50xbf16> to vector<80x50xbf16>
    %cst_58 = arith.constant dense<0.000000e+00> : vector<2x50xf32>
    %108 = tpu.matmul %105, %107, %cst_58 {dimension_numbers = #tpu.dot_dimension_numbers<[1], [0], [0], [1], [0, 0, 1, 1], [], []>} : vector<2x80xbf16>, vector<80x50xbf16>, vector<2x50xf32> -> vector<2x50xf32>
    %109 = vector.extract_strided_slice %102 {offsets = [0, 1, 0], sizes = [2, 1, 80], strides = [1, 1, 1]} : vector<2x4x80xf32> to vector<2x1x80xf32>
    %110 = vector.shape_cast %109 : vector<2x1x80xf32> to vector<2x80xf32>
    %111 = arith.truncf %110 : vector<2x80xf32> to vector<2x80xbf16>
    %c1_59 = arith.constant 1 : index
    %c0_60 = arith.constant 0 : index
    %c0_61 = arith.constant 0 : index
    %112 = vector.load %arg10[%c1_59, %c0_60, %c0_61] : memref<4x80x50xbf16, #tpu.memory_space<vmem>>, vector<1x80x50xbf16>
    %113 = vector.shape_cast %112 : vector<1x80x50xbf16> to vector<80x50xbf16>
    %cst_62 = arith.constant dense<0.000000e+00> : vector<2x50xf32>
    %114 = tpu.matmul %111, %113, %cst_62 {dimension_numbers = #tpu.dot_dimension_numbers<[1], [0], [0], [1], [0, 0, 1, 1], [], []>} : vector<2x80xbf16>, vector<80x50xbf16>, vector<2x50xf32> -> vector<2x50xf32>
    %115 = arith.addf %108, %114 : vector<2x50xf32>
    %116 = vector.extract_strided_slice %102 {offsets = [0, 2, 0], sizes = [2, 1, 80], strides = [1, 1, 1]} : vector<2x4x80xf32> to vector<2x1x80xf32>
    %117 = vector.shape_cast %116 : vector<2x1x80xf32> to vector<2x80xf32>
    %118 = arith.truncf %117 : vector<2x80xf32> to vector<2x80xbf16>
    %c2_63 = arith.constant 2 : index
    %c0_64 = arith.constant 0 : index
    %c0_65 = arith.constant 0 : index
    %119 = vector.load %arg10[%c2_63, %c0_64, %c0_65] : memref<4x80x50xbf16, #tpu.memory_space<vmem>>, vector<1x80x50xbf16>
    %120 = vector.shape_cast %119 : vector<1x80x50xbf16> to vector<80x50xbf16>
    %cst_66 = arith.constant dense<0.000000e+00> : vector<2x50xf32>
    %121 = tpu.matmul %118, %120, %cst_66 {dimension_numbers = #tpu.dot_dimension_numbers<[1], [0], [0], [1], [0, 0, 1, 1], [], []>} : vector<2x80xbf16>, vector<80x50xbf16>, vector<2x50xf32> -> vector<2x50xf32>
    %122 = arith.addf %115, %121 : vector<2x50xf32>
    %123 = vector.extract_strided_slice %102 {offsets = [0, 3, 0], sizes = [2, 1, 80], strides = [1, 1, 1]} : vector<2x4x80xf32> to vector<2x1x80xf32>
    %124 = vector.shape_cast %123 : vector<2x1x80xf32> to vector<2x80xf32>
    %125 = arith.truncf %124 : vector<2x80xf32> to vector<2x80xbf16>
    %c3_67 = arith.constant 3 : index
    %c0_68 = arith.constant 0 : index
    %c0_69 = arith.constant 0 : index
    %126 = vector.load %arg10[%c3_67, %c0_68, %c0_69] : memref<4x80x50xbf16, #tpu.memory_space<vmem>>, vector<1x80x50xbf16>
    %127 = vector.shape_cast %126 : vector<1x80x50xbf16> to vector<80x50xbf16>
    %cst_70 = arith.constant dense<0.000000e+00> : vector<2x50xf32>
    %128 = tpu.matmul %125, %127, %cst_70 {dimension_numbers = #tpu.dot_dimension_numbers<[1], [0], [0], [1], [0, 0, 1, 1], [], []>} : vector<2x80xbf16>, vector<80x50xbf16>, vector<2x50xf32> -> vector<2x50xf32>
    %129 = arith.addf %122, %128 : vector<2x50xf32>
    %c0_71 = arith.constant 0 : index
    %c0_72 = arith.constant 0 : index
    %130 = vector.load %arg11[%c0_71, %c0_72] : memref<1x50xf32, #tpu.memory_space<vmem>>, vector<1x50xf32>
    %131 = vector.broadcast %130 : vector<1x50xf32> to vector<2x50xf32>
    %132 = arith.addf %129, %131 : vector<2x50xf32>
    %cst_73 = arith.constant 0.000000e+00 : f32
    %133 = vector.broadcast %cst_73 : f32 to vector<2x50xf32>
    %134 = arith.maximumf %132, %133 : vector<2x50xf32>
    %135 = arith.truncf %134 : vector<2x50xf32> to vector<2x50xbf16>
    %c0_74 = arith.constant 0 : index
    %c0_75 = arith.constant 0 : index
    %136 = vector.load %arg12[%c0_74, %c0_75] : memref<50x10xbf16, #tpu.memory_space<vmem>>, vector<50x10xbf16>
    %cst_76 = arith.constant dense<0.000000e+00> : vector<2x10xf32>
    %137 = tpu.matmul %135, %136, %cst_76 {dimension_numbers = #tpu.dot_dimension_numbers<[1], [0], [0], [1], [0, 0, 1, 1], [], []>} : vector<2x50xbf16>, vector<50x10xbf16>, vector<2x10xf32> -> vector<2x10xf32>
    %c0_77 = arith.constant 0 : index
    %c0_78 = arith.constant 0 : index
    %138 = vector.load %arg13[%c0_77, %c0_78] : memref<1x10xf32, #tpu.memory_space<vmem>>, vector<1x10xf32>
    %139 = vector.broadcast %138 : vector<1x10xf32> to vector<2x10xf32>
    %140 = arith.addf %137, %139 : vector<2x10xf32>
    %cst_79 = arith.constant dense<0xFF800000> : vector<2xf32>
    %141 = vector.multi_reduction <maximumf>, %140, %cst_79 [1] : vector<2x10xf32> to vector<2xf32>
    %142 = vector.shape_cast %141 : vector<2xf32> to vector<2x1xf32>
    %143 = vector.broadcast %142 : vector<2x1xf32> to vector<2x10xf32>
    %144 = arith.subf %140, %143 : vector<2x10xf32>
    %145 = math.exp %144 : vector<2x10xf32>
    %cst_80 = arith.constant dense<0.000000e+00> : vector<2xf32>
    %146 = vector.multi_reduction <add>, %145, %cst_80 [1] : vector<2x10xf32> to vector<2xf32>
    %147 = vector.shape_cast %146 : vector<2xf32> to vector<2x1xf32>
    %148 = math.log %147 : vector<2x1xf32>
    %149 = arith.addf %148, %142 : vector<2x1xf32>
    %150 = vector.broadcast %149 : vector<2x1xf32> to vector<2x10xf32>
    %151 = arith.subf %140, %150 : vector<2x10xf32>
    %c0_81 = arith.constant 0 : index
    %c0_82 = arith.constant 0 : index
    %152 = vector.load %arg14[%c0_81, %c0_82] : memref<2x10xf32, #tpu.memory_space<vmem>>, vector<2x10xf32>
    tpu.vector_store %arg14[%c0_81, %c0_82], %151 {strides = array<i32>} : memref<2x10xf32, #tpu.memory_space<vmem>>, vector<2x10xf32>,
    return
  }
  func.func @transform_0(%arg0: i32) -> (i32, i32, i32) {
    %c0_i32 = arith.constant 0 : i32
    %c0_i32_0 = arith.constant 0 : i32
    %c0_i32_1 = arith.constant 0 : i32
    return %arg0, %c0_i32, %c0_i32_0 : i32, i32, i32
  }
  func.func @transform_1(%arg0: i32) -> (i32, i32, i32) {
    %c0_i32 = arith.constant 0 : i32
    %c0_i32_0 = arith.constant 0 : i32
    %c0_i32_1 = arith.constant 0 : i32
    %c0_i32_2 = arith.constant 0 : i32
    return %c0_i32, %c0_i32_0, %c0_i32_1 : i32, i32, i32
  }
  func.func @transform_2(%arg0: i32) -> (i32, i32) {
    %c0_i32 = arith.constant 0 : i32
    %c0_i32_0 = arith.constant 0 : i32
    %c0_i32_1 = arith.constant 0 : i32
    return %c0_i32, %c0_i32_0 : i32, i32
  }
  func.func @transform_3(%arg0: i32) -> (i32, i32) {
    %c0_i32 = arith.constant 0 : i32
    %c0_i32_0 = arith.constant 0 : i32
    %c0_i32_1 = arith.constant 0 : i32
    return %c0_i32, %c0_i32_0 : i32, i32
  }
  func.func @transform_4(%arg0: i32) -> (i32, i32) {
    %c0_i32 = arith.constant 0 : i32
    %c0_i32_0 = arith.constant 0 : i32
    %c0_i32_1 = arith.constant 0 : i32
    return %c0_i32, %c0_i32_0 : i32, i32
  }
  func.func @transform_5(%arg0: i32) -> (i32, i32, i32) {
    %c0_i32 = arith.constant 0 : i32
    %c0_i32_0 = arith.constant 0 : i32
    %c0_i32_1 = arith.constant 0 : i32
    %c0_i32_2 = arith.constant 0 : i32
    return %c0_i32, %c0_i32_0, %c0_i32_1 : i32, i32, i32
  }
  func.func @transform_6(%arg0: i32) -> (i32, i32) {
    %c0_i32 = arith.constant 0 : i32
    %c0_i32_0 = arith.constant 0 : i32
    %c0_i32_1 = arith.constant 0 : i32
    return %c0_i32, %c0_i32_0 : i32, i32
  }
  func.func @transform_7(%arg0: i32) -> (i32, i32) {
    %c0_i32 = arith.constant 0 : i32
    %c0_i32_0 = arith.constant 0 : i32
    %c0_i32_1 = arith.constant 0 : i32
    return %c0_i32, %c0_i32_0 : i32, i32
  }
  func.func @transform_8(%arg0: i32) -> (i32, i32) {
    %c0_i32 = arith.constant 0 : i32
    %c0_i32_0 = arith.constant 0 : i32
    %c0_i32_1 = arith.constant 0 : i32
    return %c0_i32, %c0_i32_0 : i32, i32
  }
  func.func @transform_9(%arg0: i32) -> (i32, i32, i32) {
    %c0_i32 = arith.constant 0 : i32
    %c0_i32_0 = arith.constant 0 : i32
    %c0_i32_1 = arith.constant 0 : i32
    %c0_i32_2 = arith.constant 0 : i32
    return %c0_i32, %c0_i32_0, %c0_i32_1 : i32, i32, i32
  }
  func.func @transform_10(%arg0: i32) -> (i32, i32) {
    %c0_i32 = arith.constant 0 : i32
    %c0_i32_0 = arith.constant 0 : i32
    %c0_i32_1 = arith.constant 0 : i32
    return %c0_i32, %c0_i32_0 : i32, i32
  }
  func.func @transform_11(%arg0: i32) -> (i32, i32) {
    %c0_i32 = arith.constant 0 : i32
    %c0_i32_0 = arith.constant 0 : i32
    %c0_i32_1 = arith.constant 0 : i32
    return %c0_i32, %c0_i32_0 : i32, i32
  }
  func.func @transform_12(%arg0: i32) -> (i32, i32) {
    %c0_i32 = arith.constant 0 : i32
    %c0_i32_0 = arith.constant 0 : i32
    %c0_i32_1 = arith.constant 0 : i32
    return %c0_i32, %c0_i32_0 : i32, i32
  }
  func.func @transform_13(%arg0: i32) -> (i32, i32) {
    %c0_i32 = arith.constant 0 : i32
    %c0_i32_0 = arith.constant 0 : i32
    return %arg0, %c0_i32 : i32, i32
  }
}

</mosaic_0001>

<bundles_post_ra>
// kernel: tile.13
= control target key start
LH: loop header
LB: loop body
LE: loop exit
PB: predicated region body
PF: predicated region fallthrough
CT: control target
= control target key end

     0   :  { %s34_s0 = inlined_call_operand.vmem [shape: f32[10], index: 0, kind: input, shape index: {}]   ;;  %s35_s1 = inlined_call_operand.vmem [shape: f32[24,10], index: 1, kind: output, shape index: {}]  }
   0x1   :  { %v4_v0 = vld [vmem:[%s34_s0] ss:$0 sm:$0xff] }
   0x2   :  { %5 = vst [vmem:[%s35_s1] sm:$0xff] %v4_v0  ;;  %10 = vst [vmem:[%s35_s1 + $0x8] sm:$0xff] %v4_v0 }
   0x3   :  { %11 = vst [vmem:[%s35_s1 + $0x10] sm:$0xff] %v4_v0 }

// kernel: tile.14
= control target key start
LH: loop header
LB: loop body
LE: loop exit
PB: predicated region body
PF: predicated region fallthrough
CT: control target
= control target key end

     0   :  { %vm9_vm0 = vcmask 64512   ;;  %s223_s12 = smov 120   ;;  %s224_s13 = smov 102   ;;  %vm3_vm1 = vcmask 80896   ;;  %vm13_vm2 = vcmask 15360   ;;  %vm16_vm3 = vcmask 1048512   ;;  %s337_s0 = inlined_call_operand.vmem [shape: f32[24,10], index: 0, kind: input, shape index: {}]   ;;  %s338_s1 = inlined_call_operand.vmem [shape: f32[1,240], index: 1, kind: output, shape index: {}]  }
   0x1   :  { %v175_v0 = vld [vmem:[%s337_s0 + $0xc] sm:$0x1]   ;;  %v178_v3 = vld [vmem:[%s337_s0 + $0x17] sm:$0x1]   ;;  %v177_v4 = vld [vmem:[%s337_s0 + $0xb] sm:$0x1]  }
   0x2   :  { %v176_v1 = vld [vmem:[%s337_s0 + $0xc] sm:$0x1]   ;;  %26 = vrot.lane.b32.xlu1 %v178_v3, %s224_s13  ;;  %v179_v5 = vld [vmem:[%s337_s0 + $0xa] sm:$0x1]   ;;  %s225_s18 = smov 110   ;;  %s226_s19 = smov 100  }
   0x3   :  { %v10_v2 = vsel %vm9_vm0, %v176_v1, %v175_v0  ;;  %v180_v6 = vld [vmem:[%s337_s0 + $0x16] sm:$0x1]   ;;  %v181_v7 = vld [vmem:[%s337_s0 + $0x9] sm:$0x1]   ;;  %s227_s24 = smov 92   ;;  %s228_s25 = smov 90  }
   0x4   :  { %11 = vrot.lane.b32.xlu0 %v10_v2, %s223_s12  ;;  %v182_v8 = vld [vmem:[%s337_s0 + $0x15] sm:$0x1]   ;;  %v183_v9 = vld [vmem:[%s337_s0 + $0x8] sm:$0x1]   ;;  %v2_v10 = vld [vmem:[%s337_s0] sm:$0x1]  }
   0x5   :  { %4 = vst.msk [vmem:[#allocation0] sm:$0x1] %vm3_vm1, %v2_v10   ;;  %s229_s3 = smov 82   ;;  %s230_s4 = smov 80   ;;  %v184_v11 = vld [vmem:[%s337_s0 + $0x14] sm:$0x1]  }
   0x6   :  { %33 = vrot.lane.b32.xlu1 %v179_v5, %s226_s19  ;;  %v185_v12 = vld [vmem:[%s337_s0 + $0x7] sm:$0x1]   ;;  %s231_s9 = smov 72   ;;  %s232_s10 = smov 70   ;;  %v186_v13 = vld [vmem:[%s337_s0 + $0x13] sm:$0x1]  }
   0x7   :  { %v187_v14 = vld [vmem:[%s337_s0 + $0x6] sm:$0x1]   ;;  %s233_s15 = smov 62   ;;  %s234_s16 = smov 60   ;;  %v188_v15 = vld [vmem:[%s337_s0 + $0x12] sm:$0x1]  }
   0x8   :  { %20 = vrot.lane.b32.xlu0 %v177_v4, %s225_s18  ;;  %v189_v16 = vld [vmem:[%s337_s0 + $0x5] sm:$0x1]   ;;  %s235_s21 = smov 52   ;;  %s236_s22 = smov 50   ;;  %v190_v17 = vld [vmem:[%s337_s0 + $0x11] sm:$0x1]  }
   0x9   :  { %v191_v18 = vld [vmem:[%s337_s0 + $0x4] sm:$0x1]   ;;  %s237_s27 = smov 42   ;;  %s238_s28 = smov 40   ;;  %v192_v19 = vld [vmem:[%s337_s0 + $0x10] sm:$0x1]  }
   0xa   :  { %46 = vrot.lane.b32.xlu1 %v181_v7, %s228_s25  ;;  %v193_v20 = vld [vmem:[%s337_s0 + $0x3] sm:$0x1]   ;;  %s240_s5 = smov 30   ;;  %v194_v21 = vld [vmem:[%s337_s0 + $0xf] sm:$0x1]   ;;  %s242_s11 = smov 20  }
   0xb   :  { %v195_v22 = vld [vmem:[%s337_s0 + $0x2] sm:$0x1]   ;;  %v196_v23 = vld [vmem:[%s337_s0 + $0xe] sm:$0x1]   ;;  %v197_v24 = vld [vmem:[%s337_s0 + $0x1] sm:$0x1]  }
   0xc   :  { %39 = vrot.lane.b32.xlu0 %v180_v6, %s227_s24  ;;  %s244_s17 = smov 10   ;;  %v198_v25 = vld [vmem:[%s337_s0 + $0xd] sm:$0x1]   ;;  %s245_s0 = smov 2   ;;  %vm28_vm4 = vcmask 917296   ;;  %vm22_vm5 = vcmask 982896  }
   0xd   :  { %vm35_vm6 = vcmask 900896   ;;  %vm41_vm7 = vcmask 835296   ;;  %vm48_vm8 = vcmask 818896   ;;  %vm54_vm9 = vcmask 753296  }
   0xe   :  { %59 = vrot.lane.b32.xlu1 %v183_v9, %s230_s4  ;;  %s239_s4 = smov 32   ;;  %vm61_vm10 = vcmask 736896   ;;  %vm67_vm11 = vcmask 671296   ;;  %vm74_vm12 = vcmask 654896   ;;  %vm80_vm13 = vcmask 589296  }
   0xf   :  { %vm87_vm14 = vcmask 572896   ;;  %vm93_vm15 = vcmask 507296   ;;  %vm100_vm0 = vcmask 490896   ;;  %vm106_vm1 = vcmask 425296  }
  0x10   :  { %52 = vrot.lane.b32.xlu0 %v182_v8, %s229_s3 }
  0x12   :  { %72 = vrot.lane.b32.xlu1 %v185_v12, %s232_s10  ;;  %s241_s10 = smov 22  }
  0x14   :  { %65 = vrot.lane.b32.xlu0 %v184_v11, %s231_s9 }
  0x16   :  { %85 = vrot.lane.b32.xlu1 %v187_v14, %s234_s16  ;;  %s243_s16 = smov 12  }
  0x18   :  { %78 = vrot.lane.b32.xlu0 %v186_v13, %s233_s15 }
  0x1a   :  { %98 = vrot.lane.b32.xlu1 %v189_v16, %s236_s22 }
  0x1c   :  { %91 = vrot.lane.b32.xlu0 %v188_v15, %s235_s21 }
  0x1e   :  { %111 = vrot.lane.b32.xlu1 %v191_v18, %s238_s28 }
  0x20   :  { %104 = vrot.lane.b32.xlu0 %v190_v17, %s237_s27 }
  0x22   :  { %124 = vrot.lane.b32.xlu1 %v193_v20, %s240_s5 }
  0x24   :  { %117 = vrot.lane.b32.xlu0 %v192_v19, %s239_s4 }
  0x26   :  { %137 = vrot.lane.b32.xlu1 %v195_v22, %s242_s11 }
  0x28   :  { %130 = vrot.lane.b32.xlu0 %v194_v21, %s241_s10 }
  0x2a   :  { %150 = vrot.lane.b32.xlu1 %v197_v24, %s244_s17 }
  0x2c   :  { %143 = vrot.lane.b32.xlu0 %v196_v23, %s243_s16 }
  0x30   :  { %156 = vrot.lane.b32.xlu0 %v198_v25, %s245_s0 }
  0x74   :  { %v27_v27 = vpop.permute.xlu1 %26  }
  0x76   :  { %v12_v26 = vpop.permute.xlu0 %11  }
  0x77   :  { %15 = vst.msk [vmem:[#allocation0 + $0x8] sm:$0x1] %vm13_vm2, %v12_v26   ;;  %vm113_vm2 = vcmask 408896  }
  0x78   :  { %17 = vst.msk [vmem:[#allocation0] sm:$0x1] %vm16_vm3, %v12_v26   ;;  %v34_v29 = vpop.permute.xlu1 %33   ;;  %vm119_vm3 = vcmask 343296  }
  0x79   :  { %30 = vst.msk [vmem:[#allocation0 + $0x8] sm:$0x1] %vm28_vm4, %v27_v27   ;;  %vm126_vm4 = vcmask 326896  }
  0x7a   :  { %v21_v28 = vpop.permute.xlu0 %20  }
  0x7b   :  { %23 = vst.msk [vmem:[#allocation0] sm:$0x1] %vm22_vm5, %v21_v28   ;;  %vm132_vm5 = vcmask 261296  }
  0x7c   :  { %36 = vst.msk [vmem:[#allocation0] sm:$0x1] %vm35_vm6, %v34_v29   ;;  %v47_v31 = vpop.permute.xlu1 %46   ;;  %vm139_vm6 = vcmask 244896  }
  0x7d   :  { %49 = vst.msk [vmem:[#allocation0] sm:$0x1] %vm48_vm8, %v47_v31   ;;  %vm152_vm8 = vcmask 162896  }
  0x7e   :  { %v40_v30 = vpop.permute.xlu0 %39  }
  0x7f   :  { %43 = vst.msk [vmem:[#allocation0 + $0x8] sm:$0x1] %vm41_vm7, %v40_v30   ;;  %vm145_vm7 = vcmask 179296  }
  0x80   :  { %v60_v33 = vpop.permute.xlu1 %59  }
  0x81   :  { %62 = vst.msk [vmem:[#allocation0] sm:$0x1] %vm61_vm10, %v60_v33  }
  0x82   :  { %v53_v32 = vpop.permute.xlu0 %52  }
  0x83   :  { %56 = vst.msk [vmem:[#allocation0 + $0x8] sm:$0x1] %vm54_vm9, %v53_v32   ;;  %vm158_vm9 = vcmask 97296  }
  0x84   :  { %v73_v35 = vpop.permute.xlu1 %72  }
  0x85   :  { %75 = vst.msk [vmem:[#allocation0] sm:$0x1] %vm74_vm12, %v73_v35  }
  0x86   :  { %v66_v34 = vpop.permute.xlu0 %65  }
  0x87   :  { %69 = vst.msk [vmem:[#allocation0 + $0x8] sm:$0x1] %vm67_vm11, %v66_v34  }
  0x88   :  { %v86_v37 = vpop.permute.xlu1 %85  }
  0x89   :  { %88 = vst.msk [vmem:[#allocation0] sm:$0x1] %vm87_vm14, %v86_v37  }
  0x8a   :  { %v79_v36 = vpop.permute.xlu0 %78  }
  0x8b   :  { %82 = vst.msk [vmem:[#allocation0 + $0x8] sm:$0x1] %vm80_vm13, %v79_v36  }
  0x8c   :  { %v99_v39 = vpop.permute.xlu1 %98  }
  0x8d   :  { %101 = vst.msk [vmem:[#allocation0] sm:$0x1] %vm100_vm0, %v99_v39  }
  0x8e   :  { %v92_v38 = vpop.permute.xlu0 %91  }
  0x8f   :  { %95 = vst.msk [vmem:[#allocation0 + $0x8] sm:$0x1] %vm93_vm15, %v92_v38  }
  0x90   :  { %v112_v41 = vpop.permute.xlu1 %111  }
  0x91   :  { %114 = vst.msk [vmem:[#allocation0] sm:$0x1] %vm113_vm2, %v112_v41  }
  0x92   :  { %v105_v40 = vpop.permute.xlu0 %104  }
  0x93   :  { %108 = vst.msk [vmem:[#allocation0 + $0x8] sm:$0x1] %vm106_vm1, %v105_v40  }
  0x94   :  { %v125_v43 = vpop.permute.xlu1 %124  }
  0x95   :  { %127 = vst.msk [vmem:[#allocation0] sm:$0x1] %vm126_vm4, %v125_v43  }
  0x96   :  { %v118_v42 = vpop.permute.xlu0 %117  }
  0x97   :  { %121 = vst.msk [vmem:[#allocation0 + $0x8] sm:$0x1] %vm119_vm3, %v118_v42  }
  0x98   :  { %v138_v45 = vpop.permute.xlu1 %137  }
  0x99   :  { %140 = vst.msk [vmem:[#allocation0] sm:$0x1] %vm139_vm6, %v138_v45  }
  0x9a   :  { %v131_v44 = vpop.permute.xlu0 %130  }
  0x9b   :  { %134 = vst.msk [vmem:[#allocation0 + $0x8] sm:$0x1] %vm132_vm5, %v131_v44  }
  0x9c   :  { %v151_v47 = vpop.permute.xlu1 %150  }
  0x9d   :  { %153 = vst.msk [vmem:[#allocation0] sm:$0x1] %vm152_vm8, %v151_v47  }
  0x9e   :  { %v144_v46 = vpop.permute.xlu0 %143  }
  0x9f   :  { %147 = vst.msk [vmem:[#allocation0 + $0x8] sm:$0x1] %vm145_vm7, %v144_v46  }
  0xa2   :  { %v157_v48 = vpop.permute.xlu0 %156  }
  0xa3   :  { %160 = vst.msk [vmem:[#allocation0 + $0x8] sm:$0x1] %vm158_vm9, %v157_v48  }
  0xa4   :  { %v165_v49 = vld [vmem:[#allocation0] sm:$0x1] }
  0xa5   :  { %168 = vst [vmem:[%s338_s1] sm:$0x1] %v165_v49 }
  0xaa   :  { %v170_v50 = vld [vmem:[#allocation0 + $0x8] sm:$0x1] }
  0xab   :  { %199 = vst [vmem:[%s338_s1 + $0x1] sm:$0x1] %v170_v50 }

// kernel: tile.18
= control target key start
LH: loop header
LB: loop body
LE: loop exit
PB: predicated region body
PF: predicated region fallthrough
CT: control target
= control target key end

     0   :  { %s22_s0 = inlined_call_operand.vmem [shape: f32[20], index: 0, kind: input, shape index: {}]   ;;  %s23_s1 = inlined_call_operand.vmem [shape: f32[8,20], index: 1, kind: output, shape index: {}]  }
   0x1   :  { %v4_v0 = vld [vmem:[%s22_s0] ss:$0 sm:$0xff] }
   0x2   :  { %5 = vst [vmem:[%s23_s1] sm:$0xff] %v4_v0 }

// kernel: tile.19
= control target key start
LH: loop header
LB: loop body
LE: loop exit
PB: predicated region body
PF: predicated region fallthrough
CT: control target
= control target key end

     0   :  { %vm9_vm0 = vcmask 64512   ;;  %s85_s12 = smov 120   ;;  %s86_s13 = smov 80   ;;  %vm3_vm1 = vcmask 162816   ;;  %vm13_vm2 = vcmask 97280   ;;  %vm16_vm3 = vcmask 1048512   ;;  %s135_s0 = inlined_call_operand.vmem [shape: f32[8,20], index: 0, kind: input, shape index: {}]   ;;  %s136_s1 = inlined_call_operand.vmem [shape: f32[1,160], index: 1, kind: output, shape index: {}]  }
   0x1   :  { %v69_v0 = vld [vmem:[%s135_s0 + $0x6] sm:$0x1]   ;;  %v72_v3 = vld [vmem:[%s135_s0 + $0x4] sm:$0x1]   ;;  %v71_v4 = vld [vmem:[%s135_s0 + $0x5] sm:$0x1]  }
   0x2   :  { %v70_v1 = vld [vmem:[%s135_s0 + $0x6] sm:$0x1]   ;;  %26 = vrot.lane.b32.xlu1 %v72_v3, %s86_s13  ;;  %v73_v5 = vld [vmem:[%s135_s0 + $0x3] sm:$0x1]   ;;  %v2_v6 = vld [vmem:[%s135_s0] sm:$0x1]  }
   0x3   :  { %v10_v2 = vsel %vm9_vm0, %v70_v1, %v69_v0  ;;  %4 = vst.msk [vmem:[#allocation0] sm:$0x1] %vm3_vm1, %v2_v6   ;;  %s87_s20 = smov 100   ;;  %s88_s21 = smov 60   ;;  %v74_v7 = vld [vmem:[%s135_s0 + $0x2] sm:$0x1]  }
   0x4   :  { %11 = vrot.lane.b32.xlu0 %v10_v2, %s85_s12  ;;  %v75_v8 = vld [vmem:[%s135_s0 + $0x1] sm:$0x1]   ;;  %s89_s26 = smov 40   ;;  %s90_s27 = smov 20   ;;  %v76_v9 = vld [vmem:[%s135_s0 + $0x7] sm:$0x1]  }
   0x5   :  { %s91_s0 = smov 12   ;;  %vm22_vm4 = vcmask 982816   ;;  %vm28_vm5 = vcmask 818816   ;;  %vm34_vm6 = vcmask 654816   ;;  %vm40_vm7 = vcmask 490816  }
   0x6   :  { %32 = vrot.lane.b32.xlu1 %v73_v5, %s88_s21  ;;  %vm46_vm8 = vcmask 326816   ;;  %vm52_vm9 = vcmask 261216  }
   0x8   :  { %20 = vrot.lane.b32.xlu0 %v71_v4, %s87_s20 }
   0xa   :  { %44 = vrot.lane.b32.xlu1 %v75_v8, %s90_s27 }
   0xc   :  { %38 = vrot.lane.b32.xlu0 %v74_v7, %s89_s26 }
  0x10   :  { %50 = vrot.lane.b32.xlu0 %v76_v9, %s91_s0 }
  0x74   :  { %v27_v11 = vpop.permute.xlu1 %26  }
  0x76   :  { %v12_v10 = vpop.permute.xlu0 %11  }
  0x77   :  { %15 = vst.msk [vmem:[#allocation0 + $0x8] sm:$0x1] %vm13_vm2, %v12_v10  }
  0x78   :  { %17 = vst.msk [vmem:[#allocation0] sm:$0x1] %vm16_vm3, %v12_v10   ;;  %v33_v13 = vpop.permute.xlu1 %32  }
  0x7a   :  { %v21_v12 = vpop.permute.xlu0 %20  }
  0x7b   :  { %23 = vst.msk [vmem:[#allocation0] sm:$0x1] %vm22_vm4, %v21_v12  }
  0x7c   :  { %29 = vst.msk [vmem:[#allocation0] sm:$0x1] %vm28_vm5, %v27_v11   ;;  %v45_v15 = vpop.permute.xlu1 %44  }
  0x7d   :  { %35 = vst.msk [vmem:[#allocation0] sm:$0x1] %vm34_vm6, %v33_v13  }
  0x7e   :  { %v39_v14 = vpop.permute.xlu0 %38  }
  0x7f   :  { %41 = vst.msk [vmem:[#allocation0] sm:$0x1] %vm40_vm7, %v39_v14  }
  0x80   :  { %47 = vst.msk [vmem:[#allocation0] sm:$0x1] %vm46_vm8, %v45_v15  }
  0x82   :  { %v51_v16 = vpop.permute.xlu0 %50  }
  0x83   :  { %54 = vst.msk [vmem:[#allocation0 + $0x8] sm:$0x1] %vm52_vm9, %v51_v16  }
  0x87   :  { %v59_v17 = vld [vmem:[#allocation0] sm:$0x1] }
  0x88   :  { %62 = vst [vmem:[%s136_s1] sm:$0x1] %v59_v17 }
  0x8a   :  { %v64_v18 = vld [vmem:[#allocation0 + $0x8] sm:$0x1] }
  0x8b   :  { %77 = vst [vmem:[%s136_s1 + $0x1] sm:$0x1] %v64_v18 }

// kernel: net_forward.1
= control target key start
LH: loop header
LB: loop body
LE: loop exit
PB: predicated region body
PF: predicated region fallthrough
CT: control target
= control target key end

     0   :  { %vm121_vm0 = vcmask 1045504   ;;  %v4148_v6 = vmov 0   ;;  %vm108_vm1 = vcmask 228352   ;;  %s5852_s0 = inlined_call_operand.vmem [shape: f32[2,28,28], index: 0, kind: input, shape index: {}]   ;;  %s5853_s1 = inlined_call_operand.vmem [shape: bf16[5,28,240], index: 1, kind: input, shape index: {}]   ;;  %s5854_s2 = inlined_call_operand.vmem [shape: f32[1,240], index: 2, kind: input, shape index: {}]   ;;  %s5855_s3 = inlined_call_operand.vmem [shape: f32[240,120], index: 3, kind: input, shape index: {}]   ;;  %s5856_s4 = inlined_call_operand.vmem [shape: f32[240,120], index: 4, kind: input, shape index: {}]   ;;  %s5857_s5 = inlined_call_operand.vmem [shape: bf16[5,120,160], index: 5, kind: input, shape index: {}]   ;;  %s5858_s6 = inlined_call_operand.vmem [shape: f32[1,160], index: 6, kind: input, shape index: {}]   ;;  %s5859_s7 = inlined_call_operand.vmem [shape: f32[160,80], index: 7, kind: input, shape index: {}]   ;;  %s5860_s8 = inlined_call_operand.vmem [shape: f32[160,80], index: 8, kind: input, shape index: {}]   ;;  %s5861_s9 = inlined_call_operand.vmem [shape: bf16[4,80,50], index: 9, kind: input, shape index: {}]   ;;  %s5862_s10 = inlined_call_operand.vmem [shape: f32[1,50], index: 10, kind: input, shape index: {}]   ;;  %s5863_s11 = inlined_call_operand.vmem [shape: bf16[50,10], index: 11, kind: input, shape index: {}]   ;;  %s5864_s12 = inlined_call_operand.vmem [shape: f32[1,10], index: 12, kind: input, shape index: {}]   ;;  %s5865_s13 = inlined_call_operand.hbm [shape: f32[2,10], index: 13, kind: output, shape index: {}]  }
   0x1   :  { %v3946_v0 = vld [vmem:[%s5853_s1 + $0x14] ss:$8 sps:$4 sm:$0x3f]   ;;  %v3948_v1 = vld [vmem:[%s5853_s1 + $0x10] ss:$8 sps:$4 sm:$0x3f]   ;;  %160 = vmatprep.mubr.bf16.mxu0 %v4148_v6  ;;  %190 = vmatprep.mubr.bf16.mxu1 %v4148_v6 }
   0x2   :  { %3521 = vmatprep.subr.msk.bf16.mxu0 %vm121_vm0, %v3946_v0  ;;  %3937 = vmatprep.subr.msk.bf16.mxu1 %vm121_vm0, %v3946_v0  ;;  %v3949_v2 = vld [vmem:[%s5853_s1 + $0x4] ss:$8 sps:$4 sm:$0xff]   ;;  %v3951_v3 = vld [vmem:[%s5853_s1] ss:$8 sps:$4 sm:$0xff]   ;;  %v123_v5 = vsel %vm121_vm0, %v3948_v1, 0  ;;  %v52_v9 = vld [vmem:[%s5852_s0 + $0x30] sm:$0xff] }
   0x3   :  { %v46_v4 = vld [vmem:[%s5852_s0] sm:$0xff]  ;;  %v47_v7 = vld [vmem:[%s5852_s0 + $0x8] sm:$0xff]  ;;  %v53_v10 = vld [vmem:[%s5852_s0 + $0x38] sm:$0xf]  ;;  %141 = vmatpush1.bf16.msra.mxu0 %v123_v5  ;;  %3939 = vmatpush1.bf16.msra.mxu1 %v123_v5  ;;  %v67_v12 = vcombine.high %v52_v9, %v52_v9 }
   0x4   :  { %v62_v8 = vcombine.high %v46_v4, %v46_v4  ;;  %v63_v11 = vcombine.high %v47_v7, %v47_v7  ;;  %v3955_v13 = vld [vmem:[%s5853_s1 + $0x34] ss:$8 sps:$4 sm:$0x3f]   ;;  %142 = vmatprep.subr.bf16.mxu0 %v3949_v2  ;;  %3938 = vmatprep.subr.bf16.mxu1 %v3949_v2  ;;  %v3959_v18 = vld [vmem:[%s5853_s1 + $0x30] ss:$8 sps:$4 sm:$0x3f]  }
   0x5   :  { %v3957_v15 = vld [vmem:[%s5853_s1 + $0x54] ss:$8 sps:$4 sm:$0x3f]   ;;  %v74_v17 = vcombine.low %v67_v12, %v53_v10  ;;  %v3960_v19 = vld [vmem:[%s5853_s1 + $0x50] ss:$8 sps:$4 sm:$0x3f]  }
   0x6   :  { %v68_v14 = vcombine.low %v46_v4, %v62_v8  ;;  %v69_v16 = vcombine.low %v47_v7, %v63_v11  ;;  %v3963_v22 = vld [vmem:[%s5853_s1 + $0x24] ss:$8 sps:$4 sm:$0xff]   ;;  %v48_v23 = vld [vmem:[%s5852_s0 + $0x10] sm:$0xff]  ;;  %v261_v25 = vsel %vm121_vm0, %v3959_v18, 0  ;;  %v454_v26 = vsel %vm121_vm0, %v3960_v19, 0 }
   0x7   :  { %143 = vmatpush1.bf16.msra.mxu0 %v3951_v3  ;;  %3940 = vmatpush1.bf16.msra.mxu1 %v3951_v3  ;;  %v4266_v21 = vpack.c.bf16 %v74_v17, %v74_v17  ;;  %v50_v24 = vld [vmem:[%s5852_s0 + $0x20] sm:$0xff]  ;;  %v49_v27 = vld [vmem:[%s5852_s0 + $0x18] sm:$0xf]  ;;  %v64_v28 = vcombine.high %v48_v23, %v48_v23  ;;  %v51_v34 = vld [vmem:[%s5852_s0 + $0x28] sm:$0xff] }
   0x8   :  { %v4264_v20 = vpack.c.bf16 %v69_v16, %v68_v14  ;;  %3534 = vmatprep.subr.msk.bf16.mxu1 %vm121_vm0, %v3955_v13  ;;  %3549 = vmatprep.subr.msk.bf16.mxu0 %vm121_vm0, %v3957_v15  ;;  %v3961_v29 = vld [vmem:[%s5853_s1 + $0x20] ss:$8 sps:$4 sm:$0xff]   ;;  %v3968_v30 = vld [vmem:[%s5853_s1 + $0x44] ss:$8 sps:$4 sm:$0xff]   ;;  %v71_v32 = vcombine.low %v49_v27, %v50_v24  ;;  %v65_v39 = vcombine.high %v50_v24, %v50_v24 }
   0x9   :  { %v70_v31 = vcombine.low %v48_v23, %v64_v28  ;;  %v3966_v33 = vld [vmem:[%s5853_s1 + $0x40] ss:$8 sps:$4 sm:$0xff]   ;;  %v3971_v35 = vld [vmem:[%s5853_s1 + $0x74] ss:$8 sps:$4 sm:$0x3f]   ;;  %v66_v40 = vcombine.high %v51_v34, %v51_v34 }
   0xa   :  { %3522 = vmatmul.mubr.msk.bf16.vlgmr.msra.gmra.mxu0 %vm108_vm1, %v4264_v20  ;;  %3525 = vmatmul.mubr.msk.bf16.vlgmr.msra.gmra.mxu1 %vm108_vm1, %v4266_v21  ;;  %v3974_v36 = vld [vmem:[%s5853_s1 + $0x94] ss:$8 sps:$4 sm:$0x3f]   ;;  %v3973_v37 = vld [vmem:[%s5853_s1 + $0x70] ss:$8 sps:$4 sm:$0x3f]   ;;  %v72_v43 = vcombine.low %v65_v39, %v51_v34 }
   0xb   :  { %279 = vmatpush1.bf16.msra.mxu1 %v261_v25  ;;  %472 = vmatpush1.bf16.msra.mxu0 %v454_v26  ;;  %v83_v38 = vpack.c.bf16 %v71_v32, %v70_v31  ;;  %v3979_v41 = vld [vmem:[%s5853_s1 + $0x64] ss:$8 sps:$4 sm:$0xff]   ;;  %v647_v42 = vsel %vm121_vm0, %v3973_v37, 0  ;;  %v73_v44 = vcombine.low %v66_v40, %v52_v9  ;;  %v3977_v45 = vld [vmem:[%s5853_s1 + $0x60] ss:$8 sps:$4 sm:$0xff]  }
   0xc   :  { %280 = vmatprep.subr.bf16.mxu1 %v3963_v22  ;;  %170 = vmatprep.mubr.bf16.mxu0 %v4148_v6  ;;  %v3976_v47 = vld [vmem:[%s5853_s1 + $0x90] ss:$8 sps:$4 sm:$0x3f]   ;;  %v3982_v48 = vld [vmem:[%s5853_s1 + $0x84] ss:$8 sps:$4 sm:$0xff]  }
   0xd   :  { %298 = vmatprep.mubr.bf16.mxu1 %v4148_v6  ;;  %473 = vmatprep.subr.bf16.mxu0 %v3968_v30  ;;  %v84_v46 = vpack.c.bf16 %v73_v44, %v72_v43  ;;  %v840_v49 = vsel %vm121_vm0, %v3976_v47, 0  ;;  %v3980_v50 = vld [vmem:[%s5853_s1 + $0x80] ss:$8 sps:$4 sm:$0xff]  }
   0xf   :  { %281 = vmatpush1.bf16.msra.mxu1 %v3961_v29  ;;  %474 = vmatpush1.bf16.msra.mxu0 %v3966_v33 }
  0x10   :  { %3564 = vmatprep.subr.msk.bf16.mxu1 %vm121_vm0, %v3971_v35  ;;  %3579 = vmatprep.subr.msk.bf16.mxu0 %vm121_vm0, %v3974_v36 }
  0x12   :  { %3523 = vmatmul.mubr.msk.bf16.gmra.mxu0 %vm108_vm1, %v83_v38  ;;  %3535 = vmatmul.mubr.msk.bf16.vlgmr.msra.gmra.mxu1 %vm108_vm1, %v4264_v20 }
  0x13   :  { %180 = vmatprep.mubr.bf16.mxu0 %v4148_v6  ;;  %308 = vmatprep.mubr.bf16.mxu1 %v4148_v6 }
  0x14   :  { %665 = vmatpush1.bf16.msra.mxu1 %v647_v42 }
  0x15   :  { %666 = vmatprep.subr.bf16.mxu1 %v3979_v41 }
  0x18   :  { %667 = vmatpush1.bf16.msra.mxu1 %v3977_v45 }
  0x1a   :  { %3524 = vmatmul.mubr.msk.bf16.gmra.mxu0 %vm108_vm1, %v84_v46  ;;  %3536 = vmatmul.mubr.msk.bf16.gmra.mxu1 %vm108_vm1, %v83_v38 }
  0x1b   :  { %318 = vmatprep.mubr.bf16.mxu1 %v4148_v6  ;;  %491 = vmatprep.mubr.bf16.mxu0 %v4148_v6 }
  0x22   :  { %3537 = vmatmul.mubr.msk.bf16.gmra.mxu1 %vm108_vm1, %v84_v46  ;;  %3550 = vmatmul.mubr.msk.bf16.vlgmr.msra.gmra.mxu0 %vm108_vm1, %v4264_v20 }
  0x23   :  { %858 = vmatpush1.bf16.msra.mxu0 %v840_v49  ;;  %328 = vmatprep.mubr.bf16.mxu1 %v4148_v6 }
  0x24   :  { %501 = vmatprep.mubr.bf16.mxu0 %v4148_v6  ;;  %859 = vmatprep.subr.bf16.mxu0 %v3982_v48 }
  0x27   :  { %860 = vmatpush1.bf16.msra.mxu0 %v3980_v50 }
  0x2a   :  { %3538 = vmatmul.mubr.msk.bf16.gmra.mxu1 %vm108_vm1, %v4266_v21  ;;  %3551 = vmatmul.mubr.msk.bf16.gmra.mxu0 %vm108_vm1, %v83_v38 }
  0x2b   :  { %511 = vmatprep.mubr.bf16.mxu0 %v4148_v6  ;;  %684 = vmatprep.mubr.bf16.mxu1 %v4148_v6 }
  0x32   :  { %3552 = vmatmul.mubr.msk.bf16.gmra.mxu0 %vm108_vm1, %v84_v46  ;;  %3565 = vmatmul.mubr.msk.bf16.vlgmr.msra.gmra.mxu1 %vm108_vm1, %v4264_v20 }
  0x33   :  { %521 = vmatprep.mubr.bf16.mxu0 %v4148_v6  ;;  %694 = vmatprep.mubr.bf16.mxu1 %v4148_v6 }
  0x34   :  { %18 = vsyncpa [#allocation3], 0  ;;  %v4149_v51 = vmov 0.0   ;;  %v1235_v52 = vld [vmem:[%s5855_s3 + $0x78] sm:$0xff]  ;;  %v1234_v54 = vld [vmem:[%s5855_s3 + $0x70] sm:$0xff]  ;;  %vm365_vm2 = vcmask 1042432  }
  0x35   :  { %1524 = vmatprep.subr.mxu1 %v4149_v51  ;;  %1634 = vmatprep.subr.mxu0 %v4149_v51  ;;  %v1619_v53 = vld [vmem:[%s5856_s4 + $0x78] sm:$0xff]  ;;  %v1618_v55 = vld [vmem:[%s5856_s4 + $0x70] sm:$0xff]  ;;  %v1233_v56 = vld [vmem:[%s5855_s3 + $0x68] sm:$0xff]  ;;  %vm366_vm3 = vcmask 1046532   ;;  %vm558_vm5 = vcmask 1041408   ;;  %vm559_vm6 = vcmask 1045508  }
  0x36   :  { %1525 = vmatpush1.msra.mxu1 %v1235_v52  ;;  %v1617_v57 = vld [vmem:[%s5856_s4 + $0x68] sm:$0xff]  ;;  %v1232_v58 = vld [vmem:[%s5855_s3 + $0x60] sm:$0xff]  ;;  %v1231_v60 = vld [vmem:[%s5855_s3 + $0x58] sm:$0xff]  ;;  %vm751_vm8 = vcmask 1040384   ;;  %vm752_vm9 = vcmask 1044484   ;;  %vm1466_vm11 = vcmask 1041409  }
  0x37   :  { %1526 = vmatprep.subr.mxu1 %v4149_v51  ;;  %v1616_v59 = vld [vmem:[%s5856_s4 + $0x60] sm:$0xff]  ;;  %v1615_v61 = vld [vmem:[%s5856_s4 + $0x58] sm:$0xff]  ;;  %v1230_v62 = vld [vmem:[%s5855_s3 + $0x50] sm:$0xff]  ;;  %vm1468_vm12 = vcmask 1042434   ;;  %vm1470_vm13 = vcmask 1043459   ;;  %vm1473_vm14 = vcmask 1045509  }
  0x38   :  { %1527 = vmatpush1.msra.mxu1 %v1234_v54  ;;  %v1614_v63 = vld [vmem:[%s5856_s4 + $0x50] sm:$0xff]  ;;  %v1229_v0 = vld [vmem:[%s5855_s3 + $0x48] sm:$0xff]  ;;  %v1228_v2 = vld [vmem:[%s5855_s3 + $0x40] sm:$0xff]  ;;  %vm1475_vm15 = vcmask 1046534   ;;  %vm1477_vm0 = vcmask 1047559  }
  0x39   :  { %1528 = vmatprep.subr.mxu1 %v4149_v51  ;;  %v1613_v1 = vld [vmem:[%s5856_s4 + $0x48] sm:$0xff]  ;;  %v1612_v3 = vld [vmem:[%s5856_s4 + $0x40] sm:$0xff]  ;;  %v1227_v4 = vld [vmem:[%s5855_s3 + $0x38] sm:$0xff] }
  0x3a   :  { %3553 = vmatmul.mubr.msk.bf16.gmra.mxu0 %vm108_vm1, %v4266_v21  ;;  %3566 = vmatmul.mubr.msk.bf16.gmra.mxu1 %vm108_vm1, %v83_v38  ;;  %v1611_v5 = vld [vmem:[%s5856_s4 + $0x38] sm:$0xff]  ;;  %v1226_v7 = vld [vmem:[%s5855_s3 + $0x30] sm:$0xff]  ;;  %v1225_v9 = vld [vmem:[%s5855_s3 + $0x28] sm:$0xff] }
  0x3b   :  { %704 = vmatprep.mubr.bf16.mxu1 %v4148_v6  ;;  %877 = vmatprep.mubr.bf16.mxu0 %v4148_v6  ;;  %v1610_v8 = vld [vmem:[%s5856_s4 + $0x30] sm:$0xff]  ;;  %v1609_v10 = vld [vmem:[%s5856_s4 + $0x28] sm:$0xff]  ;;  %v1224_v11 = vld [vmem:[%s5855_s3 + $0x20] sm:$0xff] }
  0x3c   :  { %1529 = vmatpush1.msra.mxu1 %v1233_v56  ;;  %v1608_v12 = vld [vmem:[%s5856_s4 + $0x20] sm:$0xff]  ;;  %v1223_v13 = vld [vmem:[%s5855_s3 + $0x18] sm:$0xff]  ;;  %v1222_v15 = vld [vmem:[%s5855_s3 + $0x10] sm:$0xff] }
  0x3d   :  { %1530 = vmatprep.subr.mxu1 %v4149_v51  ;;  %v1607_v14 = vld [vmem:[%s5856_s4 + $0x18] sm:$0xff]  ;;  %v1606_v16 = vld [vmem:[%s5856_s4 + $0x10] sm:$0xff]  ;;  %v1221_v17 = vld [vmem:[%s5855_s3 + $0x8] sm:$0xff] }
  0x3e   :  { %1531 = vmatpush1.msra.mxu1 %v1232_v58  ;;  %v1605_v18 = vld [vmem:[%s5856_s4 + $0x8] sm:$0xff]  ;;  %v1220_v19 = vld [vmem:[%s5855_s3] sm:$0xff]  ;;  %v1247_v25 = vld [vmem:[%s5855_s3 + $0xd8] sm:$0xff] }
  0x3f   :  { %1532 = vmatprep.subr.mxu1 %v4149_v51  ;;  %v1633_v22 = vld [vmem:[%s5856_s4 + $0xe8] sm:$0xff]  ;;  %v1248_v23 = vld [vmem:[%s5855_s3 + $0xe0] sm:$0xff]  ;;  %v1631_v26 = vld [vmem:[%s5856_s4 + $0xd8] sm:$0xff] }
  0x40   :  { %1533 = vmatpush1.msra.mxu1 %v1231_v60  ;;  %v1632_v24 = vld [vmem:[%s5856_s4 + $0xe0] sm:$0xff]  ;;  %v1246_v27 = vld [vmem:[%s5855_s3 + $0xd0] sm:$0xff]  ;;  %v1245_v29 = vld [vmem:[%s5855_s3 + $0xc8] sm:$0xff] }
  0x41   :  { %1534 = vmatprep.subr.mxu1 %v4149_v51  ;;  %v1630_v28 = vld [vmem:[%s5856_s4 + $0xd0] sm:$0xff]  ;;  %v1629_v30 = vld [vmem:[%s5856_s4 + $0xc8] sm:$0xff]  ;;  %v1244_v31 = vld [vmem:[%s5855_s3 + $0xc0] sm:$0xff] }
  0x42   :  { %3567 = vmatmul.mubr.msk.bf16.gmra.mxu1 %vm108_vm1, %v84_v46  ;;  %3580 = vmatmul.mubr.msk.bf16.vlgmr.msra.gmra.mxu0 %vm108_vm1, %v4264_v20  ;;  %v1604_v20 = vld [vmem:[%s5856_s4] sm:$0xff]  ;;  %v1243_v33 = vld [vmem:[%s5855_s3 + $0xb8] sm:$0xff]  ;;  %v1242_v35 = vld [vmem:[%s5855_s3 + $0xb0] sm:$0xff] }
  0x43   :  { %714 = vmatprep.mubr.bf16.mxu1 %v4148_v6  ;;  %887 = vmatprep.mubr.bf16.mxu0 %v4148_v6  ;;  %v1628_v32 = vld [vmem:[%s5856_s4 + $0xc0] sm:$0xff]  ;;  %v1627_v34 = vld [vmem:[%s5856_s4 + $0xb8] sm:$0xff]  ;;  %v1626_v36 = vld [vmem:[%s5856_s4 + $0xb0] sm:$0xff] }
  0x44   :  { %1635 = vmatpush1.msra.mxu0 %v1619_v53  ;;  %1535 = vmatpush1.msra.mxu1 %v1230_v62  ;;  %v1241_v37 = vld [vmem:[%s5855_s3 + $0xa8] sm:$0xff]  ;;  %v1240_v39 = vld [vmem:[%s5855_s3 + $0xa0] sm:$0xff]  ;;  %v1239_v41 = vld [vmem:[%s5855_s3 + $0x98] sm:$0xff] }
  0x45   :  { %1636 = vmatprep.subr.mxu0 %v4149_v51  ;;  %1536 = vmatprep.subr.mxu1 %v4149_v51  ;;  %v1624_v40 = vld [vmem:[%s5856_s4 + $0xa0] sm:$0xff]  ;;  %v1623_v42 = vld [vmem:[%s5856_s4 + $0x98] sm:$0xff]  ;;  %v1238_v43 = vld [vmem:[%s5855_s3 + $0x90] sm:$0xff] }
  0x46   :  { %1637 = vmatpush1.msra.mxu0 %v1618_v55  ;;  %1537 = vmatpush1.msra.mxu1 %v1229_v0  ;;  %v1622_v44 = vld [vmem:[%s5856_s4 + $0x90] sm:$0xff]  ;;  %v1237_v45 = vld [vmem:[%s5855_s3 + $0x88] sm:$0xff]  ;;  %v1236_v47 = vld [vmem:[%s5855_s3 + $0x80] sm:$0xff] }
  0x47   :  { %1638 = vmatprep.subr.mxu0 %v4149_v51  ;;  %1538 = vmatprep.subr.mxu1 %v4149_v51  ;;  %v1620_v48 = vld [vmem:[%s5856_s4 + $0x80] sm:$0xff]  ;;  %vm4630_vm4 = vmor %vm365_vm2, %vm366_vm3  ;;  %vm1931_vm2 = vcmask 1043456   ;;  %vm1764_vm3 = vsmask.f32 1280 }
  0x48   :  { %1639 = vmatpush1.msra.mxu0 %v1617_v57  ;;  %1539 = vmatpush1.msra.mxu1 %v1228_v2  ;;  %vm4704_vm7 = vmor %vm558_vm5, %vm559_vm6  ;;  %vm1767_vm5 = vsmask.f32 5392 }
  0x49   :  { %1640 = vmatprep.subr.mxu0 %v4149_v51  ;;  %1540 = vmatprep.subr.mxu1 %v4149_v51  ;;  %vm4773_vm10 = vmor %vm751_vm8, %vm752_vm9 }
  0x4a   :  { %3568 = vmatmul.mubr.msk.bf16.gmra.mxu1 %vm108_vm1, %v4266_v21  ;;  %3581 = vmatmul.mubr.msk.bf16.gmra.mxu0 %vm108_vm1, %v83_v38  ;;  %v1625_v38 = vld [vmem:[%s5856_s4 + $0xa8] sm:$0xff] }
  0x4b   :  { %897 = vmatprep.mubr.bf16.mxu0 %v4148_v6  ;;  %1641 = vmatpush1.msra.mxu0 %v1616_v59 }
  0x4c   :  { %1642 = vmatprep.subr.mxu0 %v4149_v51  ;;  %1541 = vmatpush1.msra.mxu1 %v1227_v4 }
  0x4d   :  { %1643 = vmatpush1.msra.mxu0 %v1615_v61  ;;  %1542 = vmatprep.subr.mxu1 %v4149_v51 }
  0x4e   :  { %1644 = vmatprep.subr.mxu0 %v4149_v51  ;;  %1543 = vmatpush1.msra.mxu1 %v1226_v7 }
  0x4f   :  { %1645 = vmatpush1.msra.mxu0 %v1614_v63  ;;  %1544 = vmatprep.subr.mxu1 %v4149_v51 }
  0x50   :  { %1646 = vmatprep.subr.mxu0 %v4149_v51  ;;  %1545 = vmatpush1.msra.mxu1 %v1225_v9 }
  0x51   :  { %1647 = vmatpush1.msra.mxu0 %v1613_v1  ;;  %1546 = vmatprep.subr.mxu1 %v4149_v51 }
  0x52   :  { %3582 = vmatmul.mubr.msk.bf16.gmra.mxu0 %vm108_vm1, %v84_v46  ;;  %1648 = vmatprep.subr.mxu0 %v4149_v51  ;;  %v1621_v46 = vld [vmem:[%s5856_s4 + $0x88] sm:$0xff] }
  0x53   :  { %907 = vmatprep.mubr.bf16.mxu0 %v4148_v6  ;;  %1649 = vmatpush1.msra.mxu0 %v1612_v3 }
  0x54   :  { %1650 = vmatprep.subr.mxu0 %v4149_v51  ;;  %1547 = vmatpush1.msra.mxu1 %v1224_v11 }
  0x55   :  { %1651 = vmatpush1.msra.mxu0 %v1611_v5  ;;  %1548 = vmatprep.subr.mxu1 %v4149_v51 }
  0x56   :  { %1652 = vmatprep.subr.mxu0 %v4149_v51  ;;  %1549 = vmatpush1.msra.mxu1 %v1223_v13 }
  0x57   :  { %1653 = vmatpush1.msra.mxu0 %v1610_v8  ;;  %1550 = vmatprep.subr.mxu1 %v4149_v51 }
  0x58   :  { %1654 = vmatprep.subr.mxu0 %v4149_v51  ;;  %1551 = vmatpush1.msra.mxu1 %v1222_v15 }
  0x59   :  { %1655 = vmatpush1.msra.mxu0 %v1609_v10  ;;  %1552 = vmatprep.subr.mxu1 %v4149_v51 }
  0x5a   :  { %3583 = vmatmul.mubr.msk.bf16.gmra.mxu0 %vm108_vm1, %v4266_v21  ;;  %1656 = vmatprep.subr.mxu0 %v4149_v51  ;;  %v1249_v21 = vld [vmem:[%s5855_s3 + $0xe8] sm:$0xff]  ;;  %vm1517_vm1 = vcmask 916480  }
  0x5b   :  { %1657 = vmatpush1.msra.mxu0 %v1608_v12  ;;  %1553 = vmatpush1.msra.mxu1 %v1221_v17 }
  0x5c   :  { %1658 = vmatprep.subr.mxu0 %v4149_v51  ;;  %1554 = vmatprep.subr.mxu1 %v4149_v51 }
  0x5d   :  { %1659 = vmatpush1.msra.mxu0 %v1607_v14  ;;  %1555 = vmatpush1.msra.mxu1 %v1220_v19 }
  0x5e   :  { %1660 = vmatprep.subr.mxu0 %v4149_v51  ;;  %1560 = vmatprep.subr.mxu1 %v4149_v51 }
  0x5f   :  { %1661 = vmatpush1.msra.mxu0 %v1606_v16  ;;  %1561 = vmatpush2.msra.mxu1 %v1249_v21 }
  0x60   :  { %1662 = vmatprep.subr.mxu0 %v4149_v51  ;;  %1562 = vmatprep.subr.mxu1 %v4149_v51 }
  0x61   :  { %1663 = vmatpush1.msra.mxu0 %v1605_v18  ;;  %1563 = vmatpush2.msra.mxu1 %v1248_v23 }
  0x62   :  { %1664 = vmatprep.subr.mxu0 %v4149_v51  ;;  %1564 = vmatprep.subr.mxu1 %v4149_v51 }
  0x63   :  { %1665 = vmatpush1.msra.mxu0 %v1604_v20  ;;  %1565 = vmatpush2.msra.mxu1 %v1247_v25 }
  0x64   :  { %1670 = vmatprep.subr.mxu0 %v4149_v51  ;;  %1566 = vmatprep.subr.mxu1 %v4149_v51 }
  0x65   :  { %1671 = vmatpush2.msra.mxu0 %v1633_v22  ;;  %1567 = vmatpush2.msra.mxu1 %v1246_v27 }
  0x66   :  { %1672 = vmatprep.subr.mxu0 %v4149_v51  ;;  %1568 = vmatprep.subr.mxu1 %v4149_v51 }
  0x67   :  { %1673 = vmatpush2.msra.mxu0 %v1632_v24  ;;  %1569 = vmatpush2.msra.mxu1 %v1245_v29  ;;  %v968_v24 = vlaneseq }
  0x68   :  { %1674 = vmatprep.subr.mxu0 %v4149_v51  ;;  %1570 = vmatprep.subr.mxu1 %v4149_v51 }
  0x69   :  { %1675 = vmatpush2.msra.mxu0 %v1631_v26  ;;  %1571 = vmatpush2.msra.mxu1 %v1244_v31 }
  0x6a   :  { %1676 = vmatprep.subr.mxu0 %v4149_v51  ;;  %1572 = vmatprep.subr.mxu1 %v4149_v51 }
  0x6b   :  { %1677 = vmatpush2.msra.mxu0 %v1630_v28  ;;  %1573 = vmatpush2.msra.mxu1 %v1243_v33 }
  0x6c   :  { %1678 = vmatprep.subr.mxu0 %v4149_v51  ;;  %1574 = vmatprep.subr.mxu1 %v4149_v51 }
  0x6d   :  { %1679 = vmatpush2.msra.mxu0 %v1629_v30  ;;  %1575 = vmatpush2.msra.mxu1 %v1242_v35 }
  0x6e   :  { %1680 = vmatprep.subr.mxu0 %v4149_v51  ;;  %1576 = vmatprep.subr.mxu1 %v4149_v51 }
  0x6f   :  { %1681 = vmatpush2.msra.mxu0 %v1628_v32  ;;  %1577 = vmatpush2.msra.mxu1 %v1241_v37 }
  0x70   :  { %1682 = vmatprep.subr.mxu0 %v4149_v51  ;;  %1578 = vmatprep.subr.mxu1 %v4149_v51 }
  0x71   :  { %1683 = vmatpush2.msra.mxu0 %v1627_v34  ;;  %1579 = vmatpush2.msra.mxu1 %v1240_v39  ;;  %v4660_v39 = vshrl.u32 %v968_v24, 7 }
  0x72   :  { %1684 = vmatprep.subr.mxu0 %v4149_v51  ;;  %1580 = vmatprep.subr.mxu1 %v4149_v51 }
  0x73   :  { %1685 = vmatpush2.msra.mxu0 %v1626_v36  ;;  %1581 = vmatpush2.msra.mxu1 %v1239_v41 }
  0x74   :  { %1686 = vmatprep.subr.mxu0 %v4149_v51  ;;  %1582 = vmatprep.subr.mxu1 %v4149_v51 }
  0x75   :  { %1687 = vmatpush2.msra.mxu0 %v1625_v38  ;;  %1583 = vmatpush2.msra.mxu1 %v1238_v43 }
  0x76   :  { %1688 = vmatprep.subr.mxu0 %v4149_v51  ;;  %1584 = vmatprep.subr.mxu1 %v4149_v51 }
  0x77   :  { %1689 = vmatpush2.msra.mxu0 %v1624_v40  ;;  %1585 = vmatpush2.msra.mxu1 %v1237_v45 }
  0x78   :  { %1690 = vmatprep.subr.mxu0 %v4149_v51  ;;  %1586 = vmatprep.subr.mxu1 %v4149_v51 }
  0x79   :  { %1691 = vmatpush2.msra.mxu0 %v1623_v42  ;;  %1587 = vmatpush2.msra.mxu1 %v1236_v47 }
  0x7a   :  { %1692 = vmatprep.subr.mxu0 %v4149_v51 }
  0x7b   :  { %1693 = vmatpush2.msra.mxu0 %v1622_v44 }
  0x7c   :  { %1694 = vmatprep.subr.mxu0 %v4149_v51 }
  0x7d   :  { %1695 = vmatpush2.msra.mxu0 %v1621_v46 }
  0x7e   :  { %1696 = vmatprep.subr.mxu0 %v4149_v51 }
  0x7f   :  { %1697 = vmatpush2.msra.mxu0 %v1620_v48 }
  0xca   :  { %v162_v49 = vpop.f32.mrf.mxu0  ;;  %v4612_v50 = vpop.f32.mrf.mxu1 }
  0xcc   :  { %v164_v52 = vpop.f32.mrf.mxu0  ;;  %v4614_v53 = vpop.f32.mrf.mxu1 }
  0xcd   :  { %v213_v54 = vcombine.low %v162_v49, %v164_v52  ;;  %v214_v55 = vcombine.high %v162_v49, %v164_v52  ;;  %v224_v56 = vcombine.low %v4612_v50, %v4614_v53 }
  0xce   :  { %v4618_v57 = vpop.f32.mrf.mxu0  ;;  %v196_v58 = vpop.f32.mrf.mxu1 }
  0xd0   :  { %v168_v59 = vpop.f32.mrf.mxu0  ;;  %v197_v60 = vpop.f32.mrf.mxu1 }
  0xd1   :  { %v215_v61 = vcombine.low %v4618_v57, %v168_v59  ;;  %v216_v62 = vcombine.high %v4618_v57, %v168_v59  ;;  %v4675_v60 = vsub.s32 0, %v4660_v39 }
  0xd2   :  { %v4622_v63 = vpop.f32.mrf.mxu0  ;;  %v300_v0 = vpop.f32.mrf.mxu1 }
  0xd4   :  { %v4624_v1 = vpop.f32.mrf.mxu0  ;;  %v302_v2 = vpop.f32.mrf.mxu1 }
  0xd5   :  { %v217_v3 = vcombine.low %v4622_v63, %v4624_v1  ;;  %v218_v4 = vcombine.high %v4622_v63, %v4624_v1  ;;  %v351_v5 = vcombine.low %v300_v0, %v302_v2  ;;  %v352_v7 = vcombine.high %v300_v0, %v302_v2 }
  0xd6   :  { %v4634_v9 = vpop.f32.mrf.mxu0  ;;  %v304_v10 = vpop.f32.mrf.mxu1 }
  0xd7   :  { %v3539_v11 = vrot.slane %v351_v5, 9  ;;  %v370_v12 = vrot.slane %v352_v7, 5  ;;  %v974_v7 = vsub.s32 1, %v4660_v39 }
  0xd8   :  { %v4636_v13 = vpop.f32.mrf.mxu0  ;;  %v306_v14 = vpop.f32.mrf.mxu1 }
  0xd9   :  { %v371_v15 = vsel %vm4630_vm4, %v3539_v11, %v370_v12  ;;  %v372_v16 = vrot.slane %v370_v12, 4  ;;  %v219_v17 = vcombine.high %v4634_v9, %v4636_v13  ;;  %v353_v18 = vcombine.low %v304_v10, %v306_v14 }
  0xda   :  { %v4642_v19 = vadd.f32 %v371_v15, %v213_v54  ;;  %v354_v20 = vcombine.high %v304_v10, %v306_v14  ;;  %v4644_v21 = vpop.f32.mrf.mxu0  ;;  %v310_v22 = vpop.f32.mrf.mxu1  ;;  %v4150_v10 = vmov 1983009808  }
  0xdb   :  { %v373_v23 = vrot.slane %v353_v18, 5  ;;  %v1005_v11 = vunpack.c.l.s4 %v4150_v10 }
  0xdc   :  { %v376_v25 = vrot.slane %v354_v20, 5  ;;  %v4646_v26 = vpop.f32.mrf.mxu0  ;;  %v312_v27 = vpop.f32.mrf.mxu1 }
  0xdd   :  { %v374_v28 = vsel %vm4630_vm4, %v372_v16, %v373_v23  ;;  %v375_v29 = vrot.slane %v373_v23, 4  ;;  %v220_v30 = vcombine.low %v4644_v21, %v4646_v26  ;;  %v221_v31 = vcombine.high %v4644_v21, %v4646_v26  ;;  %v966_v16 = vld [vmem:[%s5854_s2] sm:$0x3] }
  0xde   :  { %v378_v32 = vrot.slane %v376_v25, 4  ;;  %v4654_v33 = vadd.f32 %v374_v28, %v214_v55  ;;  %v355_v34 = vcombine.low %v310_v22, %v312_v27  ;;  %v356_v35 = vcombine.high %v310_v22, %v312_v27  ;;  %v4656_v36 = vpop.f32.mrf.mxu0  ;;  %v314_v37 = vpop.f32.mrf.mxu1 }
  0xdf   :  { %v377_v38 = vsel %vm4630_vm4, %v375_v29, %v376_v25  ;;  %v971_v29 = vrot.slane %v966_v16, %v4675_v60  ;;  %v975_v63 = vrot.slane %v966_v16, %v974_v7  ;;  %v1006_v1 = vunpack.c.0.s8 %v1005_v11 }
  0xe0   :  { %v4662_v40 = vadd.f32 %v377_v38, %v215_v61  ;;  %v379_v41 = vrot.slane %v355_v34, 5  ;;  %v382_v42 = vrot.slane %v356_v35, 5  ;;  %v4664_v43 = vpop.f32.mrf.mxu0  ;;  %v316_v44 = vpop.f32.mrf.mxu1  ;;  %v4718_v11 = vsub.s32 2, %v4660_v39 }
  0xe1   :  { %v222_v45 = vcombine.low %v4656_v36, %v4664_v43  ;;  %v223_v46 = vcombine.high %v4656_v36, %v4664_v43  ;;  %v357_v47 = vcombine.low %v314_v37, %v316_v44  ;;  %v358_v48 = vcombine.high %v314_v37, %v316_v44 }
  0xe2   :  { %v380_v49 = vsel %vm4630_vm4, %v378_v32, %v379_v41  ;;  %v381_v52 = vrot.slane %v379_v41, 4  ;;  %v384_v54 = vrot.slane %v382_v42, 4  ;;  %v320_v55 = vpop.f32.mrf.mxu1  ;;  %v493_v57 = vpop.f32.mrf.mxu0  ;;  %v4708_v13 = vcombine.low %v971_v29, %v975_v63 }
  0xe3   :  { %v4672_v58 = vadd.f32 %v380_v49, %v216_v62  ;;  %v385_v59 = vrot.slane %v357_v47, 5  ;;  %v3540_v0 = vrot.slane %v358_v48, 9 }
  0xe4   :  { %v383_v61 = vsel %vm4630_vm4, %v381_v52, %v382_v42  ;;  %v322_v2 = vpop.f32.mrf.mxu1  ;;  %v495_v5 = vpop.f32.mrf.mxu0 }
  0xe5   :  { %v4680_v12 = vadd.f32 %v383_v61, %v217_v3  ;;  %v386_v62 = vsel %vm4630_vm4, %v384_v54, %v385_v59  ;;  %v359_v14 = vcombine.low %v320_v55, %v322_v2  ;;  %v360_v15 = vcombine.high %v320_v55, %v322_v2 }
  0xe6   :  { %v4690_v18 = vadd.f32 %v386_v62, %v218_v4  ;;  %v544_v20 = vcombine.low %v493_v57, %v495_v5  ;;  %v324_v22 = vpop.f32.mrf.mxu1  ;;  %v497_v23 = vpop.f32.mrf.mxu0  ;;  %v545_v25 = vcombine.high %v493_v57, %v495_v5  ;;  %v4713_v59 = vcombine.high %v971_v29, %v975_v63 }
  0xe7   :  { %v389_v24 = vrot.slane %v359_v14, 5  ;;  %v392_v3 = vrot.slane %v360_v15, 5 }
  0xe8   :  { %v326_v27 = vpop.f32.mrf.mxu1  ;;  %v499_v28 = vpop.f32.mrf.mxu0  ;;  %v3554_v37 = vrot.slane %v544_v20, 10  ;;  %v563_v47 = vrot.slane %v545_v25, 6 }
  0xe9   :  { %v390_v32 = vsel %vm4630_vm4, %v3540_v0, %v389_v24  ;;  %v361_v34 = vcombine.low %v324_v22, %v326_v27  ;;  %v391_v4 = vrot.slane %v389_v24, 4  ;;  %v362_v38 = vcombine.high %v324_v22, %v326_v27 }
  0xea   :  { %v4700_v35 = vadd.f32 %v390_v32, %v219_v17  ;;  %v330_v41 = vpop.f32.mrf.mxu1  ;;  %v503_v42 = vpop.f32.mrf.mxu0  ;;  %v394_v44 = vrot.slane %v392_v3, 4  ;;  %v546_v49 = vcombine.low %v497_v23, %v499_v28  ;;  %v547_v9 = vcombine.high %v497_v23, %v499_v28 }
  0xeb   :  { %v395_v48 = vrot.slane %v361_v34, 5  ;;  %v398_v54 = vrot.slane %v362_v38, 5  ;;  %v4711_v17 = vsub.s32 %v1006_v1, %v4660_v39  ;;  %v393_v61 = vsel %vm4630_vm4, %v391_v4, %v392_v3 }
  0xec   :  { %v332_v55 = vpop.f32.mrf.mxu1  ;;  %v505_v57 = vpop.f32.mrf.mxu0  ;;  %v566_v0 = vrot.slane %v546_v49, 6  ;;  %v564_v62 = vsel %vm4704_vm7, %v3554_v37, %v563_v47  ;;  %v565_v14 = vrot.slane %v563_v47, 4  ;;  %v4727_v27 = vadd.f32 %v393_v61, %v220_v30 }
  0xed   :  { %v363_v2 = vcombine.low %v330_v41, %v332_v55  ;;  %v396_v15 = vsel %vm4630_vm4, %v394_v44, %v395_v48  ;;  %v397_v16 = vrot.slane %v395_v48, 4  ;;  %v400_v20 = vrot.slane %v398_v54, 4 }
  0xee   :  { %v334_v5 = vpop.f32.mrf.mxu1  ;;  %v507_v10 = vpop.f32.mrf.mxu0  ;;  %v364_v22 = vcombine.high %v330_v41, %v332_v55  ;;  %v548_v24 = vcombine.low %v503_v42, %v505_v57  ;;  %v569_v28 = vrot.slane %v547_v9, 6  ;;  %v549_v29 = vcombine.high %v503_v42, %v505_v57 }
  0xef   :  { %v401_v23 = vrot.slane %v363_v2, 5  ;;  %v4732_v34 = vadd.f32 %v396_v15, %v221_v31  ;;  %v568_v63 = vrot.slane %v566_v0, 4  ;;  %v4735_v38 = vadd.f32 %v564_v62, %v4642_v19 }
  0xf0   :  { %v335_v3 = vpop.f32.mrf.mxu1  ;;  %v509_v25 = vpop.f32.mrf.mxu0  ;;  %v572_v1 = vrot.slane %v548_v24, 6  ;;  %v399_v41 = vsel %vm4630_vm4, %v397_v16, %v398_v54  ;;  %v567_v30 = vsel %vm4704_vm7, %v565_v14, %v566_v0  ;;  %v575_v42 = vrot.slane %v549_v29, 6 }
  0xf1   :  { %v550_v32 = vcombine.low %v507_v10, %v509_v25  ;;  %v551_v44 = vcombine.high %v507_v10, %v509_v25  ;;  %v402_v21 = vsel %vm4630_vm4, %v400_v20, %v401_v23  ;;  %v403_v26 = vrot.slane %v401_v23, 4 }
  0xf2   :  { %v513_v4 = vpop.f32.mrf.mxu0  ;;  %v686_v37 = vpop.f32.mrf.mxu1  ;;  %v404_v31 = vrot.slane %v364_v22, 5  ;;  %v574_v47 = vrot.slane %v572_v1, 4  ;;  %v571_v55 = vrot.slane %v569_v28, 4  ;;  %v4746_v54 = vadd.f32 %v399_v41, %v222_v45 }
  0xf3   :  { %v578_v57 = vrot.slane %v550_v32, 6  ;;  %v570_v61 = vsel %vm4704_vm7, %v568_v63, %v569_v28  ;;  %v4753_v62 = vadd.f32 %v402_v21, %v223_v46  ;;  %v577_v14 = vrot.slane %v575_v42, 4 }
  0xf4   :  { %v515_v48 = vpop.f32.mrf.mxu0  ;;  %v688_v49 = vpop.f32.mrf.mxu1  ;;  %v3555_v15 = vrot.slane %v551_v44, 10  ;;  %v4756_v16 = vadd.f32 %v567_v30, %v4654_v33  ;;  %v405_v45 = vsel %vm4630_vm4, %v403_v26, %v404_v31  ;;  %v573_v20 = vsel %vm4704_vm7, %v571_v55, %v572_v1 }
  0xf5   :  { %v552_v19 = vcombine.low %v513_v4, %v515_v48  ;;  %v553_v9 = vcombine.high %v513_v4, %v515_v48  ;;  %v737_v0 = vcombine.low %v686_v37, %v688_v49  ;;  %v738_v2 = vcombine.high %v686_v37, %v688_v49 }
  0xf6   :  { %v517_v5 = vpop.f32.mrf.mxu0  ;;  %v690_v10 = vpop.f32.mrf.mxu1  ;;  %v576_v22 = vsel %vm4704_vm7, %v574_v47, %v575_v42  ;;  %v579_v36 = vsel %vm4704_vm7, %v577_v14, %v578_v57  ;;  %v4769_v1 = vadd.f32 %v405_v45, %v224_v56  ;;  %v613_v41 = vadd.f32 %v570_v61, %v4662_v40 }
  0xf7   :  { %v582_v23 = vrot.slane %v552_v19, 6  ;;  %v585_v43 = vrot.slane %v553_v9, 6  ;;  %v3569_v46 = vrot.slane %v737_v0, 11  ;;  %v756_v33 = vrot.slane %v738_v2, 7 }
  0xf8   :  { %v519_v24 = vpop.f32.mrf.mxu0  ;;  %v692_v3 = vpop.f32.mrf.mxu1  ;;  %v4779_v30 = vadd.f32 %v573_v20, %v4672_v58  ;;  %v615_v50 = vadd.f32 %v576_v22, %v4680_v12  ;;  %v4785_v48 = vadd.f32 %v579_v36, %v4690_v18  ;;  %vm1765_vm4 = vsmask.f32 3336 }
  0xf9   :  { %v554_v25 = vcombine.low %v517_v5, %v519_v24  ;;  %v555_v28 = vcombine.high %v517_v5, %v519_v24  ;;  %v739_v29 = vcombine.low %v690_v10, %v692_v3  ;;  %v740_v8 = vcombine.high %v690_v10, %v692_v3  ;;  %vm1766_vm6 = vmor %vm1764_vm3, %vm1765_vm4 }
  0xfa   :  { %v523_v32 = vpop.f32.mrf.mxu0  ;;  %v696_v63 = vpop.f32.mrf.mxu1  ;;  %v584_v42 = vrot.slane %v582_v23, 4  ;;  %v583_v53 = vsel %vm4704_vm7, %v3555_v15, %v582_v23  ;;  %v587_v56 = vrot.slane %v585_v43, 4  ;;  %v757_v19 = vsel %vm4773_vm10, %v3569_v46, %v756_v33 }
  0xfb   :  { %v588_v4 = vrot.slane %v554_v25, 6  ;;  %v759_v44 = vrot.slane %v739_v29, 7  ;;  %v762_v21 = vrot.slane %v740_v8, 7  ;;  %v591_v40 = vrot.slane %v555_v28, 6 }
  0xfc   :  { %v525_v26 = vpop.f32.mrf.mxu0  ;;  %v698_v31 = vpop.f32.mrf.mxu1  ;;  %v758_v9 = vrot.slane %v756_v33, 4  ;;  %v586_v2 = vsel %vm4704_vm7, %v584_v42, %v585_v43  ;;  %v804_v22 = vadd.f32 %v757_v19, %v4735_v38  ;;  %v4793_v23 = vadd.f32 %v583_v53, %v4700_v35 }
  0xfd   :  { %v556_v47 = vcombine.low %v523_v32, %v525_v26  ;;  %v590_v49 = vrot.slane %v588_v4, 4  ;;  %v741_v55 = vcombine.low %v696_v63, %v698_v31  ;;  %v761_v61 = vrot.slane %v759_v44, 4 }
  0xfe   :  { %v527_v58 = vpop.f32.mrf.mxu0  ;;  %v700_v57 = vpop.f32.mrf.mxu1  ;;  %v742_v12 = vcombine.high %v696_v63, %v698_v31  ;;  %v764_v5 = vrot.slane %v762_v21, 4  ;;  %v557_v10 = vcombine.high %v523_v32, %v525_v26  ;;  %v589_v24 = vsel %vm4704_vm7, %v587_v56, %v588_v4 }
  0xff   :  { %v594_v0 = vrot.slane %v556_v47, 6  ;;  %v765_v14 = vrot.slane %v741_v55, 7  ;;  %v592_v3 = vsel %vm4704_vm7, %v590_v49, %v591_v40  ;;  %v593_v36 = vrot.slane %v591_v40, 4 }
 0x100   :  { %v528_v18 = vpop.f32.mrf.mxu0  ;;  %v702_v15 = vpop.f32.mrf.mxu1  ;;  %v768_v45 = vrot.slane %v742_v12, 7  ;;  %v760_v29 = vsel %vm4773_vm10, %v758_v9, %v759_v44  ;;  %v763_v38 = vsel %vm4773_vm10, %v761_v61, %v762_v21  ;;  %v597_v35 = vrot.slane %v557_v10, 6 }
 0x101   :  { %v743_v20 = vcombine.low %v700_v57, %v702_v15  ;;  %v767_v43 = vrot.slane %v765_v14, 4  ;;  %v596_v33 = vrot.slane %v594_v0, 4  ;;  %v744_v28 = vcombine.high %v700_v57, %v702_v15 }
 0x102   :  { %v706_v46 = vpop.f32.mrf.mxu1  ;;  %v879_v25 = vpop.f32.mrf.mxu0  ;;  %v770_v8 = vrot.slane %v768_v45, 4  ;;  %v766_v42 = vsel %vm4773_vm10, %v764_v5, %v765_v14  ;;  %v595_v44 = vsel %vm4704_vm7, %v593_v36, %v594_v0  ;;  %v805_v21 = vadd.f32 %v760_v29, %v4756_v16 }
 0x103   :  { %v771_v32 = vrot.slane %v743_v20, 7  ;;  %v769_v56 = vsel %vm4773_vm10, %v767_v43, %v768_v45  ;;  %v806_v40 = vadd.f32 %v763_v38, %v613_v41  ;;  %v618_v55 = vadd.f32 %v586_v2, %v4727_v27 }
 0x104   :  { %v708_v63 = vpop.f32.mrf.mxu1  ;;  %v881_v4 = vpop.f32.mrf.mxu0  ;;  %v598_v58 = vsel %vm4704_vm7, %v596_v33, %v597_v35  ;;  %v3570_v57 = vrot.slane %v744_v28, 11  ;;  %v807_v10 = vadd.f32 %v766_v42, %v4779_v30  ;;  %v808_v0 = vadd.f32 %v769_v56, %v615_v50 }
 0x105   :  { %v745_v26 = vcombine.low %v706_v46, %v708_v63  ;;  %v746_v31 = vcombine.high %v706_v46, %v708_v63  ;;  %v930_v53 = vcombine.high %v879_v25, %v881_v4  ;;  %v4817_v14 = vadd.f32 %v589_v24, %v4732_v34 }
 0x106   :  { %v710_v47 = vpop.f32.mrf.mxu1  ;;  %v883_v49 = vpop.f32.mrf.mxu0  ;;  %v772_v52 = vsel %vm4773_vm10, %v770_v8, %v771_v32  ;;  %v4823_v20 = vadd.f32 %v592_v3, %v4746_v54  ;;  %v4826_v30 = vadd.f32 %v595_v44, %v4753_v62  ;;  %v4832_v24 = vadd.f32 %v598_v58, %v4769_v1 }
 0x107   :  { %v775_v19 = vrot.slane %v745_v26, 7  ;;  %v954_v9 = vadd.f32 %v930_v53, %v804_v22  ;;  %v4813_v61 = vrot.slane %v746_v31, 7  ;;  %v809_v54 = vadd.f32 %v772_v52, %v4785_v48 }
 0x108   :  { %v712_v12 = vpop.f32.mrf.mxu1  ;;  %v885_v5 = vpop.f32.mrf.mxu0  ;;  %vm1769_vm7 = vsmask.f32 7448  ;;  %vm2310_vm4 = vsmask.f32 256 }
 0x109   :  { %v777_v16 = vrot.slane %v775_v19, 4  ;;  %v980_v41 = vadd.f32 %v4708_v13, %v954_v9  ;;  %v747_v27 = vcombine.low %v710_v47, %v712_v12  ;;  %v931_v2 = vcombine.low %v883_v49, %v885_v5 }
 0x10a   :  { %v932_v18 = vcombine.high %v883_v49, %v885_v5  ;;  %v716_v15 = vpop.f32.mrf.mxu1  ;;  %v889_v45 = vpop.f32.mrf.mxu0  ;;  %v748_v50 = vcombine.high %v710_v47, %v712_v12  ;;  %v776_v22 = vsel %vm4773_vm10, %v3570_v57, %v775_v19  ;;  %v780_v38 = vrot.slane %v4813_v61, 4 }
 0x10b   :  { %v1010_v34 = vrot.slane %v980_v41, %v4711_v17  ;;  %v955_v36 = vadd.f32 %v931_v2, %v805_v21  ;;  %v779_v62 = vsel %vm4773_vm10, %v777_v16, %v4813_v61  ;;  %v4838_v28 = vrot.slane %v747_v27, 7 }
 0x10c   :  { %v956_v43 = vadd.f32 %v932_v18, %v806_v40  ;;  %v718_v46 = vpop.f32.mrf.mxu1  ;;  %v891_v25 = vpop.f32.mrf.mxu0  ;;  %v810_v63 = vadd.f32 %v776_v22, %v4793_v23  ;;  %v4844_v4 = vrot.slane %v748_v50, 7  ;;  %v811_v26 = vadd.f32 %v779_v62, %v618_v55 }
 0x10d   :  { %v1011_v3 = vcombine.high %v1010_v34, %v1010_v34  ;;  %v3584_v33 = vrot.slane %v1010_v34, 9  ;;  %v749_v29 = vcombine.low %v716_v15, %v718_v46  ;;  %v981_v1 = vadd.f32 %v4713_v59, %v955_v36 }
 0x10e   :  { %v982_v35 = vadd.f32 %v4708_v13, %v956_v43  ;;  %v893_v8 = vpop.f32.mrf.mxu0  ;;  %v720_v32 = vpop.f32.mrf.mxu1  ;;  %v933_v42 = vcombine.low %v889_v45, %v891_v25  ;;  %v934_v44 = vcombine.high %v889_v45, %v891_v25  ;;  %v783_v40 = vrot.slane %v4838_v28, 4 }
 0x10f   :  { %v3585_v48 = vrot.slane %v1011_v3, 9  ;;  %v4846_v31 = vmax.f32 %v1010_v34, %v3584_v33  ;;  %v1018_v53 = vrot.slane %v981_v1, %v4711_v17  ;;  %v750_v58 = vcombine.high %v716_v15, %v718_v46 }
 0x110   :  { %v1026_v56 = vrot.slane %v982_v35, %v4711_v17  ;;  %v895_v47 = vpop.f32.mrf.mxu0  ;;  %v721_v49 = vpop.f32.mrf.mxu1  ;;  %v4853_v23 = vrot.slane %v749_v29, 7  ;;  %v786_v5 = vrot.slane %v4844_v4, 4  ;;  %v957_v16 = vadd.f32 %v933_v42, %v807_v10 }
 0x111   :  { %v4850_v21 = vmax.f32 %v1011_v3, %v3585_v48  ;;  %v1019_v57 = vcombine.high %v1018_v53, %v1018_v53  ;;  %v3586_v9 = vrot.slane %v1018_v53, 9  ;;  %v958_v41 = vadd.f32 %v934_v44, %v808_v0 }
 0x112   :  { %v1027_v19 = vcombine.high %v1026_v56, %v1026_v56  ;;  %v3588_v55 = vrot.slane %v1026_v56, 9  ;;  %v899_v61 = vpop.f32.mrf.mxu0  ;;  %v1277_v27 = vrot.slane %v4846_v31, %v4675_v60  ;;  %v4864_v34 = vrot.slane %v750_v58, 7 }
 0x113   :  { %v1285_v12 = vrot.slane %v4850_v21, %v4675_v60  ;;  %v3587_v52 = vrot.slane %v1019_v57, 9  ;;  %v4860_v18 = vmax.f32 %v1018_v53, %v3586_v9  ;;  %v984_v50 = vadd.f32 %v4708_v13, %v958_v41 }
 0x114   :  { %v3589_v2 = vrot.slane %v1027_v19, 9  ;;  %v901_v15 = vpop.f32.mrf.mxu0  ;;  %v4862_v45 = vmax.f32 %v1026_v56, %v3588_v55  ;;  %v935_v22 = vcombine.low %v893_v8, %v895_v47  ;;  %v1281_v36 = vrot.slane %v4846_v31, %v4718_v11 }
 0x115   :  { %v1289_v10 = vrot.slane %v4850_v21, %v4718_v11  ;;  %v4872_v0 = vsel %vm1466_vm11, %v1285_v12, %v1277_v27  ;;  %v789_v43 = vrot.slane %v4853_v23, 4  ;;  %v4875_v25 = vmax.f32 %v1019_v57, %v3587_v52 }
 0x116   :  { %v903_v46 = vpop.f32.mrf.mxu0  ;;  %v4877_v62 = vmax.f32 %v1027_v19, %v3589_v2  ;;  %v983_v3 = vadd.f32 %v4713_v59, %v957_v16  ;;  %v1042_v33 = vrot.slane %v984_v50, %v4711_v17  ;;  %v1293_v29 = vrot.slane %v4860_v18, %v4675_v60 }
 0x117   :  { %v1297_v1 = vrot.slane %v4860_v18, %v4718_v11  ;;  %v959_v35 = vadd.f32 %v935_v22, %v809_v54  ;;  %v936_v8 = vcombine.low %v899_v61, %v901_v15  ;;  %v1309_v48 = vrot.slane %v4862_v45, %v4675_v60 }
 0x118   :  { %v905_v32 = vpop.f32.mrf.mxu0  ;;  %v1043_v42 = vcombine.high %v1042_v33, %v1042_v33  ;;  %v3592_v53 = vrot.slane %v1042_v33, 9  ;;  %v937_v56 = vcombine.high %v899_v61, %v901_v15  ;;  %v1313_v44 = vrot.slane %v4862_v45, %v4718_v11 }
 0x119   :  { %v985_v47 = vadd.f32 %v4713_v59, %v959_v35  ;;  %v960_v49 = vadd.f32 %v936_v8, %v810_v63  ;;  %v782_v58 = vsel %vm4773_vm10, %v780_v38, %v4838_v28  ;;  %v1301_v54 = vrot.slane %v4875_v25, %v4675_v60 }
 0x11a   :  { %v4893_v57 = vpop.f32.mrf.mxu0  ;;  %v4898_v19 = vrot.slane %v983_v3, %v4711_v17  ;;  %v3593_v9 = vrot.slane %v1043_v42, 9  ;;  %v961_v55 = vadd.f32 %v937_v56, %v811_v26  ;;  %v785_v63 = vsel %vm4773_vm10, %v783_v40, %v4844_v4 }
 0x11b   :  { %v1050_v61 = vrot.slane %v985_v47, %v4711_v17  ;;  %v986_v12 = vadd.f32 %v4708_v13, %v960_v49  ;;  %v938_v16 = vcombine.low %v903_v46, %v905_v32  ;;  %v4905_v38 = vmax.f32 %v1042_v33, %v3592_v53 }
 0x11c   :  { %v911_v28 = vpop.f32.mrf.mxu0  ;;  %v4907_v41 = vmax.f32 %v1043_v42, %v3593_v9  ;;  %v987_v27 = vadd.f32 %v4713_v59, %v961_v55  ;;  %v812_v52 = vadd.f32 %v782_v58, %v4817_v14  ;;  %v939_v50 = vcombine.high %v903_v46, %v905_v32 }
 0x11d   :  { %v1051_v2 = vcombine.high %v1050_v61, %v1050_v61  ;;  %v3594_v26 = vrot.slane %v1050_v61, 9  ;;  %v1058_v15 = vrot.slane %v986_v12, %v4711_v17  ;;  %v1305_v3 = vrot.slane %v4875_v25, %v4718_v11 }
 0x11e   :  { %v913_v22 = vpop.f32.mrf.mxu0  ;;  %v4915_v40 = vrot.slane %v987_v27, %v4711_v17  ;;  %v813_v33 = vadd.f32 %v785_v63, %v4823_v20  ;;  %v962_v35 = vadd.f32 %v938_v16, %v812_v52  ;;  %v3590_v47 = vrot.slane %v4898_v19, 9 }
 0x11f   :  { %v3595_v8 = vrot.slane %v1051_v2, 9  ;;  %v4918_v42 = vmax.f32 %v1050_v61, %v3594_v26  ;;  %v1059_v53 = vcombine.high %v1058_v15, %v1058_v15  ;;  %v3596_v14 = vrot.slane %v1058_v15, 9 }
 0x120   :  { %v914_v56 = vpop.f32.mrf.mxu0  ;;  %v1341_v46 = vrot.slane %v4905_v38, %v4675_v60  ;;  %v963_v32 = vadd.f32 %v939_v50, %v813_v33  ;;  %v988_v49 = vadd.f32 %v4708_v13, %v962_v35  ;;  %v1345_v58 = vrot.slane %v4905_v38, %v4718_v11 }
 0x121   :  { %v1349_v20 = vrot.slane %v4907_v41, %v4675_v60  ;;  %v1353_v9 = vrot.slane %v4907_v41, %v4718_v11  ;;  %v788_v55 = vsel %vm4773_vm10, %v786_v5, %v4853_v23  ;;  %v3598_v61 = vrot.slane %v4915_v40, 9 }
 0x122   :  { %v989_v12 = vadd.f32 %v4713_v59, %v963_v32  ;;  %v1074_v63 = vrot.slane %v988_v49, %v4711_v17  ;;  %v791_v16 = vsel %vm4773_vm10, %v789_v43, %v4864_v34  ;;  %v4941_v27 = vmax.f32 %v1051_v2, %v3595_v8  ;;  %vm1768_vm10 = vmor %vm1766_vm6, %vm1767_vm5 }
 0x123   :  { %v1357_v52 = vrot.slane %v4918_v42, %v4675_v60  ;;  %v3597_v4 = vrot.slane %v1059_v53, 9  ;;  %v4945_v26 = vmax.f32 %v1058_v15, %v3596_v14  ;;  %v814_v22 = vadd.f32 %v788_v55, %v4826_v30  ;;  %vm5297_vm3 = vmor %vm1768_vm10, %vm1769_vm7 }
 0x124   :  { %v1075_v23 = vcombine.high %v1074_v63, %v1074_v63  ;;  %v1082_v5 = vrot.slane %v989_v12, %v4711_v17  ;;  %v3600_v50 = vrot.slane %v1074_v63, 9  ;;  %v815_v33 = vadd.f32 %v791_v16, %v4832_v24 }
 0x125   :  { %v940_v37 = vcombine.low %v4893_v57, %v911_v28  ;;  %v941_v34 = vcombine.high %v4893_v57, %v911_v28  ;;  %v1035_v43 = vcombine.high %v4898_v19, %v4898_v19  ;;  %v1361_v14 = vrot.slane %v4918_v42, %v4718_v11 }
 0x126   :  { %v1083_v2 = vcombine.high %v1082_v5, %v1082_v5  ;;  %v3601_v15 = vrot.slane %v1075_v23, 9  ;;  %v3602_v35 = vrot.slane %v1082_v5, 9  ;;  %v4954_v8 = vmax.f32 %v1074_v63, %v3600_v50 }
 0x127   :  { %v964_v30 = vadd.f32 %v940_v37, %v814_v22  ;;  %v965_v56 = vadd.f32 %v941_v34, %v815_v33  ;;  %v3591_v24 = vrot.slane %v1035_v43, 9  ;;  %v1365_v57 = vrot.slane %v4941_v27, %v4675_v60 }
 0x128   :  { %v3603_v28 = vrot.slane %v1083_v2, 9  ;;  %v4960_v32 = vmax.f32 %v1075_v23, %v3601_v15  ;;  %v4962_v49 = vmax.f32 %v1082_v5, %v3602_v35  ;;  %v1369_v55 = vrot.slane %v4941_v27, %v4718_v11 }
 0x129   :  { %v990_v12 = vadd.f32 %v4708_v13, %v964_v30  ;;  %v991_v63 = vadd.f32 %v4713_v59, %v965_v56  ;;  %v1202_v16 = vmax.f32 %v4898_v19, %v3590_v47  ;;  %v4969_v50 = vmax.f32 %v1059_v53, %v3597_v4 }
 0x12a   :  { %v1377_v22 = vrot.slane %v4945_v26, %v4718_v11  ;;  %v1409_v23 = vrot.slane %v4954_v8, %v4718_v11  ;;  %v1203_v5 = vmax.f32 %v1035_v43, %v3591_v24  ;;  %v4975_v33 = vmax.f32 %v1083_v2, %v3603_v28 }
 0x12b   :  { %v1413_v37 = vrot.slane %v4960_v32, %v4675_v60  ;;  %v1417_v13 = vrot.slane %v4960_v32, %v4718_v11  ;;  %v1090_v59 = vrot.slane %v990_v12, %v4711_v17  ;;  %v1425_v19 = vrot.slane %v4962_v49, %v4718_v11 }
 0x12c   :  { %v1098_v53 = vrot.slane %v991_v63, %v4711_v17  ;;  %v1321_v47 = vrot.slane %v4877_v62, %v4718_v11  ;;  %v1479_v4 = vsel %vm1466_vm11, %v1289_v10, %v1281_v36  ;;  %v1329_v2 = vrot.slane %v1202_v16, %v4718_v11 }
 0x12d   :  { %v1091_v34 = vcombine.high %v1090_v59, %v1090_v59  ;;  %v3604_v43 = vrot.slane %v1090_v59, 9  ;;  %v1480_v15 = vsel %vm1468_vm12, %v1297_v1, %v1479_v4  ;;  %v1337_v35 = vrot.slane %v1203_v5, %v4718_v11 }
 0x12e   :  { %v1481_v31 = vsel %vm1470_vm13, %v1305_v3, %v1480_v15  ;;  %v1317_v21 = vrot.slane %v4877_v62, %v4675_v60  ;;  %v1325_v36 = vrot.slane %v1202_v16, %v4675_v60  ;;  %v1333_v1 = vrot.slane %v1203_v5, %v4675_v60 }
 0x12f   :  { %v3605_v10 = vrot.slane %v1091_v34, 9  ;;  %v1482_v30 = vsel %vm752_vm9, %v1313_v44, %v1481_v31  ;;  %v1469_v56 = vsel %vm1468_vm12, %v1293_v29, %v4872_v0  ;;  %v5017_v3 = vmax.f32 %v1090_v59, %v3604_v43 }
 0x130   :  { %v1483_v62 = vsel %vm1473_vm14, %v1321_v47, %v1482_v30  ;;  %v1471_v24 = vsel %vm1470_vm13, %v1301_v54, %v1469_v56  ;;  %v1067_v44 = vcombine.high %v4915_v40, %v4915_v40  ;;  %v1433_v28 = vrot.slane %v4975_v33, %v4718_v11 }
 0x131   :  { %v1484_v12 = vsel %vm1475_vm15, %v1329_v2, %v1483_v62  ;;  %v1472_v18 = vsel %vm752_vm9, %v1309_v48, %v1471_v24  ;;  %v1210_v0 = vmax.f32 %v4915_v40, %v3598_v61  ;;  %v5036_v25 = vmax.f32 %v1091_v34, %v3605_v10 }
 0x132   :  { %v1485_v29 = vsel %vm1477_vm0, %v1337_v35, %v1484_v12  ;;  %v1474_v54 = vsel %vm1473_vm14, %v1317_v21, %v1472_v18  ;;  %v3599_v63 = vrot.slane %v1067_v44, 9  ;;  %v3606_v16 = vrot.slane %v1098_v53, 9 }
 0x133   :  { %3608 = vmatprep.mubr.msk.f32.mxu1 %vm1517_vm1, %v1485_v29  ;;  %3611 = vmatprep.mubr.msk.f32.mxu0 %vm1517_vm1, %v1485_v29  ;;  %v1476_v45 = vsel %vm1475_vm15, %v1325_v36, %v1474_v54  ;;  %v1385_v48 = vrot.slane %v4969_v50, %v4718_v11  ;;  %v1493_v40 = vsel %vm1466_vm11, %v1353_v9, %v1345_v58  ;;  %v1763_v29 = vld [vmem:[%s5857_s5 + $0x70] sm:$0xff]  ;;  %vm2311_vm5 = vsmask.f32 2312 }
 0x134   :  { %v1441_v61 = vrot.slane %v5017_v3, %v4718_v11  ;;  %v1478_v5 = vsel %vm1477_vm0, %v1333_v1, %v1476_v45  ;;  %v1211_v59 = vmax.f32 %v1067_v44, %v3599_v63  ;;  %v1494_v47 = vsel %vm1468_vm12, %v1361_v14, %v1493_v40  ;;  %v3987_v45 = vld [vmem:[%s5857_s5 + $0x64] ss:$8 sps:$4 sm:$0xff]   ;;  %v3985_v40 = vld [vmem:[%s5857_s5 + $0x60] ss:$8 sps:$4 sm:$0xff]   ;;  %vm2312_vm6 = vmor %vm2310_vm4, %vm2311_vm5 }
 0x135   :  { %1589 = vmatmul.mubr.f32.vlgmr.msra.gmra.mxu1 %v1478_v5  ;;  %1699 = vmatmul.mubr.f32.vlgmr.msra.gmra.mxu0 %v1478_v5  ;;  %v1393_v4 = vrot.slane %v1210_v0, %v4718_v11  ;;  %v1495_v34 = vsel %vm1470_vm13, %v1369_v55, %v1494_v47  ;;  %v1373_v43 = vrot.slane %v4945_v26, %v4675_v60  ;;  %v3990_v5 = vld [vmem:[%s5857_s5 + $0x54] ss:$8 sps:$4 sm:$0xff]   ;;  %vm2313_vm7 = vsmask.f32 4368  ;;  %vm2127_vm5 = vmor %vm751_vm8, %vm1468_vm12 }
 0x136   :  { %v1496_v2 = vsel %vm752_vm9, %v1377_v22, %v1495_v34  ;;  %v1381_v58 = vrot.slane %v4969_v50, %v4675_v60  ;;  %v1389_v9 = vrot.slane %v1210_v0, %v4675_v60  ;;  %v1486_v14 = vsel %vm1466_vm11, %v1349_v20, %v1341_v46  ;;  %v3995_v34 = vld [vmem:[%s5857_s5 + $0x44] ss:$8 sps:$4 sm:$0xff]   ;;  %vm2314_vm10 = vmor %vm2312_vm6, %vm2313_vm7 }
 0x137   :  { %v1401_v55 = vrot.slane %v1211_v59, %v4718_v11  ;;  %v1497_v15 = vsel %vm1473_vm14, %v1385_v48, %v1496_v2  ;;  %v1487_v26 = vsel %vm1468_vm12, %v1357_v52, %v1486_v14  ;;  %v1099_v50 = vcombine.high %v1098_v53, %v1098_v53  ;;  %v3629_v48 = vld [vmem:[%s5857_s5 + $0xe8] sm:$0xff]  ;;  %v3998_v2 = vld [vmem:[%s5857_s5 + $0xdc] ss:$8 sps:$4 sm:$0xff]   ;;  %v3999_v14 = vld [vmem:[%s5857_s5 + $0x30] ss:$8 sps:$4 sm:$0xff]  }
 0x138   :  { %v1498_v22 = vsel %vm1475_vm15, %v1393_v4, %v1497_v15  ;;  %v1488_v38 = vsel %vm1470_vm13, %v1365_v57, %v1487_v26  ;;  %v1218_v41 = vmax.f32 %v1098_v53, %v3606_v16  ;;  %v1507_v46 = vsel %vm1466_vm11, %v1417_v13, %v1409_v23  ;;  %v4002_v15 = vld [vmem:[%s5857_s5 + $0xc8] ss:$8 sps:$4 sm:$0xff]   ;;  %v4007_v26 = vld [vmem:[%s5857_s5 + $0x24] ss:$8 sps:$4 sm:$0xff]   ;;  %vm2129_vm6 = vmor %vm2127_vm5, %vm752_vm9 }
 0x139   :  { %v1499_v20 = vsel %vm1477_vm0, %v1401_v55, %v1498_v22  ;;  %v1489_v35 = vsel %vm752_vm9, %v1373_v43, %v1488_v38  ;;  %v3607_v31 = vrot.slane %v1099_v50, 9  ;;  %v1449_v42 = vrot.slane %v5036_v25, %v4718_v11  ;;  %v3993_v43 = vld [vmem:[%s5857_s5 + $0x40] ss:$8 sps:$4 sm:$0xff]   ;;  %v4004_v55 = vld [vmem:[%s5857_s5 + $0xcc] ss:$8 sps:$4 sm:$0xff]   ;;  %vm5444_vm7 = vmor %vm2129_vm6, %vm1475_vm15 }
 0x13a   :  { %3609 = vmatprep.mubr.msk.f32.mxu1 %vm1517_vm1, %v1499_v20  ;;  %3612 = vmatprep.mubr.msk.f32.mxu0 %vm1517_vm1, %v1499_v20  ;;  %v1397_v52 = vrot.slane %v1211_v59, %v4675_v60  ;;  %v1490_v27 = vsel %vm1473_vm14, %v1381_v58, %v1489_v35  ;;  %v1508_v57 = vsel %vm1468_vm12, %v1425_v19, %v1507_v46  ;;  %v3988_v59 = vld [vmem:[%s5857_s5 + $0x50] ss:$8 sps:$4 sm:$0xff]   ;;  %v4010_v22 = vld [vmem:[%s5857_s5 + $0xbc] ss:$8 sps:$4 sm:$0xff]   ;;  %v4016_v20 = vld [vmem:[%s5857_s5 + $0xac] ss:$8 sps:$4 sm:$0xff]  }
 0x13b   :  { %v1405_v23 = vrot.slane %v4954_v8, %v4675_v60  ;;  %v1491_v13 = vsel %vm1475_vm15, %v1389_v9, %v1490_v27  ;;  %v1219_v53 = vmax.f32 %v1099_v50, %v3607_v31  ;;  %v1509_v21 = vsel %vm1470_vm13, %v1433_v28, %v1508_v57  ;;  %v3996_v58 = vld [vmem:[%s5857_s5 + $0xd8] ss:$8 sps:$4 sm:$0xff]   ;;  %v4001_v9 = vld [vmem:[%s5857_s5 + $0x34] ss:$8 sps:$4 sm:$0xff]   ;;  %v4014_v35 = vld [vmem:[%s5857_s5 + $0xa8] ss:$8 sps:$4 sm:$0xff]  }
 0x13c   :  { %v1421_v36 = vrot.slane %v4962_v49, %v4675_v60  ;;  %v1492_v10 = vsel %vm1477_vm0, %v1397_v52, %v1491_v13  ;;  %v1457_v30 = vrot.slane %v1218_v41, %v4718_v11  ;;  %v1510_v1 = vsel %vm752_vm9, %v1441_v61, %v1509_v21  ;;  %v4005_v50 = vld [vmem:[%s5857_s5 + $0x20] ss:$8 sps:$4 sm:$0xff]   ;;  %v4011_v46 = vld [vmem:[%s5857_s5 + $0x10] ss:$8 sps:$4 sm:$0xff]   ;;  %v4019_v31 = vld [vmem:[%s5857_s5 + $0x4] ss:$8 sps:$4 sm:$0xff]  }
 0x13d   :  { %1594 = vmatmul.mubr.f32.gmra.mxu1 %v1492_v10  ;;  %1704 = vmatmul.mubr.f32.gmra.mxu0 %v1492_v10  ;;  %v1465_v19 = vrot.slane %v1219_v53, %v4718_v11  ;;  %v1511_v8 = vsel %vm1473_vm14, %v1449_v42, %v1510_v1  ;;  %v1437_v56 = vrot.slane %v5017_v3, %v4675_v60  ;;  %v4008_v38 = vld [vmem:[%s5857_s5 + $0xb8] ss:$8 sps:$4 sm:$0xff]   ;;  %v4022_v52 = vld [vmem:[%s5857_s5 + $0x9c] ss:$8 sps:$4 sm:$0xff]   ;;  %v4026_v13 = vld [vmem:[%s5857_s5 + $0x8c] ss:$8 sps:$4 sm:$0xff]  }
 0x13e   :  { %v1512_v62 = vsel %vm1475_vm15, %v1457_v30, %v1511_v8  ;;  %v1429_v49 = vrot.slane %v4975_v33, %v4675_v60  ;;  %v1445_v24 = vrot.slane %v5036_v25, %v4675_v60  ;;  %v1500_v44 = vsel %vm1466_vm11, %v1413_v37, %v1405_v23  ;;  %v4017_v42 = vld [vmem:[%s5857_s5] ss:$8 sps:$4 sm:$0xff]   ;;  %v5215_v57 = vld [vmem:[%s5857_s5 + $0x1d8] sm:$0xff] }
 0x13f   :  { %v1513_v28 = vsel %vm1477_vm0, %v1465_v19, %v1512_v62  ;;  %v1501_v12 = vsel %vm1468_vm12, %v1421_v36, %v1500_v44  ;;  %v1453_v33 = vrot.slane %v1218_v41, %v4675_v60  ;;  %v1461_v0 = vrot.slane %v1219_v53, %v4675_v60  ;;  %v4013_v41 = vld [vmem:[%s5857_s5 + $0x14] ss:$8 sps:$4 sm:$0xff]   ;;  %v4020_v27 = vld [vmem:[%s5857_s5 + $0x98] ss:$8 sps:$4 sm:$0xff]   ;;  %v4024_v53 = vld [vmem:[%s5857_s5 + $0x88] ss:$8 sps:$4 sm:$0xff]  }
 0x140   :  { %3610 = vmatprep.mubr.msk.f32.mxu1 %vm1517_vm1, %v1513_v28  ;;  %3613 = vmatprep.mubr.msk.f32.mxu0 %vm1517_vm1, %v1513_v28  ;;  %v1502_v3 = vsel %vm1470_vm13, %v1429_v49, %v1501_v12  ;;  %v3663_v54 = vcombine.high %v1763_v29, %v1763_v29  ;;  %v3662_v63 = vcombine.low %v1763_v29, %v1763_v29  ;;  %v4031_v21 = vld [vmem:[%s5857_s5 + $0x78] ss:$8 sps:$4 sm:$0xff]   ;;  %v4033_v36 = vld [vmem:[%s5857_s5 + $0x7c] ss:$8 sps:$4 sm:$0xff]   ;;  %vm1927_vm1 = vcmask 982016  }
 0x141   :  { %v1503_v18 = vsel %vm752_vm9, %v1437_v56, %v1502_v3  ;;  %v3645_v61 = vcombine.high %v3629_v48, %v3629_v48  ;;  %v3644_v47 = vcombine.low %v3629_v48, %v3629_v48  ;;  %v3733_v23 = vcombine.high %v5215_v57, %v5215_v57  ;;  %v5235_v10 = vld [vmem:[%s5857_s5 + $0x160] sm:$0xff] }
 0x142   :  { %v1504_v32 = vsel %vm1473_vm14, %v1445_v24, %v1503_v18  ;;  %3664 = vmatprep.subr.msk.bf16.mxu0 %vm1931_vm2, %v3663_v54  ;;  %v2077_v16 = vsel %vm1931_vm2, %v3662_v63, 0  ;;  %v3698_v30 = vcombine.high %v5235_v10, %v5235_v10 }
 0x143   :  { %v1505_v37 = vsel %vm1475_vm15, %v1453_v33, %v1504_v32  ;;  %2083 = vmatpush1.bf16.msra.mxu0 %v2077_v16  ;;  %3646 = vmatprep.subr.msk.bf16.mxu1 %vm1931_vm2, %v3645_v61  ;;  %v1933_v4 = vsel %vm1931_vm2, %v3644_v47, 0 }
 0x144   :  { %v1506_v25 = vsel %vm1477_vm0, %v1461_v0, %v1505_v37  ;;  %2084 = vmatprep.subr.bf16.mxu0 %v3987_v45  ;;  %1939 = vmatpush1.bf16.msra.mxu1 %v1933_v4 }
 0x145   :  { %1599 = vmatmul.mubr.f32.gmra.mxu1 %v1506_v25  ;;  %1709 = vmatmul.mubr.f32.gmra.mxu0 %v1506_v25 }
 0x146   :  { %2114 = vmatprep.mubr.bf16.mxu0 %v4148_v6  ;;  %1970 = vmatprep.mubr.bf16.mxu1 %v4148_v6 }
 0x147   :  { %2085 = vmatpush1.bf16.msra.mxu0 %v3985_v40  ;;  %1940 = vmatprep.subr.bf16.mxu1 %v3998_v2 }
 0x148   :  { %2086 = vmatprep.subr.bf16.mxu0 %v3990_v5  ;;  %1941 = vmatpush1.bf16.msra.mxu1 %v3996_v58 }
 0x149   :  { %1942 = vmatprep.subr.bf16.mxu1 %v4004_v55 }
 0x14b   :  { %2087 = vmatpush1.bf16.msra.mxu0 %v3988_v59 }
 0x14c   :  { %2088 = vmatprep.subr.bf16.mxu0 %v3995_v34  ;;  %1943 = vmatpush1.bf16.msra.mxu1 %v4002_v15 }
 0x14d   :  { %1944 = vmatprep.subr.bf16.mxu1 %v4010_v22 }
 0x14f   :  { %2089 = vmatpush1.bf16.msra.mxu0 %v3993_v43 }
 0x150   :  { %2090 = vmatprep.subr.bf16.mxu0 %v4001_v9  ;;  %1945 = vmatpush1.bf16.msra.mxu1 %v4008_v38 }
 0x151   :  { %1946 = vmatprep.subr.bf16.mxu1 %v4016_v20 }
 0x153   :  { %2091 = vmatpush1.bf16.msra.mxu0 %v3999_v14 }
 0x154   :  { %2092 = vmatprep.subr.bf16.mxu0 %v4007_v26  ;;  %1947 = vmatpush1.bf16.msra.mxu1 %v4014_v35 }
 0x155   :  { %1948 = vmatprep.subr.bf16.mxu1 %v4022_v52 }
 0x157   :  { %2093 = vmatpush1.bf16.msra.mxu0 %v4005_v50 }
 0x158   :  { %2094 = vmatprep.subr.bf16.mxu0 %v4013_v41  ;;  %1949 = vmatpush1.bf16.msra.mxu1 %v4020_v27 }
 0x159   :  { %1950 = vmatprep.subr.bf16.mxu1 %v4026_v13 }
 0x15b   :  { %2095 = vmatpush1.bf16.msra.mxu0 %v4011_v46  ;;  %v3732_v46 = vcombine.low %v5215_v57, %v5215_v57 }
 0x15c   :  { %2096 = vmatprep.subr.bf16.mxu0 %v4019_v31  ;;  %1951 = vmatpush1.bf16.msra.mxu1 %v4024_v53 }
 0x15d   :  { %1952 = vmatprep.subr.bf16.mxu1 %v4033_v36 }
 0x15f   :  { %2097 = vmatpush1.bf16.msra.mxu0 %v4017_v42 }
 0x160   :  { %3734 = vmatprep.subr.msk.bf16.mxu0 %vm1931_vm2, %v3733_v23  ;;  %1953 = vmatpush1.bf16.msra.mxu1 %v4031_v21 }
 0x161   :  { %3699 = vmatprep.subr.msk.bf16.mxu1 %vm1931_vm2, %v3698_v30 }
 0x1f5   :  { %v1590_v1 = vpop.f32.mrf.mxu1  ;;  %v1700_v19 = vpop.f32.mrf.mxu0 }
 0x1f6   :  { %v1714_v62 = vmax.f32 %v1590_v1, %v1700_v19 }
 0x1f7   :  { %v1592_v8 = vpop.f32.mrf.mxu1  ;;  %v1702_v56 = vpop.f32.mrf.mxu0 }
 0x1f8   :  { %v1717_v3 = vmax.f32 %v1714_v62, 0.0  ;;  %v2451_v62 = vsel %vm1931_vm2, %v3732_v46, 0 }
 0x1fd   :  { %v1595_v49 = vpop.f32.mrf.mxu1  ;;  %v1705_v24 = vpop.f32.mrf.mxu0 }
 0x1fe   :  { %v1715_v44 = vmax.f32 %v1595_v49, %v1705_v24  ;;  %v4030_v49 = vld [vmem:[%s5857_s5 + $0x1cc] ss:$8 sps:$4 sm:$0xff]  }
 0x1ff   :  { %v1597_v28 = vpop.f32.mrf.mxu1  ;;  %v1707_v12 = vpop.f32.mrf.mxu0 }
 0x200   :  { %v1718_v33 = vmax.f32 %v1715_v44, 0.0 }
 0x202   :  { %v1720_v18 = vpack.c.bf16 %v1718_v33, %v1717_v3  ;;  %v3614_v0 = vpack.c.bf16 %v1718_v33, %v1718_v33  ;;  %v4028_v33 = vld [vmem:[%s5857_s5 + $0x1c8] ss:$8 sps:$4 sm:$0xff]  }
 0x204   :  { %v5241_v32 = vrot.slane %v1720_v18, %v4711_v17  ;;  %v5244_v37 = vrot.slane %v3614_v0, %v4711_v17 }
 0x205   :  { %v1600_v25 = vpop.f32.mrf.mxu1  ;;  %v1710_v29 = vpop.f32.mrf.mxu0 }
 0x206   :  { %v5248_v54 = vcombine.high %v5241_v32, %v5241_v32  ;;  %v1772_v63 = vshrl.u32 %v5241_v32, 16  ;;  %v1775_v16 = vshll.u32 %v5241_v32, 16  ;;  %v5254_v45 = vcombine.high %v5244_v37, %v5244_v37 }
 0x207   :  { %v1602_v48 = vpop.f32.mrf.mxu1  ;;  %v1712_v40 = vpop.f32.mrf.mxu0  ;;  %v1716_v47 = vmax.f32 %v1600_v25, %v1710_v29  ;;  %v1791_v14 = vshll.u32 %v5244_v37, 16  ;;  %v4036_v25 = vld [vmem:[%s5857_s5 + $0x1bc] ss:$8 sps:$4 sm:$0xff]   ;;  %v2323_v46 = vshrl.u32 %v5244_v37, 16 }
 0x208   :  { %v1785_v61 = vshrl.u32 %v5248_v54, 16  ;;  %v1774_v5 = vrot.slane %v1772_v63, 6  ;;  %v1777_v59 = vrot.slane %v1775_v16, 7  ;;  %v1796_v4 = vshrl.u32 %v5254_v45, 16 }
 0x209   :  { %v1799_v34 = vshll.u32 %v5254_v45, 16  ;;  %v1781_v43 = vshll.u32 %v5248_v54, 16  ;;  %v1719_v58 = vmax.f32 %v1716_v47, 0.0  ;;  %v1981_v55 = vcombine.low %v5241_v32, %v5248_v54  ;;  %v4034_v47 = vld [vmem:[%s5857_s5 + $0x1b8] ss:$8 sps:$4 sm:$0xff]  }
 0x20a   :  { %v1787_v2 = vrot.slane %v1785_v61, 6  ;;  %v1778_v26 = vor.u32 %v1777_v59, %v1774_v5  ;;  %v1798_v50 = vrot.slane %v1796_v4, 6  ;;  %v2519_v35 = vcombine.low %v5248_v54, %v5244_v37 }
 0x20b   :  { %v1783_v9 = vrot.slane %v1781_v43, 7  ;;  %v1721_v15 = vpack.c.bf16 %v1719_v58, %v1719_v58  ;;  %v1801_v22 = vrot.slane %v1799_v34, 7  ;;  %v1793_v57 = vrot.slane %v1791_v14, 7 }
 0x20c   :  { %v1779_v23 = vrot.slane %v1778_v26, 2  ;;  %v1989_v13 = vrot.slane %v1981_v55, %v4711_v17  ;;  %v3697_v40 = vcombine.low %v5235_v10, %v5235_v10  ;;  %v5328_v5 = vrot.slane %v2519_v35, %v4711_v17  ;;  %v4041_v10 = vld [vmem:[%s5857_s5 + $0x1ac] ss:$8 sps:$4 sm:$0xff]  }
 0x20d   :  { %v1788_v38 = vor.u32 %v1787_v2, %v1783_v9  ;;  %v5272_v41 = vrot.slane %v1721_v15, %v4711_v17  ;;  %v1802_v53 = vor.u32 %v1801_v22, %v1798_v50  ;;  %v4044_v15 = vld [vmem:[%s5857_s5 + $0x154] ss:$8 sps:$4 sm:$0xff]   ;;  %v4039_v50 = vld [vmem:[%s5857_s5 + $0x1a8] ss:$8 sps:$4 sm:$0xff]  }
 0x20e   :  { %v1784_v28 = vsel %vm5297_vm3, %v1779_v23, %v1783_v9  ;;  %v2258_v55 = vsel %vm1931_vm2, %v3697_v40, 0  ;;  %v4042_v22 = vld [vmem:[%s5857_s5 + $0x150] ss:$8 sps:$4 sm:$0xff]   ;;  %v2319_v23 = vrot.slane %v1785_v61, 7 }
 0x20f   :  { %v1789_v20 = vrot.slane %v1788_v38, 2  ;;  %v5280_v31 = vcombine.high %v5272_v41, %v5272_v41  ;;  %v1805_v42 = vshll.u32 %v5272_v41, 16  ;;  %v1809_v52 = vshrl.u32 %v5272_v41, 16  ;;  %v4047_v38 = vld [vmem:[%s5857_s5 + $0x19c] ss:$8 sps:$4 sm:$0xff]  }
 0x210   :  { %v1982_v27 = vcombine.low %v5254_v45, %v5272_v41  ;;  %v1803_v12 = vrot.slane %v1802_v53, 2  ;;  %v4053_v53 = vld [vmem:[%s5857_s5 + $0x18c] ss:$8 sps:$4 sm:$0xff]   ;;  %v2322_v19 = vrot.slane %v2319_v23, 2  ;;  %v4063_v40 = vld [vmem:[%s5857_s5 + $0x168] ss:$8 sps:$4 sm:$0xff]  }
 0x211   :  { %v1807_v21 = vrot.slane %v1805_v42, 7  ;;  %v1811_v36 = vrot.slane %v1809_v52, 6  ;;  %v1815_v1 = vshll.u32 %v5280_v31, 16  ;;  %v1794_v24 = vsel %vm5297_vm3, %v1789_v20, %v1793_v57  ;;  %v4050_v20 = vld [vmem:[%s5857_s5 + $0x144] ss:$8 sps:$4 sm:$0xff]  }
 0x212   :  { %v1996_v30 = vrot.slane %v1982_v27, %v4711_v17  ;;  %v1835_v18 = vcombine.low %v1784_v28, %v1794_v24  ;;  %v2520_v0 = vcombine.low %v5272_v41, %v5280_v31  ;;  %v2334_v26 = vshrl.u32 %v5280_v31, 16  ;;  %v4045_v27 = vld [vmem:[%s5857_s5 + $0x198] ss:$8 sps:$4 sm:$0xff]   ;;  %v4062_v24 = vld [vmem:[%s5857_s5 + $0x124] ss:$8 sps:$4 sm:$0xff]  }
 0x213   :  { %v1812_v8 = vor.u32 %v1811_v36, %v1807_v21  ;;  %v1817_v3 = vrot.slane %v1815_v1, 7  ;;  %v1808_v29 = vsel %vm5297_vm3, %v1803_v12, %v1807_v21  ;;  %v2330_v57 = vrot.slane %v1809_v52, 7  ;;  %v4056_v36 = vld [vmem:[%s5857_s5 + $0x134] ss:$8 sps:$4 sm:$0xff]   ;;  %v4051_v52 = vld [vmem:[%s5857_s5 + $0x188] ss:$8 sps:$4 sm:$0xff]  }
 0x214   :  { %v1997_v56 = vcombine.low %v1989_v13, %v1996_v30  ;;  %v5331_v59 = vrot.slane %v2520_v0, %v4711_v17  ;;  %v1843_v34 = vrot.slane %v1835_v18, %v4711_v17  ;;  %v2336_v35 = vrot.slane %v2334_v26, 7  ;;  %v4048_v13 = vld [vmem:[%s5857_s5 + $0x140] ss:$8 sps:$4 sm:$0xff]  }
 0x215   :  { %v1813_v44 = vrot.slane %v1812_v8, 2  ;;  %v2325_v21 = vrot.slane %v2323_v46, 7  ;;  %v2320_v30 = vor.u32 %v2319_v23, %v1781_v43  ;;  %v2331_v8 = vor.u32 %v2330_v57, %v1805_v42 }
 0x216   :  { %3665 = vmatmul.mubr.msk.bf16.vlgmr.msra.gmra.mxu0 %vm1927_vm1, %v1997_v56  ;;  %v2535_v58 = vcombine.low %v5328_v5, %v5331_v59  ;;  %v2337_v61 = vor.u32 %v2336_v35, %v1815_v1  ;;  %v2333_v56 = vrot.slane %v2330_v57, 2  ;;  %v4059_v1 = vld [vmem:[%s5857_s5 + $0x17c] ss:$8 sps:$4 sm:$0xff]   ;;  %v3701_v43 = vrot.slane %v1772_v63, 9  ;;  %v4057_v63 = vld [vmem:[%s5857_s5 + $0x178] ss:$8 sps:$4 sm:$0xff]  }
 0x217   :  { %2457 = vmatpush1.bf16.msra.mxu0 %v2451_v62  ;;  %2488 = vmatprep.mubr.bf16.mxu0 %v4148_v6  ;;  %v1818_v16 = vsel %vm5297_vm3, %v1813_v44, %v1817_v3  ;;  %vm2315_vm3 = vsmask.f32 6424  ;;  %v4054_v62 = vld [vmem:[%s5857_s5 + $0x130] ss:$8 sps:$4 sm:$0xff]   ;;  %v2326_v42 = vor.u32 %v2325_v21, %v1791_v14  ;;  %v3702_v44 = vrot.slane %v1796_v4, 9  ;;  %v2776_v59 = vld [vmem:[%s5859_s7 + $0x68] sm:$0xff] }
 0x218   :  { %2458 = vmatprep.subr.bf16.mxu0 %v4030_v49  ;;  %v1836_v48 = vcombine.low %v1808_v29, %v1818_v16  ;;  %vm5394_vm4 = vmor %vm2314_vm10, %vm2315_vm3  ;;  %v2141_v12 = vrot.slane %v5272_v41, 7  ;;  %v4060_v4 = vld [vmem:[%s5857_s5 + $0x120] ss:$8 sps:$4 sm:$0xff]   ;;  %v4065_v41 = vld [vmem:[%s5857_s5 + $0x16c] ss:$8 sps:$4 sm:$0xff]   ;;  %v2134_v0 = vrot.slane %v5248_v54, 7 }
 0x219   :  { %v2338_v28 = vsel %vm5394_vm4, %v2333_v56, %v2337_v61  ;;  %v2321_v14 = vsel %vm5394_vm4, %v3701_v43, %v2320_v30  ;;  %v2327_v3 = vsel %vm5394_vm4, %v2322_v19, %v2326_v42  ;;  %v4066_v54 = vld [vmem:[%s5857_s5 + $0x110] ss:$8 sps:$4 sm:$0xff]   ;;  %v3666_v26 = vrot.slane %v5241_v32, 9  ;;  %v4079_v61 = vld [vmem:[%s5857_s5 + $0x244] ss:$8 sps:$4 sm:$0xff]  }
 0x21a   :  { %v1850_v2 = vrot.slane %v1836_v48, %v4711_v17  ;;  %v2355_v29 = vcombine.low %v2321_v14, %v2327_v3  ;;  %v2143_v16 = vrot.slane %v2141_v12, 2  ;;  %v2144_v48 = vrot.slane %v5280_v31, 7  ;;  %v4082_v30 = vld [vmem:[%s5857_s5 + $0x234] ss:$8 sps:$4 sm:$0xff]   ;;  %v4080_v19 = vld [vmem:[%s5857_s5 + $0x230] ss:$8 sps:$4 sm:$0xff]  }
 0x21b   :  { %2459 = vmatpush1.bf16.msra.mxu0 %v4028_v33  ;;  %v2332_v33 = vsel %vm5394_vm4, %v3702_v44, %v2331_v8  ;;  %v2135_v46 = vsel %vm5444_vm7, %v3666_v26, %v2134_v0  ;;  %v4085_v8 = vld [vmem:[%s5857_s5 + $0x224] ss:$8 sps:$4 sm:$0xff]   ;;  %v4088_v56 = vld [vmem:[%s5857_s5 + $0x214] ss:$8 sps:$4 sm:$0xff]   ;;  %v4089_v49 = vld [vmem:[%s5857_s5 + $0x200] ss:$8 sps:$4 sm:$0xff]  }
 0x21c   :  { %2460 = vmatprep.subr.bf16.mxu0 %v4036_v25  ;;  %v1851_v9 = vcombine.low %v1843_v34, %v1850_v2  ;;  %v2356_v18 = vcombine.low %v2332_v33, %v2338_v28  ;;  %v4068_v25 = vld [vmem:[%s5857_s5 + $0x114] ss:$8 sps:$4 sm:$0xff]   ;;  %v2136_v34 = vrot.slane %v2134_v0, 2  ;;  %v4071_v2 = vld [vmem:[%s5857_s5 + $0x104] ss:$8 sps:$4 sm:$0xff]  }
 0x21d   :  { %v4094_v43 = vld [vmem:[%s5857_s5 + $0x1f4] ss:$8 sps:$4 sm:$0xff]   ;;  %v4092_v42 = vld [vmem:[%s5857_s5 + $0x1f0] ss:$8 sps:$4 sm:$0xff]   ;;  %v4095_v44 = vld [vmem:[%s5857_s5 + $0x1e0] ss:$8 sps:$4 sm:$0xff]  }
 0x21e   :  { %3647 = vmatmul.mubr.msk.bf16.vlgmr.msra.gmra.mxu1 %vm1927_vm1, %v1851_v9  ;;  %v2363_v9 = vrot.slane %v2355_v29, %v4711_v17  ;;  %v2778_v28 = vld [vmem:[%s5859_s7 + $0x78] sm:$0xff]  ;;  %v2957_v5 = vld [vmem:[%s5860_s8 + $0x70] sm:$0xff]  ;;  %v2775_v14 = vld [vmem:[%s5859_s7 + $0x60] sm:$0xff] }
 0x21f   :  { %2461 = vmatpush1.bf16.msra.mxu0 %v4034_v47  ;;  %2264 = vmatpush1.bf16.msra.mxu1 %v2258_v55  ;;  %v2370_v47 = vrot.slane %v2356_v18, %v4711_v17  ;;  %v3667_v55 = vrot.slane %v5254_v45, 9  ;;  %v4074_v45 = vld [vmem:[%s5857_s5 + $0xf4] ss:$8 sps:$4 sm:$0xff]   ;;  %v2955_v3 = vld [vmem:[%s5860_s8 + $0x60] sm:$0xff]  ;;  %v2772_v0 = vld [vmem:[%s5859_s7 + $0x48] sm:$0xff] }
 0x220   :  { %2462 = vmatprep.subr.bf16.mxu0 %v4041_v10  ;;  %2265 = vmatprep.subr.bf16.mxu1 %v4044_v15  ;;  %v2137_v10 = vrot.slane %v5244_v37, 7  ;;  %v2145_v15 = vsel %vm5444_vm7, %v2143_v16, %v2144_v48  ;;  %v2774_v33 = vld [vmem:[%s5859_s7 + $0x58] sm:$0xff]  ;;  %v2953_v18 = vld [vmem:[%s5860_s8 + $0x50] sm:$0xff]  ;;  %v2771_v29 = vld [vmem:[%s5859_s7 + $0x40] sm:$0xff] }
 0x221   :  { %2295 = vmatprep.mubr.bf16.mxu1 %v4148_v6  ;;  %v2142_v37 = vsel %vm5444_vm7, %v3667_v55, %v2141_v12  ;;  %v2958_v12 = vld [vmem:[%s5860_s8 + $0x78] sm:$0xff]  ;;  %v2951_v16 = vld [vmem:[%s5860_s8 + $0x40] sm:$0xff]  ;;  %v2945_v26 = vld [vmem:[%s5860_s8 + $0x10] sm:$0xff] }
 0x222   :  { %v2163_v32 = vcombine.low %v2142_v37, %v2145_v15  ;;  %v2770_v48 = vld [vmem:[%s5859_s7 + $0x38] sm:$0xff]  ;;  %v2767_v31 = vld [vmem:[%s5859_s7 + $0x20] sm:$0xff]  ;;  %v2765_v15 = vld [vmem:[%s5859_s7 + $0x10] sm:$0xff] }
 0x223   :  { %2463 = vmatpush1.bf16.msra.mxu0 %v4039_v50  ;;  %2266 = vmatpush1.bf16.msra.mxu1 %v4042_v22  ;;  %v2371_v50 = vcombine.low %v2363_v9, %v2370_v47  ;;  %v4069_v22 = vld [vmem:[%s5857_s5 + $0x100] ss:$8 sps:$4 sm:$0xff]   ;;  %v2949_v47 = vld [vmem:[%s5860_s8 + $0x30] sm:$0xff]  ;;  %v2766_v9 = vld [vmem:[%s5859_s7 + $0x18] sm:$0xff] }
 0x224   :  { %2464 = vmatprep.subr.bf16.mxu0 %v4047_v38  ;;  %2267 = vmatprep.subr.bf16.mxu1 %v4050_v20  ;;  %v2138_v38 = vsel %vm5444_vm7, %v2136_v34, %v2137_v10  ;;  %v3750_v20 = vld [vmem:[%s5857_s5 + $0x250] sm:$0xff]  ;;  %v2177_v23 = vrot.slane %v2163_v32, %v4711_v17  ;;  %v2768_v34 = vld [vmem:[%s5859_s7 + $0x28] sm:$0xff]  ;;  %v2947_v10 = vld [vmem:[%s5860_s8 + $0x20] sm:$0xff] }
 0x225   :  { %v2162_v35 = vcombine.low %v2135_v46, %v2138_v38  ;;  %v3766_v57 = vcombine.high %v3750_v20, %v3750_v20  ;;  %v2946_v55 = vld [vmem:[%s5860_s8 + $0x18] sm:$0xff]  ;;  %v2763_v38 = vld [vmem:[%s5859_s7] sm:$0xff]  ;;  %v2781_v46 = vld [vmem:[%s5859_s7 + $0x90] sm:$0xff] }
 0x226   :  { %v2943_v37 = vld [vmem:[%s5860_s8] sm:$0xff]  ;;  %v2962_v32 = vld [vmem:[%s5860_s8 + $0x98] sm:$0xff] }
 0x227   :  { %2465 = vmatpush1.bf16.msra.mxu0 %v4045_v27  ;;  %2268 = vmatpush1.bf16.msra.mxu1 %v4048_v13  ;;  %v4072_v27 = vld [vmem:[%s5857_s5 + $0xf0] ss:$8 sps:$4 sm:$0xff]   ;;  %v3765_v13 = vcombine.low %v3750_v20, %v3750_v20 }
 0x228   :  { %2466 = vmatprep.subr.bf16.mxu0 %v4053_v53  ;;  %2269 = vmatprep.subr.bf16.mxu1 %v4056_v36  ;;  %v2170_v53 = vrot.slane %v2162_v35, %v4711_v17  ;;  %v2961_v20 = vld [vmem:[%s5860_s8 + $0x90] sm:$0xff]  ;;  %v2780_v35 = vld [vmem:[%s5859_s7 + $0x88] sm:$0xff] }
 0x229   :  { %v2615_v36 = vsel %vm1931_vm2, %v3765_v13, 0 }
 0x22a   :  { %v2178_v21 = vcombine.low %v2170_v53, %v2177_v23  ;;  %v2779_v23 = vld [vmem:[%s5859_s7 + $0x80] sm:$0xff] }
 0x22b   :  { %2467 = vmatpush1.bf16.msra.mxu0 %v4051_v52  ;;  %2270 = vmatpush1.bf16.msra.mxu1 %v4054_v62  ;;  %v4077_v52 = vld [vmem:[%s5857_s5 + $0x240] ss:$8 sps:$4 sm:$0xff]   ;;  %v4086_v62 = vld [vmem:[%s5857_s5 + $0x210] ss:$8 sps:$4 sm:$0xff]  }
 0x22c   :  { %2468 = vmatprep.subr.bf16.mxu0 %v4059_v1  ;;  %2271 = vmatprep.subr.bf16.mxu1 %v4062_v24  ;;  %v4091_v1 = vld [vmem:[%s5857_s5 + $0x204] ss:$8 sps:$4 sm:$0xff]  }
 0x22d   :  { %v4097_v24 = vld [vmem:[%s5857_s5 + $0x1e4] ss:$8 sps:$4 sm:$0xff]  }
 0x22f   :  { %2469 = vmatpush1.bf16.msra.mxu0 %v4057_v63  ;;  %2272 = vmatpush1.bf16.msra.mxu1 %v4060_v4  ;;  %v2777_v63 = vld [vmem:[%s5859_s7 + $0x70] sm:$0xff]  ;;  %v2954_v4 = vld [vmem:[%s5860_s8 + $0x58] sm:$0xff] }
 0x230   :  { %2470 = vmatprep.subr.bf16.mxu0 %v4065_v41  ;;  %2273 = vmatprep.subr.bf16.mxu1 %v4068_v25  ;;  %v2773_v41 = vld [vmem:[%s5859_s7 + $0x50] sm:$0xff]  ;;  %v2952_v25 = vld [vmem:[%s5860_s8 + $0x48] sm:$0xff] }
 0x233   :  { %2471 = vmatpush1.bf16.msra.mxu0 %v4063_v40  ;;  %2274 = vmatpush1.bf16.msra.mxu1 %v4066_v54  ;;  %v2950_v40 = vld [vmem:[%s5860_s8 + $0x38] sm:$0xff]  ;;  %v2769_v54 = vld [vmem:[%s5859_s7 + $0x30] sm:$0xff] }
 0x234   :  { %2873 = vmatprep.subr.mxu0 %v4149_v51  ;;  %2275 = vmatprep.subr.bf16.mxu1 %v4071_v2  ;;  %v2948_v2 = vld [vmem:[%s5860_s8 + $0x28] sm:$0xff] }
 0x236   :  { %3735 = vmatmul.mubr.msk.bf16.vlgmr.msra.gmra.mxu0 %vm1927_vm1, %v2371_v50  ;;  %v2764_v50 = vld [vmem:[%s5859_s7 + $0x8] sm:$0xff] }
 0x237   :  { %2276 = vmatpush1.bf16.msra.mxu1 %v4069_v22  ;;  %2874 = vmatpush1.msra.mxu0 %v2778_v28  ;;  %v2944_v22 = vld [vmem:[%s5860_s8 + $0x8] sm:$0xff] }
 0x238   :  { %2277 = vmatprep.subr.bf16.mxu1 %v4074_v45  ;;  %2875 = vmatprep.subr.mxu0 %v4149_v51  ;;  %v2782_v45 = vld [vmem:[%s5859_s7 + $0x98] sm:$0xff] }
 0x239   :  { %2876 = vmatpush1.msra.mxu0 %v2777_v63 }
 0x23a   :  { %2877 = vmatprep.subr.mxu0 %v4149_v51 }
 0x23b   :  { %2278 = vmatpush1.bf16.msra.mxu1 %v4072_v27  ;;  %2878 = vmatpush1.msra.mxu0 %v2776_v59  ;;  %v2960_v27 = vld [vmem:[%s5860_s8 + $0x88] sm:$0xff] }
 0x23c   :  { %3767 = vmatprep.subr.msk.bf16.mxu1 %vm1931_vm2, %v3766_v57  ;;  %2879 = vmatprep.subr.mxu0 %v4149_v51  ;;  %v2959_v57 = vld [vmem:[%s5860_s8 + $0x80] sm:$0xff]  ;;  %vm2870_vm2 = vcmask 261120  }
 0x23d   :  { %2880 = vmatpush1.msra.mxu0 %v2775_v14 }
 0x23e   :  { %3700 = vmatmul.mubr.msk.bf16.vlgmr.msra.gmra.mxu1 %vm1927_vm1, %v2178_v21  ;;  %2881 = vmatprep.subr.mxu0 %v4149_v51 }
 0x23f   :  { %2621 = vmatpush1.bf16.msra.mxu1 %v2615_v36  ;;  %2652 = vmatprep.mubr.bf16.mxu1 %v4148_v6  ;;  %v4083_v6 = vld [vmem:[%s5857_s5 + $0x220] ss:$8 sps:$4 sm:$0xff]  }
 0x240   :  { %2622 = vmatprep.subr.bf16.mxu1 %v4079_v61  ;;  %2882 = vmatpush1.msra.mxu0 %v2774_v33 }
 0x241   :  { %2883 = vmatprep.subr.mxu0 %v4149_v51 }
 0x242   :  { %2884 = vmatpush1.msra.mxu0 %v2773_v41 }
 0x243   :  { %2623 = vmatpush1.bf16.msra.mxu1 %v4077_v52  ;;  %2885 = vmatprep.subr.mxu0 %v4149_v51 }
 0x244   :  { %2624 = vmatprep.subr.bf16.mxu1 %v4082_v30  ;;  %2886 = vmatpush1.msra.mxu0 %v2772_v0 }
 0x245   :  { %2887 = vmatprep.subr.mxu0 %v4149_v51 }
 0x246   :  { %2888 = vmatpush1.msra.mxu0 %v2771_v29 }
 0x247   :  { %2625 = vmatpush1.bf16.msra.mxu1 %v4080_v19  ;;  %2889 = vmatprep.subr.mxu0 %v4149_v51 }
 0x248   :  { %2626 = vmatprep.subr.bf16.mxu1 %v4085_v8  ;;  %2890 = vmatpush1.msra.mxu0 %v2770_v48 }
 0x249   :  { %2891 = vmatprep.subr.mxu0 %v4149_v51 }
 0x24a   :  { %2892 = vmatpush1.msra.mxu0 %v2769_v54 }
 0x24b   :  { %2627 = vmatpush1.bf16.msra.mxu1 %v4083_v6  ;;  %2893 = vmatprep.subr.mxu0 %v4149_v51 }
 0x24c   :  { %2628 = vmatprep.subr.bf16.mxu1 %v4088_v56  ;;  %2894 = vmatpush1.msra.mxu0 %v2768_v34 }
 0x24d   :  { %2895 = vmatprep.subr.mxu0 %v4149_v51 }
 0x24e   :  { %2896 = vmatpush1.msra.mxu0 %v2767_v31 }
 0x24f   :  { %2629 = vmatpush1.bf16.msra.mxu1 %v4086_v62  ;;  %2897 = vmatprep.subr.mxu0 %v4149_v51 }
 0x250   :  { %2630 = vmatprep.subr.bf16.mxu1 %v4091_v1  ;;  %2898 = vmatpush1.msra.mxu0 %v2766_v9 }
 0x251   :  { %2899 = vmatprep.subr.mxu0 %v4149_v51 }
 0x252   :  { %2900 = vmatpush1.msra.mxu0 %v2765_v15 }
 0x253   :  { %2631 = vmatpush1.bf16.msra.mxu1 %v4089_v49  ;;  %2901 = vmatprep.subr.mxu0 %v4149_v51 }
 0x254   :  { %2632 = vmatprep.subr.bf16.mxu1 %v4094_v43  ;;  %2902 = vmatpush1.msra.mxu0 %v2764_v50 }
 0x255   :  { %2903 = vmatprep.subr.mxu0 %v4149_v51 }
 0x256   :  { %2904 = vmatpush1.msra.mxu0 %v2763_v38 }
 0x257   :  { %2633 = vmatpush1.bf16.msra.mxu1 %v4092_v42  ;;  %2929 = vmatprep.subr.mxu0 %v4149_v51 }
 0x258   :  { %2634 = vmatprep.subr.bf16.mxu1 %v4097_v24  ;;  %2930 = vmatpush2.msra.mxu0 %v2782_v45 }
 0x259   :  { %2931 = vmatprep.subr.mxu0 %v4149_v51 }
 0x25a   :  { %2932 = vmatpush2.msra.mxu0 %v2781_v46 }
 0x25b   :  { %2635 = vmatpush1.bf16.msra.mxu1 %v4095_v44  ;;  %2933 = vmatprep.subr.mxu0 %v4149_v51  ;;  %v2667_v44 = vld [vmem:[%s5858_s6] sm:$0x3] }
 0x25c   :  { %2963 = vmatprep.subr.mxu1 %v4149_v51  ;;  %2934 = vmatpush2.msra.mxu0 %v2780_v35 }
 0x25d   :  { %2935 = vmatprep.subr.mxu0 %v4149_v51 }
 0x25e   :  { %3768 = vmatmul.mubr.msk.bf16.vlgmr.msra.gmra.mxu1 %vm1927_vm1, %v2535_v58  ;;  %v2956_v58 = vld [vmem:[%s5860_s8 + $0x68] sm:$0xff]  ;;  %2936 = vmatpush2.msra.mxu0 %v2779_v23 }
 0x25f   :  { %2964 = vmatpush1.msra.mxu1 %v2958_v12  ;;  %3869 = vmatprep.subr.bf16.mxu0 %v4149_v51 }
 0x260   :  { %2965 = vmatprep.subr.mxu1 %v4149_v51 }
 0x261   :  { %2966 = vmatpush1.msra.mxu1 %v2957_v5 }
 0x262   :  { %2967 = vmatprep.subr.mxu1 %v4149_v51 }
 0x263   :  { %2968 = vmatpush1.msra.mxu1 %v2956_v58 }
 0x264   :  { %2969 = vmatprep.subr.mxu1 %v4149_v51 }
 0x265   :  { %2970 = vmatpush1.msra.mxu1 %v2955_v3  ;;  %v2672_v3 = vrot.slane %v2667_v44, %v4675_v60 }
 0x266   :  { %2971 = vmatprep.subr.mxu1 %v4149_v51 }
 0x267   :  { %2972 = vmatpush1.msra.mxu1 %v2954_v4 }
 0x268   :  { %2973 = vmatprep.subr.mxu1 %v4149_v51 }
 0x269   :  { %2974 = vmatpush1.msra.mxu1 %v2953_v18  ;;  %v2676_v18 = vrot.slane %v2667_v44, %v974_v7 }
 0x26a   :  { %2975 = vmatprep.subr.mxu1 %v4149_v51 }
 0x26b   :  { %2976 = vmatpush1.msra.mxu1 %v2952_v25 }
 0x26c   :  { %2977 = vmatprep.subr.mxu1 %v4149_v51 }
 0x26d   :  { %2978 = vmatpush1.msra.mxu1 %v2951_v16 }
 0x26e   :  { %2979 = vmatprep.subr.mxu1 %v4149_v51 }
 0x26f   :  { %2980 = vmatpush1.msra.mxu1 %v2950_v40 }
 0x270   :  { %2981 = vmatprep.subr.mxu1 %v4149_v51 }
 0x271   :  { %2982 = vmatpush1.msra.mxu1 %v2949_v47 }
 0x272   :  { %2983 = vmatprep.subr.mxu1 %v4149_v51 }
 0x273   :  { %2984 = vmatpush1.msra.mxu1 %v2948_v2 }
 0x274   :  { %2985 = vmatprep.subr.mxu1 %v4149_v51 }
 0x275   :  { %2986 = vmatpush1.msra.mxu1 %v2947_v10 }
 0x276   :  { %2987 = vmatprep.subr.mxu1 %v4149_v51 }
 0x277   :  { %2988 = vmatpush1.msra.mxu1 %v2946_v55 }
 0x278   :  { %2989 = vmatprep.subr.mxu1 %v4149_v51 }
 0x279   :  { %2990 = vmatpush1.msra.mxu1 %v2945_v26 }
 0x27a   :  { %2991 = vmatprep.subr.mxu1 %v4149_v51 }
 0x27b   :  { %2992 = vmatpush1.msra.mxu1 %v2944_v22 }
 0x27c   :  { %2993 = vmatprep.subr.mxu1 %v4149_v51 }
 0x27d   :  { %2994 = vmatpush1.msra.mxu1 %v2943_v37 }
 0x27e   :  { %3019 = vmatprep.subr.mxu1 %v4149_v51 }
 0x27f   :  { %3020 = vmatpush2.msra.mxu1 %v2962_v32 }
 0x280   :  { %3021 = vmatprep.subr.mxu1 %v4149_v51 }
 0x281   :  { %3022 = vmatpush2.msra.mxu1 %v2961_v20 }
 0x282   :  { %3023 = vmatprep.subr.mxu1 %v4149_v51 }
 0x283   :  { %3024 = vmatpush2.msra.mxu1 %v2960_v27 }
 0x284   :  { %3025 = vmatprep.subr.mxu1 %v4149_v51 }
 0x285   :  { %3026 = vmatpush2.msra.mxu1 %v2959_v57 }
 0x286   :  { %3883 = vmatprep.subr.bf16.mxu1 %v4149_v51 }
 0x2d6   :  { %v2116_v21 = vpop.f32.mrf.mxu0 }
 0x2d8   :  { %v2118_v61 = vpop.f32.mrf.mxu0 }
 0x2da   :  { %v2120_v30 = vpop.f32.mrf.mxu0 }
 0x2dc   :  { %v2122_v8 = vpop.f32.mrf.mxu0 }
 0x2de   :  { %v1972_v13 = vpop.f32.mrf.mxu1 }
 0x2df   :  { %v2117_v62 = vadd.f32 %v2116_v21, %v1972_v13 }
 0x2e0   :  { %v1974_v53 = vpop.f32.mrf.mxu1 }
 0x2e1   :  { %v2119_v49 = vadd.f32 %v2118_v61, %v1974_v53 }
 0x2e2   :  { %v1976_v36 = vpop.f32.mrf.mxu1 }
 0x2e3   :  { %v2121_v28 = vadd.f32 %v2120_v30, %v1976_v36 }
 0x2e4   :  { %v1978_v52 = vpop.f32.mrf.mxu1 }
 0x2e5   :  { %v2123_v63 = vadd.f32 %v2122_v8, %v1978_v52 }
 0x2f6   :  { %v2490_v56 = vpop.f32.mrf.mxu0 }
 0x2f8   :  { %v2492_v42 = vpop.f32.mrf.mxu0 }
 0x2fa   :  { %v2494_v59 = vpop.f32.mrf.mxu0 }
 0x2fc   :  { %v2496_v29 = vpop.f32.mrf.mxu0 }
 0x2fe   :  { %v2297_v19 = vpop.f32.mrf.mxu1 }
 0x2ff   :  { %v2306_v43 = vadd.f32 %v2297_v19, %v2117_v62 }
 0x300   :  { %v2299_v6 = vpop.f32.mrf.mxu1 }
 0x301   :  { %v2307_v24 = vadd.f32 %v2299_v6, %v2119_v49  ;;  %v2499_v5 = vadd.f32 %v2490_v56, %v2306_v43 }
 0x302   :  { %v2301_v1 = vpop.f32.mrf.mxu1 }
 0x303   :  { %v2308_v58 = vadd.f32 %v2301_v1, %v2121_v28  ;;  %v2500_v41 = vadd.f32 %v2492_v42, %v2307_v24 }
 0x304   :  { %v2303_v12 = vpop.f32.mrf.mxu1 }
 0x305   :  { %v2309_v33 = vadd.f32 %v2303_v12, %v2123_v63  ;;  %v2501_v16 = vadd.f32 %v2494_v59, %v2308_v58 }
 0x307   :  { %v2502_v47 = vadd.f32 %v2496_v29, %v2309_v33 }
 0x31e   :  { %v2654_v14 = vpop.f32.mrf.mxu1 }
 0x31f   :  { %v2663_v4 = vadd.f32 %v2654_v14, %v2499_v5 }
 0x320   :  { %v2656_v0 = vpop.f32.mrf.mxu1 }
 0x321   :  { %v2664_v25 = vadd.f32 %v2656_v0, %v2500_v41  ;;  %v2679_v40 = vadd.f32 %v2672_v3, %v2663_v4 }
 0x322   :  { %v2658_v48 = vpop.f32.mrf.mxu1 }
 0x323   :  { %v2680_v54 = vadd.f32 %v2676_v18, %v2664_v25  ;;  %v2665_v34 = vadd.f32 %v2658_v48, %v2501_v16 }
 0x324   :  { %v2660_v2 = vpop.f32.mrf.mxu1 }
 0x325   :  { %v2687_v31 = vcombine.low %v2679_v40, %v2680_v54  ;;  %v2688_v10 = vcombine.high %v2679_v40, %v2680_v54  ;;  %v2666_v9 = vadd.f32 %v2660_v2, %v2502_v47  ;;  %v2681_v39 = vadd.f32 %v2672_v3, %v2665_v34  ;;  %v4098_v47 = vld [vmem:[%s5861_s9 + $0x48] sm:$0xff]  }
 0x327   :  { %v2695_v55 = vrot.slane %v2687_v31, %v4711_v17  ;;  %v2702_v15 = vrot.slane %v2688_v10, %v4711_v17  ;;  %v2682_v26 = vadd.f32 %v2676_v18, %v2666_v9  ;;  %v4101_v10 = vld [vmem:[%s5861_s9 + $0x18] sm:$0xff]  }
 0x328   :  { %v4102_v9 = vld [vmem:[%s5861_s9 + $0x38] sm:$0xff]  }
 0x329   :  { %v2703_v7 = vcombine.high %v2695_v55, %v2695_v55  ;;  %v2704_v50 = vcombine.high %v2702_v15, %v2702_v15  ;;  %v3769_v22 = vrot.slane %v2695_v55, 9  ;;  %v3771_v38 = vrot.slane %v2702_v15, 9 }
 0x32a   :  { %v2705_v37 = vcombine.low %v2681_v39, %v2682_v26  ;;  %v2706_v45 = vcombine.high %v2681_v39, %v2682_v26  ;;  %v4105_v26 = vld [vmem:[%s5861_s9 + $0x8] sm:$0xff]  }
 0x32b   :  { %v3770_v32 = vrot.slane %v2703_v7, 9  ;;  %v3772_v46 = vrot.slane %v2704_v50, 9  ;;  %v2755_v20 = vmax.f32 %v2695_v55, %v3769_v22  ;;  %v2757_v57 = vmax.f32 %v2702_v15, %v3771_v38  ;;  %v4103_v55 = vld [vmem:[%s5861_s9 + $0x10] sm:$0xff]   ;;  %v4106_v39 = vld [vmem:[%s5861_s9 + $0x28] sm:$0xff]  }
 0x32c   :  { %v2713_v35 = vrot.slane %v2705_v37, %v4711_v17  ;;  %v2720_v27 = vrot.slane %v2706_v45, %v4711_v17  ;;  %v4104_v15 = vld [vmem:[%s5861_s9 + $0x30] sm:$0xff]  }
 0x32d   :  { %v2756_v23 = vmax.f32 %v2703_v7, %v3770_v32  ;;  %v2758_v13 = vmax.f32 %v2704_v50, %v3772_v46  ;;  %v2794_v36 = vrot.slane %v2755_v20, %v4675_v60  ;;  %v2798_v61 = vrot.slane %v2755_v20, %v4718_v11  ;;  %v4107_v7 = vld [vmem:[%s5861_s9] sm:$0xff]  }
 0x32e   :  { %v2721_v53 = vcombine.high %v2713_v35, %v2713_v35  ;;  %v2722_v21 = vcombine.high %v2720_v27, %v2720_v27  ;;  %v3773_v19 = vrot.slane %v2713_v35, 9  ;;  %v3775_v6 = vrot.slane %v2720_v27, 9 }
 0x32f   :  { %v2802_v52 = vrot.slane %v2756_v23, %v4675_v60  ;;  %v2806_v30 = vrot.slane %v2756_v23, %v4718_v11  ;;  %v2810_v62 = vrot.slane %v2757_v57, %v4675_v60  ;;  %v2814_v17 = vrot.slane %v2757_v57, %v4718_v11 }
 0x330   :  { %v3774_v8 = vrot.slane %v2721_v53, 9  ;;  %v3776_v56 = vrot.slane %v2722_v21, 9  ;;  %v2759_v43 = vmax.f32 %v2713_v35, %v3773_v19  ;;  %v2761_v24 = vmax.f32 %v2720_v27, %v3775_v6  ;;  %v4110_v19 = vld [vmem:[%s5861_s9 + $0x68] sm:$0xff]   ;;  %v4112_v6 = vld [vmem:[%s5861_s9 + $0x60] sm:$0xff]  }
 0x331   :  { %v2862_v1 = vsel %vm1466_vm11, %v2806_v30, %v2798_v61  ;;  %v2855_v49 = vsel %vm1466_vm11, %v2802_v52, %v2794_v36  ;;  %v2822_v44 = vrot.slane %v2758_v13, %v4718_v11  ;;  %v2818_v5 = vrot.slane %v2758_v13, %v4675_v60  ;;  %v4109_v52 = vld [vmem:[%s5861_s9 + $0x98] sm:$0xff]  }
 0x332   :  { %v2760_v42 = vmax.f32 %v2721_v53, %v3774_v8  ;;  %v2762_v28 = vmax.f32 %v2722_v21, %v3776_v56  ;;  %v2863_v12 = vsel %vm1468_vm12, %v2814_v17, %v2862_v1  ;;  %v2856_v63 = vsel %vm1468_vm12, %v2810_v62, %v2855_v49  ;;  %v4108_v21 = vld [vmem:[%s5861_s9 + $0x70] sm:$0xff]   ;;  %v4113_v56 = vld [vmem:[%s5861_s9 + $0x88] sm:$0xff]   ;;  %v4114_v62 = vld [vmem:[%s5861_s9 + $0x58] sm:$0xff]  }
 0x333   :  { %v2826_v59 = vrot.slane %v2759_v43, %v4675_v60  ;;  %v2830_v58 = vrot.slane %v2759_v43, %v4718_v11  ;;  %v2864_v3 = vsel %vm1470_vm13, %v2822_v44, %v2863_v12  ;;  %v2846_v4 = vrot.slane %v2761_v24, %v4718_v11  ;;  %v4111_v8 = vld [vmem:[%s5861_s9 + $0x90] sm:$0xff]   ;;  %v4115_v1 = vld [vmem:[%s5861_s9 + $0x80] sm:$0xff]   ;;  %v4117_v44 = vld [vmem:[%s5861_s9 + $0x78] sm:$0xff]  }
 0x334   :  { %v2838_v14 = vrot.slane %v2760_v42, %v4718_v11  ;;  %v2834_v33 = vrot.slane %v2760_v42, %v4675_v60  ;;  %v2857_v18 = vsel %vm1470_vm13, %v2818_v5, %v2856_v63  ;;  %v2854_v0 = vrot.slane %v2762_v28, %v4718_v11  ;;  %v4099_v11 = vld [vmem:[%s5861_s9 + $0x20] sm:$0xff]   ;;  %v4116_v42 = vld [vmem:[%s5861_s9 + $0x50] sm:$0xff]  }
 0x335   :  { %v2865_v41 = vsel %vm752_vm9, %v2830_v58, %v2864_v3  ;;  %v2842_v29 = vrot.slane %v2761_v24, %v4675_v60  ;;  %v2858_v16 = vsel %vm752_vm9, %v2826_v59, %v2857_v18  ;;  %v2850_v40 = vrot.slane %v2762_v28, %v4675_v60  ;;  %v4100_v60 = vld [vmem:[%s5861_s9 + $0x40] sm:$0xff]   ;;  %v4118_v59 = vld [vmem:[%s5863_s11 + $0x18] ss:$0 sps:$4 sm:$0x11]   ;;  %v4120_v3 = vld [vmem:[%s5863_s11 + $0x8] sm:$0xff]  }
 0x336   :  { %v2866_v25 = vsel %vm1473_vm14, %v2838_v14, %v2865_v41  ;;  %v2859_v54 = vsel %vm1473_vm14, %v2834_v33, %v2858_v16  ;;  %vm4151_vm9 = vmmov 0   ;;  %vm3098_vm12 = vcmask 654336   ;;  %v4119_v14 = vld [vmem:[%s5863_s11 + $0x10] sm:$0xff]   ;;  %v4121_v33 = vld [vmem:[%s5863_s11] sm:$0xff]  }
 0x337   :  { %v2867_v48 = vsel %vm1475_vm15, %v2846_v4, %v2866_v25  ;;  %v2860_v2 = vsel %vm1475_vm15, %v2842_v29, %v2859_v54  ;;  %v3446_v58 = vsel %vm751_vm8, %v4118_v59, 0  ;;  %vm3441_vm8 = vcmask 408576  }
 0x338   :  { %v2868_v34 = vsel %vm1477_vm0, %v2854_v0, %v2867_v48  ;;  %v2861_v31 = vsel %vm1477_vm0, %v2850_v40, %v2860_v2  ;;  %v3833_v2 = vld [vmem:[%s5862_s10] ss:$0 sm:$0xff]  ;;  %s4152_s10 = smov [#allocation2]  }
 0x339   :  { %3777 = vmatprep.mubr.msk.f32.mxu0 %vm2870_vm2, %v2868_v34  ;;  %3778 = vmatprep.mubr.msk.f32.mxu1 %vm2870_vm2, %v2868_v34 }
 0x33a   :  { %2938 = vmatmul.mubr.f32.vlgmr.msra.gmra.mxu0 %v2861_v31  ;;  %3028 = vmatmul.mubr.f32.vlgmr.msra.gmra.mxu1 %v2861_v31 }
 0x33b   :  { %3870 = vmatpush3.bf16.msra.mxu0 %v4098_v47  ;;  %3884 = vmatpush3.bf16.msra.mxu1 %v4099_v11 }
 0x33c   :  { %3871 = vmatprep.subr.bf16.mxu0 %v4149_v51  ;;  %3885 = vmatprep.subr.bf16.mxu1 %v4149_v51 }
 0x33d   :  { %3879 = vmatprep.mubr.msk.bf16.mxu0 %vm4151_vm9, %v4149_v51  ;;  %3893 = vmatprep.mubr.msk.bf16.mxu1 %vm4151_vm9, %v4149_v51 }
 0x33f   :  { %3872 = vmatpush3.bf16.msra.mxu0 %v4100_v60  ;;  %3886 = vmatpush3.bf16.msra.mxu1 %v4101_v10 }
 0x340   :  { %3873 = vmatprep.subr.bf16.mxu0 %v4149_v51  ;;  %3887 = vmatprep.subr.bf16.mxu1 %v4149_v51 }
 0x343   :  { %3874 = vmatpush3.bf16.msra.mxu0 %v4102_v9  ;;  %3888 = vmatpush3.bf16.msra.mxu1 %v4103_v55 }
 0x344   :  { %3875 = vmatprep.subr.bf16.mxu0 %v4149_v51  ;;  %3889 = vmatprep.subr.bf16.mxu1 %v4149_v51 }
 0x347   :  { %3876 = vmatpush3.bf16.msra.mxu0 %v4104_v15  ;;  %3890 = vmatpush3.bf16.msra.mxu1 %v4105_v26 }
 0x348   :  { %3877 = vmatprep.subr.bf16.mxu0 %v4149_v51  ;;  %3891 = vmatprep.subr.bf16.mxu1 %v4149_v51 }
 0x34b   :  { %3878 = vmatpush3.bf16.msra.mxu0 %v4106_v39  ;;  %3892 = vmatpush3.bf16.msra.mxu1 %v4107_v7  ;;  %v3834_v7 = vld [vmem:[%s5864_s12] ss:$0 sm:$0xff]  ;;  %s3509_s12 = sshll.u32 %s4152_s10, 4  ;;  %s3510_s12 = int_to_ptr.vmem [resolvable:$true] %s3509_s12 }
 0x34c   :  { %3897 = vmatprep.subr.bf16.mxu0 %v4149_v51  ;;  %3911 = vmatprep.subr.bf16.mxu1 %v4149_v51  ;;  %s4126_s7 = scalar_lea.vmem %s3510_s12, 32  ;;  %p4131_p1 = scmp.lt.s32.totalorder %s3510_s12, %s3510_s12 }
 0x34d   :  { %p4127_p0 = scmp.ne.s32.totalorder %s3510_s12, %s4126_s7  ;;  %p4132_p2 = scmp.lt.s32.totalorder %s4126_s7, %s4126_s7 }
 0x34f   :  { %p4133_p3 = por %p4132_p2, %p4131_p1 }
 0x351   :  { %p4134_p4 = pnand %p4133_p3, %p4127_p0 }
 0x3fa   :  { %v2939_v50 = vpop.f32.mrf.mxu0  ;;  %v3029_v22 = vpop.f32.mrf.mxu1 }
 0x3fb   :  { %v3033_v38 = vmax.f32 %v2939_v50, %v3029_v22 }
 0x3fc   :  { %v2941_v37 = vpop.f32.mrf.mxu0  ;;  %v3031_v45 = vpop.f32.mrf.mxu1 }
 0x3fd   :  { %v3034_v32 = vmax.f32 %v3033_v38, 0.0 }
 0x3ff   :  { %v3036_v46 = vcombine.high %v3034_v32, %v3034_v32  ;;  %v3038_v20 = vpack.c.bf16 %v3034_v32, %v3034_v32 }
 0x401   :  { %v3039_v35 = vpack.c.bf16 %v3036_v46, %v3036_v46  ;;  %v3063_v27 = vunpack.c.l.b16 %v3038_v20 }
 0x403   :  { %v3064_v23 = vunpack.c.l.b16 %v3039_v35  ;;  %v3065_v57 = vrot.slane %v3063_v27, 1  ;;  %v3229_v49 = vrot.slane %v3063_v27, 2  ;;  %v3318_v24 = vrot.slane %v3063_v27, 3 }
 0x405   :  { %v3066_v13 = vsel %vm1466_vm11, %v3064_v23, %v3065_v57  ;;  %v3142_v53 = vrot.slane %v3064_v23, 7  ;;  %v3230_v17 = vrot.slane %v3064_v23, 1  ;;  %v3319_v43 = vrot.slane %v3064_v23, 2 }
 0x406   :  { %v3067_v36 = vpack.c.b16 %v3066_v13, %v3066_v13 }
 0x407   :  { %v3143_v61 = vsel %vm1466_vm11, %v3142_v53, %v3063_v27  ;;  %v3231_v28 = vsel %vm1466_vm11, %v3230_v17, %v3229_v49  ;;  %v3320_v12 = vsel %vm1466_vm11, %v3319_v43, %v3318_v24  ;;  %vm3488_vm11 = vcmask 74752  }
 0x408   :  { %v3144_v30 = vpack.c.b16 %v3143_v61, %v3143_v61  ;;  %3880 = vmatmul.mubr.msk.bf16.vlgmr.msra.gmra.mxu0 %vm3098_vm12, %v3067_v36  ;;  %v3232_v63 = vpack.c.b16 %v3231_v28, %v3231_v28  ;;  %v3321_v5 = vpack.c.b16 %v3320_v12, %v3320_v12 }
 0x409   :  { %3898 = vmatpush3.bf16.msra.mxu0 %v4108_v21  ;;  %3907 = vmatprep.mubr.msk.bf16.mxu0 %vm4151_vm9, %v4149_v51 }
 0x40a   :  { %3894 = vmatmul.mubr.msk.bf16.vlgmr.msra.gmra.mxu1 %vm3098_vm12, %v3144_v30  ;;  %3899 = vmatprep.subr.bf16.mxu0 %v4149_v51 }
 0x40b   :  { %3912 = vmatpush3.bf16.msra.mxu1 %v4109_v52  ;;  %3921 = vmatprep.mubr.msk.bf16.mxu1 %vm4151_vm9, %v4149_v51 }
 0x40c   :  { %3913 = vmatprep.subr.bf16.mxu1 %v4149_v51 }
 0x40d   :  { %3900 = vmatpush3.bf16.msra.mxu0 %v4110_v19 }
 0x40e   :  { %3901 = vmatprep.subr.bf16.mxu0 %v4149_v51 }
 0x40f   :  { %3914 = vmatpush3.bf16.msra.mxu1 %v4111_v8 }
 0x410   :  { %3915 = vmatprep.subr.bf16.mxu1 %v4149_v51 }
 0x411   :  { %3902 = vmatpush3.bf16.msra.mxu0 %v4112_v6 }
 0x412   :  { %3903 = vmatprep.subr.bf16.mxu0 %v4149_v51 }
 0x413   :  { %3916 = vmatpush3.bf16.msra.mxu1 %v4113_v56 }
 0x414   :  { %3917 = vmatprep.subr.bf16.mxu1 %v4149_v51 }
 0x415   :  { %3904 = vmatpush3.bf16.msra.mxu0 %v4114_v62 }
 0x416   :  { %3905 = vmatprep.subr.bf16.mxu0 %v4149_v51 }
 0x417   :  { %3918 = vmatpush3.bf16.msra.mxu1 %v4115_v1 }
 0x418   :  { %3919 = vmatprep.subr.bf16.mxu1 %v4149_v51 }
 0x419   :  { %3906 = vmatpush3.bf16.msra.mxu0 %v4116_v42 }
 0x41a   :  { %3925 = vmatprep.subr.bf16.mxu0 %v4149_v51 }
 0x41b   :  { %3920 = vmatpush3.bf16.msra.mxu1 %v4117_v44 }
 0x41c   :  { %3908 = vmatmul.mubr.msk.bf16.vlgmr.msra.gmra.mxu0 %vm3098_vm12, %v3232_v63 }
 0x41d   :  { %3933 = vmatprep.mubr.msk.bf16.mxu0 %vm4151_vm9, %v4149_v51  ;;  %3926 = vmatpush3.bf16.msra.mxu0 %v3446_v58 }
 0x41e   :  { %3922 = vmatmul.mubr.msk.bf16.vlgmr.msra.gmra.mxu1 %vm3098_vm12, %v3321_v5  ;;  %3927 = vmatprep.subr.bf16.mxu0 %v4149_v51 }
 0x421   :  { %3928 = vmatpush3.bf16.msra.mxu0 %v4119_v14 }
 0x422   :  { %3929 = vmatprep.subr.bf16.mxu0 %v4149_v51 }
 0x425   :  { %3930 = vmatpush3.bf16.msra.mxu0 %v4120_v3 }
 0x426   :  { %3931 = vmatprep.subr.bf16.mxu0 %v4149_v51 }
 0x429   :  { %3932 = vmatpush3.bf16.msra.mxu0 %v4121_v33 }
 0x4c8   :  { %v3136_v4 = vpop.f32.mrf.mxu0 }
 0x4ca   :  { %v3881_v41 = vpop.f32.mrf.mxu0  ;;  %v3212_v18 = vpop.f32.mrf.mxu1 }
 0x4cb   :  { %v3213_v40 = vadd.f32 %v3212_v18, %v3136_v4 }
 0x4cc   :  { %v3139_v0 = vpop.f32.mrf.mxu0  ;;  %v3895_v25 = vpop.f32.mrf.mxu1 }
 0x4ce   :  { %v3882_v29 = vpop.f32.mrf.mxu0  ;;  %v3215_v16 = vpop.f32.mrf.mxu1 }
 0x4d0   :  { %v3896_v48 = vpop.f32.mrf.mxu1 }
 0x4dc   :  { %v3300_v54 = vpop.f32.mrf.mxu0 }
 0x4dd   :  { %v3306_v47 = vadd.f32 %v3300_v54, %v3213_v40 }
 0x4de   :  { %v3909_v11 = vpop.f32.mrf.mxu0  ;;  %v3389_v34 = vpop.f32.mrf.mxu1 }
 0x4df   :  { %v3395_v31 = vadd.f32 %v3389_v34, %v3306_v47 }
 0x4e0   :  { %v3303_v51 = vpop.f32.mrf.mxu0  ;;  %v3923_v60 = vpop.f32.mrf.mxu1 }
 0x4e1   :  { %v3403_v10 = vadd.f32 %v3833_v2, %v3395_v31 }
 0x4e2   :  { %v3910_v9 = vpop.f32.mrf.mxu0  ;;  %v3392_v55 = vpop.f32.mrf.mxu1 }
 0x4e3   :  { %v3404_v15 = vmax.f32 %v3403_v10, 0.0 }
 0x4e4   :  { %v3924_v26 = vpop.f32.mrf.mxu1 }
 0x4e5   :  { %v3405_v39 = vpack.c.bf16 %v3404_v15, %v3404_v15 }
 0x4e7   :  { %3934 = vmatmul.mubr.msk.bf16.vlgmr.msra.gmra.mxu0 %vm3441_vm8, %v3405_v39 }
 0x5a7   :  { %v3482_v50 = vpop.f32.mrf.mxu0 }
 0x5a8   :  { %v3483_v22 = vadd.f32 %v3834_v7, %v3482_v50 }
 0x5a9   :  { %v3935_v38 = vpop.f32.mrf.mxu0 }
 0x5aa   :  { %v3489_v37 = vsel %vm3488_vm11, %v3483_v22, -inf }
 0x5ab   :  { %3490 = vmax.xlane.f32.xlu0 %v3489_v37  ;;  %v3485_v45 = vpop.f32.mrf.mxu0 }
 0x5ad   :  { %v3936_v32 = vpop.f32.mrf.mxu0 }
 0x634   :  { %v3491_v46 = vpop.xlane.xlu0 %3490 }
 0x635   :  { %v3492_v20 = vsub.f32 %v3483_v22, %v3491_v46 }
 0x637   :  { %v3493_v35 = vmul.f32 1.442695, %v3492_v20 }
 0x639   :  { %4122 = vpow2.f32 %v3493_v35 }
 0x646   :  { %v4123_v27 = vpop.eup %4122 }
 0x647   :  { %v3495_v23 = vsel %vm3488_vm11, %v4123_v27, 0.0 }
 0x648   :  { %3496 = vadd.xlane.f32.xlu0 %v3495_v23 }
 0x6d1   :  { %v3497_v57 = vpop.xlane.xlu0 %3496 }
 0x6d2   :  { %4124 = vlog2.f32 %v3497_v57 }
 0x6df   :  { %v4125_v13 = vpop.eup %4124 }
 0x6e0   :  { %v3499_v53 = vmul.f32 0.6931472, %v4125_v13 }
 0x6e2   :  { %v3500_v21 = vadd.f32 %v3499_v53, %v3491_v46 }
 0x6e4   :  { %v3501_v36 = vsub.f32 %v3483_v22, %v3500_v21 }
 0x6e6   :  { %3502 = vst.msk [vmem:[#allocation2] sm:$0x3] %vm3488_vm11, %v3501_v36 }
 0x6e7   :  { %4137 = shalt.err (!%p4134_p4)
}
 0x6e8   :  { %3512 = dma.vmem_to_hbm [thread:$0]  %s3510_s12, 32, %s5865_s13, [#allocation3]  }
 0x6e9   :  { %4146 = dma.done.wait [#allocation3], 32  }
 0x6ea   :  { %4147 = vsyncadd [#allocation3], 4294967264 }
 0x6eb   :  { %3516 = vsyncpa [#allocation3], 1 }

</bundles_post_ra>
